<compile_context>
chip_gen: v5e
topology: v5e:2x2
jax: 0.10.0
libtpu: 0.0.40
codegen_flags: <defaults>
</compile_context>

<pallas_src>
import functools

import numpy as np
import jax
import jax.numpy as jnp
from jax.experimental import pallas as pl
from jax.experimental.pallas import tpu as pltpu

BN_EPS = 1e-5  # torch.nn.BatchNorm2d default eps


# ---------------------------------------------------------------------------
# pallas_call plumbing: every kernel runs as one full-array VMEM-resident block.
# ---------------------------------------------------------------------------
def _full_spec(shape):
    nd = len(shape)
    return pl.BlockSpec(shape, lambda *_: (0,) * nd)


def _pallas_apply(kernel, out_shape, out_dtype, arrays, cost=None):
    return pl.pallas_call(
        kernel,
        out_shape=jax.ShapeDtypeStruct(out_shape, out_dtype),
        grid=(1,),
        in_specs=[_full_spec(a.shape) for a in arrays],
        out_specs=_full_spec(out_shape),
        compiler_params=pltpu.CompilerParams(dimension_semantics=("arbitrary",)),
        cost_estimate=cost,
    )(*arrays)


# ---------------------------------------------------------------------------
# Pallas kernels
# ---------------------------------------------------------------------------
def conv_bn_relu_kernel(p_ref, w_ref, gb_ref, o_ref):
    """Conv (as matmul, transposed layout) + train-mode BatchNorm2d + ReLU.

    p:  (Cin*KH*KW, R) bf16 patches, R = N*Ho*Wo (lane axis)
    w:  (Cout, Cin*KH*KW) bf16
    gb: (Cout, 2) f32, col 0 = gamma, col 1 = beta
    out:(Cout, R) bf16, lane-dense store.
    Conv bias omitted: train-mode BN mean subtraction cancels it exactly.
    """
    y = jnp.dot(w_ref[...], p_ref[...], preferred_element_type=jnp.float32)
    # Two-pass stats (numerically safe), then ONE affine pass over the big tensor.
    mean = jnp.mean(y, axis=1, keepdims=True)
    var = jnp.mean(jnp.square(y - mean), axis=1, keepdims=True)   # biased, as torch
    scale = gb_ref[:, 0:1] * jax.lax.rsqrt(var + BN_EPS)
    shift = gb_ref[:, 1:2] - mean * scale
    o_ref[...] = jnp.maximum(y * scale + shift, 0.0).astype(o_ref.dtype)


def conv3_tail_kernel(p3_ref, w3_ref, act_ref, slab_ref, o_ref, *, n, s3, off):
    """conv3(+BN+ReLU) + AdaptiveAvgPool + Flatten + Linear(2000,99) + ReLU
    + concat(actions) + 4-layer MLP (tanh x3, sigmoid), all in one kernel.

    p3:   (500, n*s3) bf16 conv3 patches     w3: (5, 500) bf16
    act:  (n, 1) f32                         slab: (rows, 128) f32 packed params
    out:  (n, 1) f32
    """
    S = slab_ref
    # conv3 as matmul in transposed layout
    y = jnp.dot(w3_ref[...], p3_ref[...], preferred_element_type=jnp.float32)  # (5, n*s3)
    # train-mode BN folded to one affine pass (+ReLU); stats over lane axis = (n,ho,wo)
    mean = jnp.mean(y, axis=1, keepdims=True)
    var = jnp.mean(jnp.square(y - mean), axis=1, keepdims=True)
    gb = S[off["gb3"]:off["gb3"] + 5, 0:2]                        # (5, 2)
    scale = gb[:, 0:1] * jax.lax.rsqrt(var + BN_EPS)
    shift = gb[:, 1:2] - mean * scale
    y = jnp.maximum(y * scale + shift, 0.0)                        # (5, n*s3) f32

    # AdaptiveAvgPool2d((20,20)) + Flatten + Linear(2000,99) folded into w_chan
    # (channel-major, 99->128 zero-padded cols).  The (5, n*s3) -> (n, ...) regroup
    # is expressed as 5 accumulated (n, s3) @ (s3, 128) matmuls — no transposes.
    acc = jnp.zeros((n, 128), jnp.float32)
    for c in range(5):
        yc = jnp.concatenate(
            [y[c:c + 1, b * s3:(b + 1) * s3] for b in range(n)], axis=0)        # (n, s3)
        wc = S[off["w_chan"] + c * s3: off["w_chan"] + (c + 1) * s3, :]          # (s3, 128)
        acc = acc + jnp.dot(yc, wc, preferred_element_type=jnp.float32)
    feat = jnp.maximum(acc + S[off["b_lin"]:off["b_lin"] + 1, :], 0.0)           # (n, 128)
    # pad cols 99..127 of feat are exactly 0 (zero weight cols, zero bias).

    # concat-free first MLP layer (ac_dim == 1):
    #   cat(feat99, actions) @ mw1 == feat @ mw1[:99] (zero-padded to 128 rows)
    #                                 + actions * mw1[99]
    a = act_ref[...]                                                             # (n, 1)
    h = jnp.tanh(jnp.dot(feat, S[off["m1f"]:off["m1f"] + 128, 0:30],
                         preferred_element_type=jnp.float32)
                 + a * S[off["m1a"]:off["m1a"] + 1, 0:30]
                 + S[off["mb1"]:off["mb1"] + 1, 0:30])
    h = jnp.tanh(jnp.dot(h, S[off["mw2"]:off["mw2"] + 30, 0:30],
                         preferred_element_type=jnp.float32)
                 + S[off["mb2"]:off["mb2"] + 1, 0:30])
    h = jnp.tanh(jnp.dot(h, S[off["mw3"]:off["mw3"] + 30, 0:30],
                         preferred_element_type=jnp.float32)
                 + S[off["mb3"]:off["mb3"] + 1, 0:30])
    y4 = (jnp.dot(h, S[off["mw4"]:off["mw4"] + 30, 0:1],
                  preferred_element_type=jnp.float32)
          + S[off["mb4"]:off["mb4"] + 1, 0:1])
    o_ref[...] = jax.nn.sigmoid(y4)


# ---------------------------------------------------------------------------
# XLA glue: one fused patches HLO per conv stage (no slice/stack chains)
# ---------------------------------------------------------------------------
def conv_out_hw(h, w, k, s):
    return (h - k) // s + 1, (w - k) // s + 1


def extract_patches(x, k, stride, lhs_spec):
    """VALID, stride-`stride`, k x k patches as ONE HLO.

    x in `lhs_spec` layout ("NCHW" or "CNHW"); returns (C*k*k, N*Ho*Wo) with
    patch-row order (C, KH, KW), matching the pre-flattened conv weights.
    """
    p = jax.lax.conv_general_dilated_patches(
        x, filter_shape=(k, k), window_strides=(stride, stride),
        padding="VALID", dimension_numbers=(lhs_spec, "OIHW", "CNHW"))
    ckk, n, ho, wo = p.shape
    return p.reshape(ckk, n * ho * wo), ho, wo


def adaptive_avg_pool_matrix(h, w, oh, ow):
    """Exact torch AdaptiveAvgPool2d bins as a (h*w, oh*ow) averaging matrix (numpy)."""
    m = np.zeros((h * w, oh * ow), np.float32)
    for i in range(oh):
        sh, eh = (i * h) // oh, -(-((i + 1) * h) // oh)
        for j in range(ow):
            sw, ew = (j * w) // ow, -(-((j + 1) * w) // ow)
            inv = 1.0 / ((eh - sh) * (ew - sw))
            for p in range(sh, eh):
                for q in range(sw, ew):
                    m[p * w + q, i * ow + j] = inv
    return m


def slab_layout(s3):
    """Static row offsets of every tail parameter inside the packed f32 slab."""
    off, r = {}, 0

    def take(name, nrows):
        nonlocal r
        off[name] = r
        r += nrows

    take("w_chan", 5 * s3)   # folded pool+linear weight, channel-major, cols 0..98
    take("b_lin", 1)         # linear bias, cols 0..98
    take("m1f", 128)         # mw1[:99] zero-padded to 128 rows, cols 0..29
    take("m1a", 1)           # mw1[99]
    take("mb1", 1)
    take("mw2", 30)
    take("mb2", 1)
    take("mw3", 30)
    take("mb3", 1)
    take("mw4", 30)          # col 0
    take("mb4", 1)           # col 0
    take("gb3", 5)           # conv3 BN gamma (col 0) / beta (col 1)
    nrows = -(-r // 8) * 8
    return off, nrows


# ---------------------------------------------------------------------------
# Parameters
# ---------------------------------------------------------------------------
def init_params(key):
    ks = jax.random.split(key, 19)

    def dense(k, fan_in, shape):
        return jax.random.normal(k, shape, jnp.float32) / np.sqrt(fan_in)

    p = {}
    # Conv weights pre-flattened as (Cout, Cin*KH*KW), row order (Cin,KH,KW), bf16.
    p["cw1"] = dense(ks[0], 3 * 25, (5, 75)).astype(jnp.bfloat16)    # Conv2d(3,5,5)
    p["g1"] = 1.0 + 0.1 * jax.random.normal(ks[1], (5, 1), jnp.float32)
    p["be1"] = 0.1 * jax.random.normal(ks[2], (5, 1), jnp.float32)
    p["cw2"] = dense(ks[3], 5 * 100, (5, 500)).astype(jnp.bfloat16)  # Conv2d(5,5,10)
    p["g2"] = 1.0 + 0.1 * jax.random.normal(ks[4], (5, 1), jnp.float32)
    p["be2"] = 0.1 * jax.random.normal(ks[5], (5, 1), jnp.float32)
    p["cw3"] = dense(ks[6], 5 * 100, (5, 500)).astype(jnp.bfloat16)  # Conv2d(5,5,10)
    p["g3"] = 1.0 + 0.1 * jax.random.normal(ks[7], (5, 1), jnp.float32)
    p["be3"] = 0.1 * jax.random.normal(ks[8], (5, 1), jnp.float32)
    # NOTE: conv biases omitted — cancelled exactly by train-mode BN mean subtraction.
    p["fw"] = dense(ks[9], 2000, (2000, 99))                         # Linear(2000,99)
    p["fb"] = 0.01 * jax.random.normal(ks[10], (1, 99), jnp.float32)
    # mlp_classifier: Linear(100,30) tanh x3, Linear(30,1) sigmoid
    p["mw1"] = dense(ks[11], 100, (100, 30))
    p["mb1"] = 0.01 * jax.random.normal(ks[12], (1, 30), jnp.float32)
    p["mw2"] = dense(ks[13], 30, (30, 30))
    p["mb2"] = 0.01 * jax.random.normal(ks[14], (1, 30), jnp.float32)
    p["mw3"] = dense(ks[15], 30, (30, 30))
    p["mb3"] = 0.01 * jax.random.normal(ks[16], (1, 30), jnp.float32)
    p["mw4"] = dense(ks[17], 30, (30, 1))
    p["mb4"] = 0.01 * jax.random.normal(ks[18], (1, 1), jnp.float32)
    return p


def prepare_params(params, img_hw):
    """One-time, outside-jit folding / padding / packing of all parameters."""
    h, w = img_hw
    h1, w1 = conv_out_hw(h, w, 5, 2)
    h2, w2 = conv_out_hw(h1, w1, 10, 2)
    h3, w3 = conv_out_hw(h2, w2, 10, 2)
    s3 = h3 * w3
    off, nrows = slab_layout(s3)

    # Fold AdaptiveAvgPool2d((20,20)) + Flatten(C,H,W order) + Linear(2000,99)
    # into one channel-major weight: w_chan[c*s3+s, k] = sum_p pool[s,p]*fw[c*400+p, k]
    pool_m = adaptive_avg_pool_matrix(h3, w3, 20, 20)                  # (s3, 400)
    fw = np.asarray(params["fw"], np.float32).reshape(5, 400, 99)
    w_chan = np.einsum("sp,cpk->csk", pool_m, fw).reshape(5 * s3, 99)

    slab = np.zeros((nrows, 128), np.float32)
    slab[off["w_chan"]:off["w_chan"] + 5 * s3, :99] = w_chan
    slab[off["b_lin"], :99] = np.asarray(params["fb"], np.float32).reshape(-1)
    mw1 = np.asarray(params["mw1"], np.float32)
    slab[off["m1f"]:off["m1f"] + 99, :30] = mw1[:99]
    slab[off["m1a"], :30] = mw1[99]
    slab[off["mb1"], :30] = np.asarray(params["mb1"], np.float32).reshape(-1)
    slab[off["mw2"]:off["mw2"] + 30, :30] = np.asarray(params["mw2"], np.float32)
    slab[off["mb2"], :30] = np.asarray(params["mb2"], np.float32).reshape(-1)
    slab[off["mw3"]:off["mw3"] + 30, :30] = np.asarray(params["mw3"], np.float32)
    slab[off["mb3"], :30] = np.asarray(params["mb3"], np.float32).reshape(-1)
    slab[off["mw4"]:off["mw4"] + 30, :1] = np.asarray(params["mw4"], np.float32)
    slab[off["mb4"], :1] = np.asarray(params["mb4"], np.float32).reshape(-1)
    slab[off["gb3"]:off["gb3"] + 5, 0] = np.asarray(params["g3"], np.float32).reshape(-1)
    slab[off["gb3"]:off["gb3"] + 5, 1] = np.asarray(params["be3"], np.float32).reshape(-1)

    return {
        "cw1": params["cw1"], "cw2": params["cw2"], "cw3": params["cw3"],
        "gb1": jnp.concatenate([params["g1"], params["be1"]], axis=1),   # (5, 2) f32
        "gb2": jnp.concatenate([params["g2"], params["be2"]], axis=1),   # (5, 2) f32
        "slab": jnp.asarray(slab),                                       # (nrows, 128) f32
    }


# ---------------------------------------------------------------------------
# Kernel call wrappers
# ---------------------------------------------------------------------------
def _conv_call(patches, w, gb):
    cout, k = w.shape
    r = patches.shape[1]
    cost = pl.CostEstimate(
        flops=2 * cout * k * r + 8 * cout * r,
        transcendentals=cout,  # rsqrt per channel
        bytes_accessed=patches.size * 2 + w.size * 2 + cout * r * 2 + gb.size * 4)
    return _pallas_apply(conv_bn_relu_kernel, (cout, r), jnp.bfloat16,
                         [patches, w, gb], cost=cost)


# ---------------------------------------------------------------------------
# FeatureExtractor.forward(observation, actions)
# ---------------------------------------------------------------------------
def feature_extractor_forward(prepared, observation, actions):
    n = observation.shape[0]
    x = observation.astype(jnp.bfloat16)

    # Conv2d(3,5,5,stride=2) + BN + ReLU  (output (5, N*46*46), lane-dense)
    p1, h1, w1 = extract_patches(x, 5, 2, "NCHW")
    y1 = _conv_call(p1, prepared["cw1"], prepared["gb1"])

    # Conv2d(5,5,10,stride=2) + BN + ReLU (output (5, N*19*19))
    p2, h2, w2 = extract_patches(y1.reshape(5, n, h1, w1), 10, 2, "CNHW")
    y2 = _conv_call(p2, prepared["cw2"], prepared["gb2"])

    # Fused tail: conv3+BN+ReLU + pool/flatten/linear + ReLU + concat(actions) + MLP
    p3, h3, w3 = extract_patches(y2.reshape(5, n, h2, w2), 10, 2, "CNHW")
    s3 = h3 * w3
    off, _ = slab_layout(s3)
    slab = prepared["slab"]
    kern = functools.partial(conv3_tail_kernel, n=n, s3=s3, off=off)
    cost = pl.CostEstimate(
        flops=(2 * 5 * 500 * n * s3 + 2 * n * 5 * s3 * 128
               + 2 * n * 128 * 30 + 4 * n * 30 * 30 + 2 * n * 30),
        transcendentals=5 + n * (3 * 30 + 1),
        bytes_accessed=p3.size * 2 + 5 * 500 * 2 + slab.size * 4 + n * 4 + n * 4)
    out = _pallas_apply(kern, (n, 1), jnp.float32,
                        [p3, prepared["cw3"], actions.astype(jnp.float32), slab],
                        cost=cost)
    return out


if __name__ == "__main__":
    key = jax.random.PRNGKey(0)
    k_param, k_obs, k_act = jax.random.split(key, 3)

    params = init_params(k_param)
    # Conv stack needs H, W >= 59; 96x96 gives conv3 output 5x5. ac_dim == 1.
    observation = jax.random.normal(k_obs, (2, 3, 96, 96), jnp.float32)  # NCHW
    actions = jax.random.normal(k_act, (2, 1), jnp.float32)

    prepared = prepare_params(params, img_hw=(96, 96))   # one-time, outside jit

    fwd = jax.jit(feature_extractor_forward)
    out = jax.block_until_ready(fwd(prepared, observation, actions))

    assert out.shape == (2, 1)
    assert bool(jnp.all(jnp.isfinite(out)))
    assert bool(jnp.all((out > 0.0) & (out < 1.0)))   # sigmoid output range
    print("KERNEL_OK")
</pallas_src>

<mosaic_0001>
module attributes {stable_mosaic.version = 11 : i64} {
  func.func @conv_bn_relu_kernel(%arg0: i32, %arg1: memref<75x4232xbf16, #tpu.memory_space<vmem>>, %arg2: memref<5x75xbf16, #tpu.memory_space<vmem>>, %arg3: memref<5x2xf32, #tpu.memory_space<vmem>>, %arg4: memref<5x4232xbf16, #tpu.memory_space<vmem>>) attributes {dimension_semantics = [#tpu.dimension_semantics<arbitrary>], iteration_bounds = array<i64: 1>, scalar_prefetch = 0 : i64, scratch_operands = 0 : i64, tpu.core_type = #tpu.core_type<tc>, window_params = [{pipeline_mode = #tpu.pipeline_mode<synchronous>, transform_indices = @transform_0, window_bounds = array<i64: 75, 4232>}, {pipeline_mode = #tpu.pipeline_mode<synchronous>, transform_indices = @transform_1, window_bounds = array<i64: 5, 75>}, {pipeline_mode = #tpu.pipeline_mode<synchronous>, transform_indices = @transform_2, window_bounds = array<i64: 5, 2>}, {pipeline_mode = #tpu.pipeline_mode<synchronous>, transform_indices = @transform_3, window_bounds = array<i64: 5, 4232>}]} {
    %c0 = arith.constant 0 : index
    %c0_0 = arith.constant 0 : index
    %0 = vector.load %arg2[%c0, %c0_0] : memref<5x75xbf16, #tpu.memory_space<vmem>>, vector<5x75xbf16>
    %c0_1 = arith.constant 0 : index
    %c0_2 = arith.constant 0 : index
    %1 = vector.load %arg1[%c0_1, %c0_2] : memref<75x4232xbf16, #tpu.memory_space<vmem>>, vector<75x4232xbf16>
    %cst = arith.constant dense<0.000000e+00> : vector<5x4232xf32>
    %2 = tpu.matmul %0, %1, %cst {dimension_numbers = #tpu.dot_dimension_numbers<[1], [0], [0], [1], [0, 0, 1, 1], [], []>} : vector<5x75xbf16>, vector<75x4232xbf16>, vector<5x4232xf32> -> vector<5x4232xf32>
    %cst_3 = arith.constant dense<0.000000e+00> : vector<5xf32>
    %3 = vector.multi_reduction <add>, %2, %cst_3 [1] : vector<5x4232xf32> to vector<5xf32>
    %4 = vector.shape_cast %3 : vector<5xf32> to vector<5x1xf32>
    %cst_4 = arith.constant 4.232000e+03 : f32
    %5 = vector.broadcast %cst_4 : f32 to vector<5x1xf32>
    %6 = arith.divf %4, %5 : vector<5x1xf32>
    %7 = vector.broadcast %6 : vector<5x1xf32> to vector<5x4232xf32>
    %8 = arith.subf %2, %7 : vector<5x4232xf32>
    %9 = arith.mulf %8, %8 : vector<5x4232xf32>
    %cst_5 = arith.constant dense<0.000000e+00> : vector<5xf32>
    %10 = vector.multi_reduction <add>, %9, %cst_5 [1] : vector<5x4232xf32> to vector<5xf32>
    %11 = vector.shape_cast %10 : vector<5xf32> to vector<5x1xf32>
    %cst_6 = arith.constant 4.232000e+03 : f32
    %12 = vector.broadcast %cst_6 : f32 to vector<5x1xf32>
    %13 = arith.divf %11, %12 : vector<5x1xf32>
    %c0_7 = arith.constant 0 : index
    %c0_8 = arith.constant 0 : index
    %14 = vector.load %arg3[%c0_7, %c0_8] : memref<5x2xf32, #tpu.memory_space<vmem>>, vector<5x1xf32>
    %cst_9 = arith.constant 9.99999974E-6 : f32
    %15 = vector.broadcast %cst_9 : f32 to vector<5x1xf32>
    %16 = arith.addf %13, %15 : vector<5x1xf32>
    %17 = math.rsqrt %16 : vector<5x1xf32>
    %18 = arith.mulf %14, %17 : vector<5x1xf32>
    %c0_10 = arith.constant 0 : index
    %c1 = arith.constant 1 : index
    %19 = vector.load %arg3[%c0_10, %c1] : memref<5x2xf32, #tpu.memory_space<vmem>>, vector<5x1xf32>
    %20 = arith.mulf %6, %18 : vector<5x1xf32>
    %21 = arith.subf %19, %20 : vector<5x1xf32>
    %22 = vector.broadcast %18 : vector<5x1xf32> to vector<5x4232xf32>
    %23 = arith.mulf %2, %22 : vector<5x4232xf32>
    %24 = vector.broadcast %21 : vector<5x1xf32> to vector<5x4232xf32>
    %25 = arith.addf %23, %24 : vector<5x4232xf32>
    %cst_11 = arith.constant 0.000000e+00 : f32
    %26 = vector.broadcast %cst_11 : f32 to vector<5x4232xf32>
    %27 = arith.maximumf %25, %26 : vector<5x4232xf32>
    %28 = arith.truncf %27 : vector<5x4232xf32> to vector<5x4232xbf16>
    %c0_12 = arith.constant 0 : index
    %c0_13 = arith.constant 0 : index
    %29 = vector.load %arg4[%c0_12, %c0_13] : memref<5x4232xbf16, #tpu.memory_space<vmem>>, vector<5x4232xbf16>
    tpu.vector_store %arg4[%c0_12, %c0_13], %28 {strides = array<i32>} : memref<5x4232xbf16, #tpu.memory_space<vmem>>, vector<5x4232xbf16>,
    return
  }
  func.func @transform_0(%arg0: i32) -> (i32, i32) {
    %c0_i32 = arith.constant 0 : i32
    %c0_i32_0 = arith.constant 0 : i32
    %c0_i32_1 = arith.constant 0 : i32
    return %c0_i32, %c0_i32_0 : i32, i32
  }
  func.func @transform_1(%arg0: i32) -> (i32, i32) {
    %c0_i32 = arith.constant 0 : i32
    %c0_i32_0 = arith.constant 0 : i32
    %c0_i32_1 = arith.constant 0 : i32
    return %c0_i32, %c0_i32_0 : i32, i32
  }
  func.func @transform_2(%arg0: i32) -> (i32, i32) {
    %c0_i32 = arith.constant 0 : i32
    %c0_i32_0 = arith.constant 0 : i32
    %c0_i32_1 = arith.constant 0 : i32
    return %c0_i32, %c0_i32_0 : i32, i32
  }
  func.func @transform_3(%arg0: i32) -> (i32, i32) {
    %c0_i32 = arith.constant 0 : i32
    %c0_i32_0 = arith.constant 0 : i32
    %c0_i32_1 = arith.constant 0 : i32
    return %c0_i32, %c0_i32_0 : i32, i32
  }
}

module attributes {stable_mosaic.version = 11 : i64} {
  func.func @conv_bn_relu_kernel(%arg0: i32, %arg1: memref<500x722xbf16, #tpu.memory_space<vmem>>, %arg2: memref<5x500xbf16, #tpu.memory_space<vmem>>, %arg3: memref<5x2xf32, #tpu.memory_space<vmem>>, %arg4: memref<5x722xbf16, #tpu.memory_space<vmem>>) attributes {dimension_semantics = [#tpu.dimension_semantics<arbitrary>], iteration_bounds = array<i64: 1>, scalar_prefetch = 0 : i64, scratch_operands = 0 : i64, tpu.core_type = #tpu.core_type<tc>, window_params = [{pipeline_mode = #tpu.pipeline_mode<synchronous>, transform_indices = @transform_0, window_bounds = array<i64: 500, 722>}, {pipeline_mode = #tpu.pipeline_mode<synchronous>, transform_indices = @transform_1, window_bounds = array<i64: 5, 500>}, {pipeline_mode = #tpu.pipeline_mode<synchronous>, transform_indices = @transform_2, window_bounds = array<i64: 5, 2>}, {pipeline_mode = #tpu.pipeline_mode<synchronous>, transform_indices = @transform_3, window_bounds = array<i64: 5, 722>}]} {
    %c0 = arith.constant 0 : index
    %c0_0 = arith.constant 0 : index
    %0 = vector.load %arg2[%c0, %c0_0] : memref<5x500xbf16, #tpu.memory_space<vmem>>, vector<5x500xbf16>
    %c0_1 = arith.constant 0 : index
    %c0_2 = arith.constant 0 : index
    %1 = vector.load %arg1[%c0_1, %c0_2] : memref<500x722xbf16, #tpu.memory_space<vmem>>, vector<500x722xbf16>
    %cst = arith.constant dense<0.000000e+00> : vector<5x722xf32>
    %2 = tpu.matmul %0, %1, %cst {dimension_numbers = #tpu.dot_dimension_numbers<[1], [0], [0], [1], [0, 0, 1, 1], [], []>} : vector<5x500xbf16>, vector<500x722xbf16>, vector<5x722xf32> -> vector<5x722xf32>
    %cst_3 = arith.constant dense<0.000000e+00> : vector<5xf32>
    %3 = vector.multi_reduction <add>, %2, %cst_3 [1] : vector<5x722xf32> to vector<5xf32>
    %4 = vector.shape_cast %3 : vector<5xf32> to vector<5x1xf32>
    %cst_4 = arith.constant 7.220000e+02 : f32
    %5 = vector.broadcast %cst_4 : f32 to vector<5x1xf32>
    %6 = arith.divf %4, %5 : vector<5x1xf32>
    %7 = vector.broadcast %6 : vector<5x1xf32> to vector<5x722xf32>
    %8 = arith.subf %2, %7 : vector<5x722xf32>
    %9 = arith.mulf %8, %8 : vector<5x722xf32>
    %cst_5 = arith.constant dense<0.000000e+00> : vector<5xf32>
    %10 = vector.multi_reduction <add>, %9, %cst_5 [1] : vector<5x722xf32> to vector<5xf32>
    %11 = vector.shape_cast %10 : vector<5xf32> to vector<5x1xf32>
    %cst_6 = arith.constant 7.220000e+02 : f32
    %12 = vector.broadcast %cst_6 : f32 to vector<5x1xf32>
    %13 = arith.divf %11, %12 : vector<5x1xf32>
    %c0_7 = arith.constant 0 : index
    %c0_8 = arith.constant 0 : index
    %14 = vector.load %arg3[%c0_7, %c0_8] : memref<5x2xf32, #tpu.memory_space<vmem>>, vector<5x1xf32>
    %cst_9 = arith.constant 9.99999974E-6 : f32
    %15 = vector.broadcast %cst_9 : f32 to vector<5x1xf32>
    %16 = arith.addf %13, %15 : vector<5x1xf32>
    %17 = math.rsqrt %16 : vector<5x1xf32>
    %18 = arith.mulf %14, %17 : vector<5x1xf32>
    %c0_10 = arith.constant 0 : index
    %c1 = arith.constant 1 : index
    %19 = vector.load %arg3[%c0_10, %c1] : memref<5x2xf32, #tpu.memory_space<vmem>>, vector<5x1xf32>
    %20 = arith.mulf %6, %18 : vector<5x1xf32>
    %21 = arith.subf %19, %20 : vector<5x1xf32>
    %22 = vector.broadcast %18 : vector<5x1xf32> to vector<5x722xf32>
    %23 = arith.mulf %2, %22 : vector<5x722xf32>
    %24 = vector.broadcast %21 : vector<5x1xf32> to vector<5x722xf32>
    %25 = arith.addf %23, %24 : vector<5x722xf32>
    %cst_11 = arith.constant 0.000000e+00 : f32
    %26 = vector.broadcast %cst_11 : f32 to vector<5x722xf32>
    %27 = arith.maximumf %25, %26 : vector<5x722xf32>
    %28 = arith.truncf %27 : vector<5x722xf32> to vector<5x722xbf16>
    %c0_12 = arith.constant 0 : index
    %c0_13 = arith.constant 0 : index
    %29 = vector.load %arg4[%c0_12, %c0_13] : memref<5x722xbf16, #tpu.memory_space<vmem>>, vector<5x722xbf16>
    tpu.vector_store %arg4[%c0_12, %c0_13], %28 {strides = array<i32>} : memref<5x722xbf16, #tpu.memory_space<vmem>>, vector<5x722xbf16>,
    return
  }
  func.func @transform_0(%arg0: i32) -> (i32, i32) {
    %c0_i32 = arith.constant 0 : i32
    %c0_i32_0 = arith.constant 0 : i32
    %c0_i32_1 = arith.constant 0 : i32
    return %c0_i32, %c0_i32_0 : i32, i32
  }
  func.func @transform_1(%arg0: i32) -> (i32, i32) {
    %c0_i32 = arith.constant 0 : i32
    %c0_i32_0 = arith.constant 0 : i32
    %c0_i32_1 = arith.constant 0 : i32
    return %c0_i32, %c0_i32_0 : i32, i32
  }
  func.func @transform_2(%arg0: i32) -> (i32, i32) {
    %c0_i32 = arith.constant 0 : i32
    %c0_i32_0 = arith.constant 0 : i32
    %c0_i32_1 = arith.constant 0 : i32
    return %c0_i32, %c0_i32_0 : i32, i32
  }
  func.func @transform_3(%arg0: i32) -> (i32, i32) {
    %c0_i32 = arith.constant 0 : i32
    %c0_i32_0 = arith.constant 0 : i32
    %c0_i32_1 = arith.constant 0 : i32
    return %c0_i32, %c0_i32_0 : i32, i32
  }
}

module attributes {stable_mosaic.version = 11 : i64} {
  func.func @conv3_tail_kernel(%arg0: i32, %arg1: memref<500x50xbf16, #tpu.memory_space<vmem>>, %arg2: memref<5x500xbf16, #tpu.memory_space<vmem>>, %arg3: memref<2x1xf32, #tpu.memory_space<vmem>>, %arg4: memref<360x128xf32, #tpu.memory_space<vmem>>, %arg5: memref<2x1xf32, #tpu.memory_space<vmem>>) attributes {dimension_semantics = [#tpu.dimension_semantics<arbitrary>], iteration_bounds = array<i64: 1>, scalar_prefetch = 0 : i64, scratch_operands = 0 : i64, tpu.core_type = #tpu.core_type<tc>, window_params = [{pipeline_mode = #tpu.pipeline_mode<synchronous>, transform_indices = @transform_0, window_bounds = array<i64: 500, 50>}, {pipeline_mode = #tpu.pipeline_mode<synchronous>, transform_indices = @transform_1, window_bounds = array<i64: 5, 500>}, {pipeline_mode = #tpu.pipeline_mode<synchronous>, transform_indices = @transform_2, window_bounds = array<i64: 2, 1>}, {pipeline_mode = #tpu.pipeline_mode<synchronous>, transform_indices = @transform_3, window_bounds = array<i64: 360, 128>}, {pipeline_mode = #tpu.pipeline_mode<synchronous>, transform_indices = @transform_4, window_bounds = array<i64: 2, 1>}]} {
    %c0 = arith.constant 0 : index
    %c0_0 = arith.constant 0 : index
    %0 = vector.load %arg2[%c0, %c0_0] : memref<5x500xbf16, #tpu.memory_space<vmem>>, vector<5x500xbf16>
    %c0_1 = arith.constant 0 : index
    %c0_2 = arith.constant 0 : index
    %1 = vector.load %arg1[%c0_1, %c0_2] : memref<500x50xbf16, #tpu.memory_space<vmem>>, vector<500x50xbf16>
    %cst = arith.constant dense<0.000000e+00> : vector<5x50xf32>
    %2 = tpu.matmul %0, %1, %cst {dimension_numbers = #tpu.dot_dimension_numbers<[1], [0], [0], [1], [0, 0, 1, 1], [], []>} : vector<5x500xbf16>, vector<500x50xbf16>, vector<5x50xf32> -> vector<5x50xf32>
    %cst_3 = arith.constant dense<0.000000e+00> : vector<5xf32>
    %3 = vector.multi_reduction <add>, %2, %cst_3 [1] : vector<5x50xf32> to vector<5xf32>
    %4 = vector.shape_cast %3 : vector<5xf32> to vector<5x1xf32>
    %cst_4 = arith.constant 5.000000e+01 : f32
    %5 = vector.broadcast %cst_4 : f32 to vector<5x1xf32>
    %6 = arith.divf %4, %5 : vector<5x1xf32>
    %7 = vector.broadcast %6 : vector<5x1xf32> to vector<5x50xf32>
    %8 = arith.subf %2, %7 : vector<5x50xf32>
    %9 = arith.mulf %8, %8 : vector<5x50xf32>
    %cst_5 = arith.constant dense<0.000000e+00> : vector<5xf32>
    %10 = vector.multi_reduction <add>, %9, %cst_5 [1] : vector<5x50xf32> to vector<5xf32>
    %11 = vector.shape_cast %10 : vector<5xf32> to vector<5x1xf32>
    %cst_6 = arith.constant 5.000000e+01 : f32
    %12 = vector.broadcast %cst_6 : f32 to vector<5x1xf32>
    %13 = arith.divf %11, %12 : vector<5x1xf32>
    %c349 = arith.constant 349 : index
    %c0_7 = arith.constant 0 : index
    %14 = vector.load %arg4[%c349, %c0_7] : memref<360x128xf32, #tpu.memory_space<vmem>>, vector<5x2xf32>
    %15 = vector.extract_strided_slice %14 {offsets = [0, 0], sizes = [5, 1], strides = [1, 1]} : vector<5x2xf32> to vector<5x1xf32>
    %cst_8 = arith.constant 9.99999974E-6 : f32
    %16 = vector.broadcast %cst_8 : f32 to vector<5x1xf32>
    %17 = arith.addf %13, %16 : vector<5x1xf32>
    %18 = math.rsqrt %17 : vector<5x1xf32>
    %19 = arith.mulf %15, %18 : vector<5x1xf32>
    %20 = vector.extract_strided_slice %14 {offsets = [0, 1], sizes = [5, 1], strides = [1, 1]} : vector<5x2xf32> to vector<5x1xf32>
    %21 = arith.mulf %6, %19 : vector<5x1xf32>
    %22 = arith.subf %20, %21 : vector<5x1xf32>
    %23 = vector.broadcast %19 : vector<5x1xf32> to vector<5x50xf32>
    %24 = arith.mulf %2, %23 : vector<5x50xf32>
    %25 = vector.broadcast %22 : vector<5x1xf32> to vector<5x50xf32>
    %26 = arith.addf %24, %25 : vector<5x50xf32>
    %cst_9 = arith.constant 0.000000e+00 : f32
    %27 = vector.broadcast %cst_9 : f32 to vector<5x50xf32>
    %28 = arith.maximumf %26, %27 : vector<5x50xf32>
    %cst_10 = arith.constant 0.000000e+00 : f32
    %29 = vector.broadcast %cst_10 : f32 to vector<2x128xf32>
    %30 = vector.extract_strided_slice %28 {offsets = [0, 0], sizes = [1, 25], strides = [1, 1]} : vector<5x50xf32> to vector<1x25xf32>
    %31 = vector.extract_strided_slice %28 {offsets = [0, 25], sizes = [1, 25], strides = [1, 1]} : vector<5x50xf32> to vector<1x25xf32>
    %32 = tpu.concatenate %30, %31 in 0 : vector<1x25xf32>, vector<1x25xf32> -> vector<2x25xf32>
    %c0_11 = arith.constant 0 : index
    %c0_12 = arith.constant 0 : index
    %33 = vector.load %arg4[%c0_11, %c0_12] : memref<360x128xf32, #tpu.memory_space<vmem>>, vector<25x128xf32>
    %cst_13 = arith.constant dense<0.000000e+00> : vector<2x128xf32>
    %34 = tpu.matmul %32, %33, %cst_13 {dimension_numbers = #tpu.dot_dimension_numbers<[1], [0], [0], [1], [0, 0, 1, 1], [], []>} : vector<2x25xf32>, vector<25x128xf32>, vector<2x128xf32> -> vector<2x128xf32>
    %35 = arith.addf %29, %34 : vector<2x128xf32>
    %36 = vector.extract_strided_slice %28 {offsets = [1, 0], sizes = [1, 25], strides = [1, 1]} : vector<5x50xf32> to vector<1x25xf32>
    %37 = vector.extract_strided_slice %28 {offsets = [1, 25], sizes = [1, 25], strides = [1, 1]} : vector<5x50xf32> to vector<1x25xf32>
    %38 = tpu.concatenate %36, %37 in 0 : vector<1x25xf32>, vector<1x25xf32> -> vector<2x25xf32>
    %c25 = arith.constant 25 : index
    %c0_14 = arith.constant 0 : index
    %39 = vector.load %arg4[%c25, %c0_14] : memref<360x128xf32, #tpu.memory_space<vmem>>, vector<25x128xf32>
    %cst_15 = arith.constant dense<0.000000e+00> : vector<2x128xf32>
    %40 = tpu.matmul %38, %39, %cst_15 {dimension_numbers = #tpu.dot_dimension_numbers<[1], [0], [0], [1], [0, 0, 1, 1], [], []>} : vector<2x25xf32>, vector<25x128xf32>, vector<2x128xf32> -> vector<2x128xf32>
    %41 = arith.addf %35, %40 : vector<2x128xf32>
    %42 = vector.extract_strided_slice %28 {offsets = [2, 0], sizes = [1, 25], strides = [1, 1]} : vector<5x50xf32> to vector<1x25xf32>
    %43 = vector.extract_strided_slice %28 {offsets = [2, 25], sizes = [1, 25], strides = [1, 1]} : vector<5x50xf32> to vector<1x25xf32>
    %44 = tpu.concatenate %42, %43 in 0 : vector<1x25xf32>, vector<1x25xf32> -> vector<2x25xf32>
    %c50 = arith.constant 50 : index
    %c0_16 = arith.constant 0 : index
    %45 = vector.load %arg4[%c50, %c0_16] : memref<360x128xf32, #tpu.memory_space<vmem>>, vector<25x128xf32>
    %cst_17 = arith.constant dense<0.000000e+00> : vector<2x128xf32>
    %46 = tpu.matmul %44, %45, %cst_17 {dimension_numbers = #tpu.dot_dimension_numbers<[1], [0], [0], [1], [0, 0, 1, 1], [], []>} : vector<2x25xf32>, vector<25x128xf32>, vector<2x128xf32> -> vector<2x128xf32>
    %47 = arith.addf %41, %46 : vector<2x128xf32>
    %48 = vector.extract_strided_slice %28 {offsets = [3, 0], sizes = [1, 25], strides = [1, 1]} : vector<5x50xf32> to vector<1x25xf32>
    %49 = vector.extract_strided_slice %28 {offsets = [3, 25], sizes = [1, 25], strides = [1, 1]} : vector<5x50xf32> to vector<1x25xf32>
    %50 = tpu.concatenate %48, %49 in 0 : vector<1x25xf32>, vector<1x25xf32> -> vector<2x25xf32>
    %c75 = arith.constant 75 : index
    %c0_18 = arith.constant 0 : index
    %51 = vector.load %arg4[%c75, %c0_18] : memref<360x128xf32, #tpu.memory_space<vmem>>, vector<25x128xf32>
    %cst_19 = arith.constant dense<0.000000e+00> : vector<2x128xf32>
    %52 = tpu.matmul %50, %51, %cst_19 {dimension_numbers = #tpu.dot_dimension_numbers<[1], [0], [0], [1], [0, 0, 1, 1], [], []>} : vector<2x25xf32>, vector<25x128xf32>, vector<2x128xf32> -> vector<2x128xf32>
    %53 = arith.addf %47, %52 : vector<2x128xf32>
    %54 = vector.extract_strided_slice %28 {offsets = [4, 0], sizes = [1, 25], strides = [1, 1]} : vector<5x50xf32> to vector<1x25xf32>
    %55 = vector.extract_strided_slice %28 {offsets = [4, 25], sizes = [1, 25], strides = [1, 1]} : vector<5x50xf32> to vector<1x25xf32>
    %56 = tpu.concatenate %54, %55 in 0 : vector<1x25xf32>, vector<1x25xf32> -> vector<2x25xf32>
    %c100 = arith.constant 100 : index
    %c0_20 = arith.constant 0 : index
    %57 = vector.load %arg4[%c100, %c0_20] : memref<360x128xf32, #tpu.memory_space<vmem>>, vector<25x128xf32>
    %cst_21 = arith.constant dense<0.000000e+00> : vector<2x128xf32>
    %58 = tpu.matmul %56, %57, %cst_21 {dimension_numbers = #tpu.dot_dimension_numbers<[1], [0], [0], [1], [0, 0, 1, 1], [], []>} : vector<2x25xf32>, vector<25x128xf32>, vector<2x128xf32> -> vector<2x128xf32>
    %59 = arith.addf %53, %58 : vector<2x128xf32>
    %c125 = arith.constant 125 : index
    %c0_22 = arith.constant 0 : index
    %60 = vector.load %arg4[%c125, %c0_22] : memref<360x128xf32, #tpu.memory_space<vmem>>, vector<1x128xf32>
    %61 = vector.broadcast %60 : vector<1x128xf32> to vector<2x128xf32>
    %62 = arith.addf %59, %61 : vector<2x128xf32>
    %cst_23 = arith.constant 0.000000e+00 : f32
    %63 = vector.broadcast %cst_23 : f32 to vector<2x128xf32>
    %64 = arith.maximumf %62, %63 : vector<2x128xf32>
    %c0_24 = arith.constant 0 : index
    %c0_25 = arith.constant 0 : index
    %65 = vector.load %arg3[%c0_24, %c0_25] : memref<2x1xf32, #tpu.memory_space<vmem>>, vector<2x1xf32>
    %c126 = arith.constant 126 : index
    %c0_26 = arith.constant 0 : index
    %66 = vector.load %arg4[%c126, %c0_26] : memref<360x128xf32, #tpu.memory_space<vmem>>, vector<128x30xf32>
    %cst_27 = arith.constant dense<0.000000e+00> : vector<2x30xf32>
    %67 = tpu.matmul %64, %66, %cst_27 {dimension_numbers = #tpu.dot_dimension_numbers<[1], [0], [0], [1], [0, 0, 1, 1], [], []>} : vector<2x128xf32>, vector<128x30xf32>, vector<2x30xf32> -> vector<2x30xf32>
    %c254 = arith.constant 254 : index
    %c0_28 = arith.constant 0 : index
    %68 = vector.load %arg4[%c254, %c0_28] : memref<360x128xf32, #tpu.memory_space<vmem>>, vector<1x30xf32>
    %69 = vector.broadcast %65 : vector<2x1xf32> to vector<2x30xf32>
    %70 = vector.broadcast %68 : vector<1x30xf32> to vector<2x30xf32>
    %71 = arith.mulf %69, %70 : vector<2x30xf32>
    %72 = arith.addf %67, %71 : vector<2x30xf32>
    %c255 = arith.constant 255 : index
    %c0_29 = arith.constant 0 : index
    %73 = vector.load %arg4[%c255, %c0_29] : memref<360x128xf32, #tpu.memory_space<vmem>>, vector<1x30xf32>
    %74 = vector.broadcast %73 : vector<1x30xf32> to vector<2x30xf32>
    %75 = arith.addf %72, %74 : vector<2x30xf32>
    %76 = math.tanh %75 : vector<2x30xf32>
    %c256 = arith.constant 256 : index
    %c0_30 = arith.constant 0 : index
    %77 = vector.load %arg4[%c256, %c0_30] : memref<360x128xf32, #tpu.memory_space<vmem>>, vector<30x30xf32>
    %cst_31 = arith.constant dense<0.000000e+00> : vector<2x30xf32>
    %78 = tpu.matmul %76, %77, %cst_31 {dimension_numbers = #tpu.dot_dimension_numbers<[1], [0], [0], [1], [0, 0, 1, 1], [], []>} : vector<2x30xf32>, vector<30x30xf32>, vector<2x30xf32> -> vector<2x30xf32>
    %c286 = arith.constant 286 : index
    %c0_32 = arith.constant 0 : index
    %79 = vector.load %arg4[%c286, %c0_32] : memref<360x128xf32, #tpu.memory_space<vmem>>, vector<1x30xf32>
    %80 = vector.broadcast %79 : vector<1x30xf32> to vector<2x30xf32>
    %81 = arith.addf %78, %80 : vector<2x30xf32>
    %82 = math.tanh %81 : vector<2x30xf32>
    %c287 = arith.constant 287 : index
    %c0_33 = arith.constant 0 : index
    %83 = vector.load %arg4[%c287, %c0_33] : memref<360x128xf32, #tpu.memory_space<vmem>>, vector<30x30xf32>
    %cst_34 = arith.constant dense<0.000000e+00> : vector<2x30xf32>
    %84 = tpu.matmul %82, %83, %cst_34 {dimension_numbers = #tpu.dot_dimension_numbers<[1], [0], [0], [1], [0, 0, 1, 1], [], []>} : vector<2x30xf32>, vector<30x30xf32>, vector<2x30xf32> -> vector<2x30xf32>
    %c317 = arith.constant 317 : index
    %c0_35 = arith.constant 0 : index
    %85 = vector.load %arg4[%c317, %c0_35] : memref<360x128xf32, #tpu.memory_space<vmem>>, vector<1x30xf32>
    %86 = vector.broadcast %85 : vector<1x30xf32> to vector<2x30xf32>
    %87 = arith.addf %84, %86 : vector<2x30xf32>
    %88 = math.tanh %87 : vector<2x30xf32>
    %c318 = arith.constant 318 : index
    %c0_36 = arith.constant 0 : index
    %89 = vector.load %arg4[%c318, %c0_36] : memref<360x128xf32, #tpu.memory_space<vmem>>, vector<30x1xf32>
    %cst_37 = arith.constant dense<0.000000e+00> : vector<2x1xf32>
    %90 = tpu.matmul %88, %89, %cst_37 {dimension_numbers = #tpu.dot_dimension_numbers<[1], [0], [0], [1], [0, 0, 1, 1], [], []>} : vector<2x30xf32>, vector<30x1xf32>, vector<2x1xf32> -> vector<2x1xf32>
    %c348 = arith.constant 348 : index
    %c0_38 = arith.constant 0 : index
    %91 = vector.load %arg4[%c348, %c0_38] : memref<360x128xf32, #tpu.memory_space<vmem>>, vector<1x1xf32>
    %92 = vector.broadcast %91 : vector<1x1xf32> to vector<2x1xf32>
    %93 = arith.addf %90, %92 : vector<2x1xf32>
    %94 = arith.negf %93 : vector<2x1xf32>
    %95 = math.exp %94 : vector<2x1xf32>
    %cst_39 = arith.constant 1.000000e+00 : f32
    %96 = vector.broadcast %cst_39 : f32 to vector<2x1xf32>
    %97 = arith.addf %96, %95 : vector<2x1xf32>
    %98 = arith.divf %96, %97 : vector<2x1xf32>
    %c0_40 = arith.constant 0 : index
    %c0_41 = arith.constant 0 : index
    %99 = vector.load %arg5[%c0_40, %c0_41] : memref<2x1xf32, #tpu.memory_space<vmem>>, vector<2x1xf32>
    tpu.vector_store %arg5[%c0_40, %c0_41], %98 {strides = array<i32>} : memref<2x1xf32, #tpu.memory_space<vmem>>, vector<2x1xf32>,
    return
  }
  func.func @transform_0(%arg0: i32) -> (i32, i32) {
    %c0_i32 = arith.constant 0 : i32
    %c0_i32_0 = arith.constant 0 : i32
    %c0_i32_1 = arith.constant 0 : i32
    return %c0_i32, %c0_i32_0 : i32, i32
  }
  func.func @transform_1(%arg0: i32) -> (i32, i32) {
    %c0_i32 = arith.constant 0 : i32
    %c0_i32_0 = arith.constant 0 : i32
    %c0_i32_1 = arith.constant 0 : i32
    return %c0_i32, %c0_i32_0 : i32, i32
  }
  func.func @transform_2(%arg0: i32) -> (i32, i32) {
    %c0_i32 = arith.constant 0 : i32
    %c0_i32_0 = arith.constant 0 : i32
    %c0_i32_1 = arith.constant 0 : i32
    return %c0_i32, %c0_i32_0 : i32, i32
  }
  func.func @transform_3(%arg0: i32) -> (i32, i32) {
    %c0_i32 = arith.constant 0 : i32
    %c0_i32_0 = arith.constant 0 : i32
    %c0_i32_1 = arith.constant 0 : i32
    return %c0_i32, %c0_i32_0 : i32, i32
  }
  func.func @transform_4(%arg0: i32) -> (i32, i32) {
    %c0_i32 = arith.constant 0 : i32
    %c0_i32_0 = arith.constant 0 : i32
    %c0_i32_1 = arith.constant 0 : i32
    return %c0_i32, %c0_i32_0 : i32, i32
  }
}

</mosaic_0001>

<bundles_post_ra>
// kernel: feature_extractor_forward.3
= control target key start
LH: loop header
LB: loop body
LE: loop exit
PB: predicated region body
PF: predicated region fallthrough
CT: control target
= control target key end

     0   :  { %vm1006_vm0 = vcmask 1044480   ;;  %vm1007_vm1 = vcmask 1045504   ;;  %v2880_v2 = vmov 65535   ;;  %vm1002_vm2 = vcmask 613376   ;;  %s2883_s19 = smov 1   ;;  %s4576_s0 = inlined_call_operand.vmem [shape: bf16[75,4232], index: 0, kind: input, shape index: {}]   ;;  %s4577_s1 = inlined_call_operand.vmem [shape: bf16[5,75], index: 1, kind: input, shape index: {}]   ;;  %s4578_s2 = inlined_call_operand.vmem [shape: f32[5,2], index: 2, kind: input, shape index: {}]   ;;  %s4579_s3 = inlined_call_operand.vmem [shape: bf16[5,4232], index: 3, kind: output, shape index: {}]  }
   0x1   :  { %v2529_v0 = vld [vmem:[%s4576_s0 + $0x440] sm:$0xf]  ;;  %v2850_v1 = vld [vmem:[%s4576_s0 + $0x4c4] sm:$0x30]  ;;  %v1008_v3 = vsel %vm1006_vm0, 4294967295, %v2880_v2  ;;  %vm1619_vm3 = vcmask 61440  }
   0x2   :  { %v2530_v4 = vor.u32 %v2850_v1, %v2529_v0  ;;  %v2912_v5 = vsel %vm1007_vm1, %v1008_v3, 0  ;;  %v2833_v6 = vld [vmem:[%s4576_s0 + $0x444] sm:$0xf]  ;;  %v2531_v7 = vld [vmem:[%s4576_s0 + $0x4c8] sm:$0x30]  ;;  %vm1918_vm8 = vcmask 1042432  }
   0x3   :  { %v2534_v8 = vor.u32 %v2833_v6, %v2531_v7  ;;  %v2537_v9 = vld [vmem:[%s4576_s0 + $0x448] sm:$0xf]  ;;  %v2851_v10 = vld [vmem:[%s4576_s0 + $0x4cc] sm:$0x30]  ;;  %v2834_v11 = vld [vmem:[%s4576_s0 + $0x44c] sm:$0xf] }
   0x4   :  { %v1011_v12 = vand.u32 %v2530_v4, %v2912_v5  ;;  %v2538_v13 = vor.u32 %v2851_v10, %v2537_v9  ;;  %v2539_v14 = vld [vmem:[%s4576_s0 + $0x4d0] sm:$0x30]  ;;  %v2393_v15 = vld [vmem:[%s4576_s0 + $0x330] sm:$0xf]  ;;  %v2816_v16 = vld [vmem:[%s4576_s0 + $0x3b4] sm:$0xf0] }
   0x5   :  { %v1014_v17 = vand.u32 %v2534_v8, %v2912_v5  ;;  %v2542_v18 = vor.u32 %v2834_v11, %v2539_v14  ;;  %v2799_v19 = vld [vmem:[%s4576_s0 + $0x334] sm:$0xf]  ;;  %v2395_v20 = vld [vmem:[%s4576_s0 + $0x3b8] sm:$0xf0]  ;;  %v2401_v21 = vld [vmem:[%s4576_s0 + $0x338] sm:$0xf]  ;;  %v2394_v23 = vor.u32 %v2816_v16, %v2393_v15 }
   0x6   :  { %1115 = vmatpush.bf16.msra.mxu0 %v1011_v12  ;;  %v1017_v22 = vand.u32 %v2538_v13, %v2912_v5  ;;  %v2817_v24 = vld [vmem:[%s4576_s0 + $0x3bc] sm:$0xf0]  ;;  %v2800_v25 = vld [vmem:[%s4576_s0 + $0x33c] sm:$0xf]  ;;  %v2403_v26 = vld [vmem:[%s4576_s0 + $0x3c0] sm:$0xf0]  ;;  %v2398_v28 = vor.u32 %v2799_v19, %v2395_v20 }
   0x7   :  { %1128 = vmatpush.bf16.msra.mxu1 %v1014_v17  ;;  %v1020_v27 = vand.u32 %v2542_v18, %v2912_v5  ;;  %v2257_v29 = vld [vmem:[%s4576_s0 + $0x220] sm:$0xf]  ;;  %v2782_v30 = vld [vmem:[%s4576_s0 + $0x2a4] sm:$0xf0]  ;;  %v2402_v31 = vor.u32 %v2817_v24, %v2401_v21  ;;  %v2765_v32 = vld [vmem:[%s4576_s0 + $0x224] sm:$0xf]  ;;  %v2406_v34 = vor.u32 %v2800_v25, %v2403_v26 }
   0x8   :  { %1141 = vmatpush.bf16.msra.mxu2 %v1017_v22  ;;  %v2259_v33 = vld [vmem:[%s4576_s0 + $0x2a8] sm:$0xf0]  ;;  %v2265_v35 = vld [vmem:[%s4576_s0 + $0x228] sm:$0xf]  ;;  %v2783_v36 = vld [vmem:[%s4576_s0 + $0x2ac] sm:$0xf0]  ;;  %v2258_v37 = vor.u32 %v2782_v30, %v2257_v29 }
   0x9   :  { %1154 = vmatpush.bf16.msra.mxu3 %v1020_v27  ;;  %v2766_v38 = vld [vmem:[%s4576_s0 + $0x22c] sm:$0xf]  ;;  %v2267_v39 = vld [vmem:[%s4576_s0 + $0x2b0] sm:$0xf0]  ;;  %v2262_v40 = vor.u32 %v2765_v32, %v2259_v33  ;;  %v2121_v41 = vld [vmem:[%s4576_s0 + $0x110] sm:$0xf]  ;;  %v2266_v44 = vor.u32 %v2783_v36, %v2265_v35 }
   0xa   :  { %1116 = vmatpush.bf16.msra.mxu0 %v2394_v23  ;;  %v2748_v42 = vld [vmem:[%s4576_s0 + $0x194] sm:$0xf0]  ;;  %v2731_v43 = vld [vmem:[%s4576_s0 + $0x114] sm:$0xf]  ;;  %v2123_v45 = vld [vmem:[%s4576_s0 + $0x198] sm:$0xf0]  ;;  %v2270_v48 = vor.u32 %v2766_v38, %v2267_v39 }
   0xb   :  { %1129 = vmatpush.bf16.msra.mxu1 %v2398_v28  ;;  %v2129_v46 = vld [vmem:[%s4576_s0 + $0x118] sm:$0xf]  ;;  %v2749_v47 = vld [vmem:[%s4576_s0 + $0x19c] sm:$0xf0]  ;;  %v2732_v49 = vld [vmem:[%s4576_s0 + $0x11c] sm:$0xf]  ;;  %v2122_v52 = vor.u32 %v2748_v42, %v2121_v41  ;;  %v2126_v56 = vor.u32 %v2731_v43, %v2123_v45 }
   0xc   :  { %1142 = vmatpush.bf16.msra.mxu2 %v2402_v31  ;;  %v2131_v50 = vld [vmem:[%s4576_s0 + $0x1a0] sm:$0xf0]  ;;  %v1985_v51 = vld [vmem:[%s4576_s0] sm:$0xf]  ;;  %v2714_v53 = vld [vmem:[%s4576_s0 + $0x84] sm:$0xf0]  ;;  %v2130_v61 = vor.u32 %v2749_v47, %v2129_v46 }
   0xd   :  { %1155 = vmatpush.bf16.msra.mxu3 %v2406_v34  ;;  %v2697_v54 = vld [vmem:[%s4576_s0 + $0x4] sm:$0xf]  ;;  %v1987_v55 = vld [vmem:[%s4576_s0 + $0x88] sm:$0xf0]  ;;  %v1993_v57 = vld [vmem:[%s4576_s0 + $0x8] sm:$0xf]  ;;  %v2134_v2 = vor.u32 %v2732_v49, %v2131_v50  ;;  %v1986_v9 = vor.u32 %v2714_v53, %v1985_v51 }
   0xe   :  { %1117 = vmatpush.bf16.msra.mxu0 %v2258_v37  ;;  %v2545_v58 = vld [vmem:[%s4576_s0 + $0x450] sm:$0xf]  ;;  %v2852_v59 = vld [vmem:[%s4576_s0 + $0x4d4] sm:$0x30]  ;;  %v2835_v60 = vld [vmem:[%s4576_s0 + $0x454] sm:$0xf]  ;;  %v1990_v13 = vor.u32 %v2697_v54, %v1987_v55 }
   0xf   :  { %1130 = vmatpush.bf16.msra.mxu1 %v2262_v40  ;;  %v2546_v62 = vor.u32 %v2852_v59, %v2545_v58  ;;  %v2547_v63 = vld [vmem:[%s4576_s0 + $0x4d8] sm:$0x30]  ;;  %v2553_v0 = vld [vmem:[%s4576_s0 + $0x458] sm:$0xf]  ;;  %v2853_v1 = vld [vmem:[%s4576_s0 + $0x4dc] sm:$0x30] }
  0x10   :  { %1143 = vmatpush.bf16.msra.mxu2 %v2266_v44  ;;  %v2715_v3 = vld [vmem:[%s4576_s0 + $0x8c] sm:$0xf0]  ;;  %v2550_v4 = vor.u32 %v2835_v60, %v2547_v63  ;;  %v2554_v6 = vor.u32 %v2853_v1, %v2553_v0  ;;  %v2836_v7 = vld [vmem:[%s4576_s0 + $0x45c] sm:$0xf]  ;;  %v2555_v8 = vld [vmem:[%s4576_s0 + $0x4e0] sm:$0x30] }
  0x11   :  { %1156 = vmatpush.bf16.msra.mxu3 %v2270_v48  ;;  %v2698_v10 = vld [vmem:[%s4576_s0 + $0xc] sm:$0xf]  ;;  %v1995_v11 = vld [vmem:[%s4576_s0 + $0x90] sm:$0xf0]  ;;  %v2558_v12 = vor.u32 %v2836_v7, %v2555_v8  ;;  %v1023_v14 = vand.u32 %v2546_v62, %v2912_v5  ;;  %v1994_v15 = vor.u32 %v2715_v3, %v1993_v57  ;;  %v2409_v17 = vld [vmem:[%s4576_s0 + $0x340] sm:$0xf] }
  0x12   :  { %1118 = vmatpush.bf16.msra.mxu0 %v2122_v52  ;;  %v1026_v16 = vand.u32 %v2550_v4, %v2912_v5  ;;  %v1998_v18 = vor.u32 %v2698_v10, %v1995_v11  ;;  %v1029_v19 = vand.u32 %v2554_v6, %v2912_v5  ;;  %v2818_v20 = vld [vmem:[%s4576_s0 + $0x3c4] sm:$0xf0]  ;;  %v2801_v21 = vld [vmem:[%s4576_s0 + $0x344] sm:$0xf]  ;;  %v2411_v22 = vld [vmem:[%s4576_s0 + $0x3c8] sm:$0xf0] }
  0x13   :  { %1131 = vmatpush.bf16.msra.mxu1 %v2126_v56  ;;  %v1032_v23 = vand.u32 %v2558_v12, %v2912_v5  ;;  %v2417_v24 = vld [vmem:[%s4576_s0 + $0x348] sm:$0xf]  ;;  %v2819_v25 = vld [vmem:[%s4576_s0 + $0x3cc] sm:$0xf0]  ;;  %v3081_v26 = vld [vmem:[%s4577_s1] sm:$0x7]  ;;  %v2410_v29 = vor.u32 %v2818_v20, %v2409_v17  ;;  %v2414_v30 = vor.u32 %v2801_v21, %v2411_v22 }
  0x14   :  { %1144 = vmatpush.bf16.msra.mxu2 %v2130_v61  ;;  %v2802_v27 = vld [vmem:[%s4576_s0 + $0x34c] sm:$0xf]  ;;  %v2419_v28 = vld [vmem:[%s4576_s0 + $0x3d0] sm:$0xf0]  ;;  %v2273_v31 = vld [vmem:[%s4576_s0 + $0x230] sm:$0xf]  ;;  %v2418_v32 = vor.u32 %v2819_v25, %v2417_v24 }
  0x15   :  { %1157 = vmatpush.bf16.msra.mxu3 %v2134_v2  ;;  %v2784_v33 = vld [vmem:[%s4576_s0 + $0x2b4] sm:$0xf0]  ;;  %v2767_v34 = vld [vmem:[%s4576_s0 + $0x234] sm:$0xf]  ;;  %v2275_v35 = vld [vmem:[%s4576_s0 + $0x2b8] sm:$0xf0]  ;;  %v2422_v36 = vor.u32 %v2802_v27, %v2419_v28 }
  0x16   :  { %1119 = vmatpush.bf16.msra.mxu0 %v1986_v9  ;;  %v2281_v37 = vld [vmem:[%s4576_s0 + $0x238] sm:$0xf]  ;;  %v2785_v38 = vld [vmem:[%s4576_s0 + $0x2bc] sm:$0xf0]  ;;  %v2768_v39 = vld [vmem:[%s4576_s0 + $0x23c] sm:$0xf]  ;;  %v2274_v42 = vor.u32 %v2784_v33, %v2273_v31  ;;  %v2278_v43 = vor.u32 %v2767_v34, %v2275_v35 }
  0x17   :  { %1132 = vmatpush.bf16.msra.mxu1 %v1990_v13  ;;  %v2283_v40 = vld [vmem:[%s4576_s0 + $0x2c0] sm:$0xf0]  ;;  %v2137_v41 = vld [vmem:[%s4576_s0 + $0x120] sm:$0xf]  ;;  %v2750_v44 = vld [vmem:[%s4576_s0 + $0x1a4] sm:$0xf0]  ;;  %v2282_v47 = vor.u32 %v2785_v38, %v2281_v37 }
  0x18   :  { %1145 = vmatpush.bf16.msra.mxu2 %v1994_v15  ;;  %v2733_v45 = vld [vmem:[%s4576_s0 + $0x124] sm:$0xf]  ;;  %v2139_v46 = vld [vmem:[%s4576_s0 + $0x1a8] sm:$0xf0]  ;;  %v2145_v48 = vld [vmem:[%s4576_s0 + $0x128] sm:$0xf]  ;;  %v2286_v51 = vor.u32 %v2768_v39, %v2283_v40  ;;  %v2138_v59 = vor.u32 %v2750_v44, %v2137_v41 }
  0x19   :  { %1158 = vmatpush.bf16.msra.mxu3 %v1998_v18  ;;  %2663 = vmatmul.msk.bf16.vlgmr.msra.gmra.mxu0 %vm1002_vm2, %v3081_v26  ;;  %v2751_v49 = vld [vmem:[%s4576_s0 + $0x1ac] sm:$0xf0]  ;;  %v2734_v50 = vld [vmem:[%s4576_s0 + $0x12c] sm:$0xf]  ;;  %v2147_v52 = vld [vmem:[%s4576_s0 + $0x1b0] sm:$0xf0]  ;;  %v2142_v60 = vor.u32 %v2733_v45, %v2139_v46 }
  0x1a   :  { %1167 = vmatpush.bf16.msrb.mxu0 %v1023_v14  ;;  %2664 = vmatmul.msk.bf16.vlgmr.msra.gmra.mxu1 %vm1002_vm2, %v3081_v26  ;;  %v2561_v53 = vld [vmem:[%s4576_s0 + $0x460] sm:$0xf]  ;;  %v2854_v54 = vld [vmem:[%s4576_s0 + $0x4e4] sm:$0x30]  ;;  %v2001_v55 = vld [vmem:[%s4576_s0 + $0x10] sm:$0xf]  ;;  %v2146_v0 = vor.u32 %v2751_v49, %v2145_v48  ;;  %v2150_v6 = vor.u32 %v2734_v50, %v2147_v52 }
  0x1b   :  { %1180 = vmatpush.bf16.msrb.mxu1 %v1026_v16  ;;  %2665 = vmatmul.msk.bf16.vlgmr.msra.gmra.mxu2 %vm1002_vm2, %v3081_v26  ;;  %v2837_v56 = vld [vmem:[%s4576_s0 + $0x464] sm:$0xf]  ;;  %v2563_v57 = vld [vmem:[%s4576_s0 + $0x4e8] sm:$0x30]  ;;  %v2569_v58 = vld [vmem:[%s4576_s0 + $0x468] sm:$0xf]  ;;  %v2562_v4 = vor.u32 %v2854_v54, %v2561_v53 }
  0x1c   :  { %1193 = vmatpush.bf16.msrb.mxu2 %v1029_v19  ;;  %2666 = vmatmul.msk.bf16.vlgmr.msra.gmra.mxu3 %vm1002_vm2, %v3081_v26  ;;  %v2855_v61 = vld [vmem:[%s4576_s0 + $0x4ec] sm:$0x30]  ;;  %v2838_v62 = vld [vmem:[%s4576_s0 + $0x46c] sm:$0xf]  ;;  %v2571_v63 = vld [vmem:[%s4576_s0 + $0x4f0] sm:$0x30]  ;;  %v2566_v9 = vor.u32 %v2837_v56, %v2563_v57 }
  0x1d   :  { %1206 = vmatpush.bf16.msrb.mxu3 %v1032_v23  ;;  %v2716_v1 = vld [vmem:[%s4576_s0 + $0x94] sm:$0xf0]  ;;  %v2699_v2 = vld [vmem:[%s4576_s0 + $0x14] sm:$0xf]  ;;  %v2003_v3 = vld [vmem:[%s4576_s0 + $0x98] sm:$0xf0]  ;;  %v2570_v12 = vor.u32 %v2855_v61, %v2569_v58  ;;  %v2574_v13 = vor.u32 %v2838_v62, %v2571_v63  ;;  %v1035_v17 = vand.u32 %v2562_v4, %v2912_v5 }
  0x1e   :  { %1168 = vmatpush.bf16.msrb.mxu0 %v2410_v29  ;;  %v2009_v7 = vld [vmem:[%s4576_s0 + $0x18] sm:$0xf]  ;;  %v2717_v8 = vld [vmem:[%s4576_s0 + $0x9c] sm:$0xf0]  ;;  %v2700_v10 = vld [vmem:[%s4576_s0 + $0x1c] sm:$0xf]  ;;  %v2002_v14 = vor.u32 %v2716_v1, %v2001_v55  ;;  %v2006_v15 = vor.u32 %v2699_v2, %v2003_v3  ;;  %v1038_v19 = vand.u32 %v2566_v9, %v2912_v5 }
  0x1f   :  { %1181 = vmatpush.bf16.msrb.mxu1 %v2414_v30  ;;  %v2011_v11 = vld [vmem:[%s4576_s0 + $0xa0] sm:$0xf0]  ;;  %v2010_v16 = vor.u32 %v2717_v8, %v2009_v7  ;;  %v2425_v20 = vld [vmem:[%s4576_s0 + $0x350] sm:$0xf]  ;;  %v2820_v21 = vld [vmem:[%s4576_s0 + $0x3d4] sm:$0xf0]  ;;  %v1041_v22 = vand.u32 %v2570_v12, %v2912_v5  ;;  %v1044_v23 = vand.u32 %v2574_v13, %v2912_v5 }
  0x20   :  { %1194 = vmatpush.bf16.msrb.mxu2 %v2418_v32  ;;  %v2014_v18 = vor.u32 %v2700_v10, %v2011_v11  ;;  %v2803_v24 = vld [vmem:[%s4576_s0 + $0x354] sm:$0xf]  ;;  %v2427_v25 = vld [vmem:[%s4576_s0 + $0x3d8] sm:$0xf0]  ;;  %v2433_v27 = vld [vmem:[%s4576_s0 + $0x358] sm:$0xf]  ;;  %v2426_v31 = vor.u32 %v2820_v21, %v2425_v20 }
  0x21   :  { %1207 = vmatpush.bf16.msrb.mxu3 %v2422_v36  ;;  %v2821_v28 = vld [vmem:[%s4576_s0 + $0x3dc] sm:$0xf0]  ;;  %v2804_v29 = vld [vmem:[%s4576_s0 + $0x35c] sm:$0xf]  ;;  %v2435_v30 = vld [vmem:[%s4576_s0 + $0x3e0] sm:$0xf0]  ;;  %v2430_v32 = vor.u32 %v2803_v24, %v2427_v25 }
  0x22   :  { %1169 = vmatpush.bf16.msrb.mxu0 %v2274_v42  ;;  %v2289_v33 = vld [vmem:[%s4576_s0 + $0x240] sm:$0xf]  ;;  %v2786_v34 = vld [vmem:[%s4576_s0 + $0x2c4] sm:$0xf0]  ;;  %v2434_v35 = vor.u32 %v2821_v28, %v2433_v27  ;;  %v2438_v36 = vor.u32 %v2804_v29, %v2435_v30  ;;  %v2769_v37 = vld [vmem:[%s4576_s0 + $0x244] sm:$0xf] }
  0x23   :  { %1182 = vmatpush.bf16.msrb.mxu1 %v2278_v43  ;;  %v2291_v38 = vld [vmem:[%s4576_s0 + $0x2c8] sm:$0xf0]  ;;  %v2297_v39 = vld [vmem:[%s4576_s0 + $0x248] sm:$0xf]  ;;  %v2787_v40 = vld [vmem:[%s4576_s0 + $0x2cc] sm:$0xf0]  ;;  %v2290_v44 = vor.u32 %v2786_v34, %v2289_v33 }
  0x24   :  { %1195 = vmatpush.bf16.msrb.mxu2 %v2282_v47  ;;  %v2770_v41 = vld [vmem:[%s4576_s0 + $0x24c] sm:$0xf]  ;;  %v2299_v42 = vld [vmem:[%s4576_s0 + $0x2d0] sm:$0xf0]  ;;  %v2153_v43 = vld [vmem:[%s4576_s0 + $0x130] sm:$0xf]  ;;  %v2294_v45 = vor.u32 %v2769_v37, %v2291_v38  ;;  %v2298_v49 = vor.u32 %v2787_v40, %v2297_v39 }
  0x25   :  { %1208 = vmatpush.bf16.msrb.mxu3 %v2286_v51  ;;  %v2752_v46 = vld [vmem:[%s4576_s0 + $0x1b4] sm:$0xf0]  ;;  %v2735_v47 = vld [vmem:[%s4576_s0 + $0x134] sm:$0xf]  ;;  %v2155_v48 = vld [vmem:[%s4576_s0 + $0x1b8] sm:$0xf0]  ;;  %v2302_v50 = vor.u32 %v2770_v41, %v2299_v42 }
  0x26   :  { %1170 = vmatpush.bf16.msrb.mxu0 %v2138_v59  ;;  %v2161_v51 = vld [vmem:[%s4576_s0 + $0x138] sm:$0xf]  ;;  %v2753_v52 = vld [vmem:[%s4576_s0 + $0x1bc] sm:$0xf0]  ;;  %v2736_v53 = vld [vmem:[%s4576_s0 + $0x13c] sm:$0xf]  ;;  %v2154_v62 = vor.u32 %v2752_v46, %v2153_v43  ;;  %v2158_v63 = vor.u32 %v2735_v47, %v2155_v48 }
  0x27   :  { %1183 = vmatpush.bf16.msrb.mxu1 %v2142_v60  ;;  %v2163_v54 = vld [vmem:[%s4576_s0 + $0x1c0] sm:$0xf0]  ;;  %v2577_v55 = vld [vmem:[%s4576_s0 + $0x470] sm:$0xf]  ;;  %v2856_v56 = vld [vmem:[%s4576_s0 + $0x4f4] sm:$0x30]  ;;  %v2162_v3 = vor.u32 %v2753_v52, %v2161_v51 }
  0x28   :  { %1196 = vmatpush.bf16.msrb.mxu2 %v2146_v0  ;;  %v2017_v57 = vld [vmem:[%s4576_s0 + $0x20] sm:$0xf]  ;;  %v2718_v58 = vld [vmem:[%s4576_s0 + $0xa4] sm:$0xf0]  ;;  %v2839_v59 = vld [vmem:[%s4576_s0 + $0x474] sm:$0xf]  ;;  %v2166_v4 = vor.u32 %v2736_v53, %v2163_v54  ;;  %v2578_v12 = vor.u32 %v2856_v56, %v2577_v55 }
  0x29   :  { %1209 = vmatpush.bf16.msrb.mxu3 %v2150_v6  ;;  %v2579_v60 = vld [vmem:[%s4576_s0 + $0x4f8] sm:$0x30]  ;;  %v2585_v61 = vld [vmem:[%s4576_s0 + $0x478] sm:$0xf]  ;;  %v2857_v0 = vld [vmem:[%s4576_s0 + $0x4fc] sm:$0x30] }
  0x2a   :  { %1171 = vmatpush.bf16.msrb.mxu0 %v2002_v14  ;;  %v2840_v1 = vld [vmem:[%s4576_s0 + $0x47c] sm:$0xf]  ;;  %v2587_v2 = vld [vmem:[%s4576_s0 + $0x500] sm:$0x30]  ;;  %v2019_v7 = vld [vmem:[%s4576_s0 + $0xa8] sm:$0xf0]  ;;  %v2582_v13 = vor.u32 %v2839_v59, %v2579_v60  ;;  %v2586_v14 = vor.u32 %v2857_v0, %v2585_v61  ;;  %v1047_v20 = vand.u32 %v2578_v12, %v2912_v5 }
  0x2b   :  { %1184 = vmatpush.bf16.msrb.mxu1 %v2006_v15  ;;  %v2701_v6 = vld [vmem:[%s4576_s0 + $0x24] sm:$0xf]  ;;  %v2025_v8 = vld [vmem:[%s4576_s0 + $0x28] sm:$0xf]  ;;  %v2719_v9 = vld [vmem:[%s4576_s0 + $0xac] sm:$0xf0]  ;;  %v2590_v15 = vor.u32 %v2840_v1, %v2587_v2 }
  0x2c   :  { %1197 = vmatpush.bf16.msrb.mxu2 %v2010_v16  ;;  %v2702_v10 = vld [vmem:[%s4576_s0 + $0x2c] sm:$0xf]  ;;  %v2027_v11 = vld [vmem:[%s4576_s0 + $0xb0] sm:$0xf0]  ;;  %v2018_v16 = vor.u32 %v2718_v58, %v2017_v57  ;;  %v1050_v21 = vand.u32 %v2582_v13, %v2912_v5  ;;  %v1053_v24 = vand.u32 %v2586_v14, %v2912_v5  ;;  %v2805_v27 = vld [vmem:[%s4576_s0 + $0x364] sm:$0xf] }
  0x2d   :  { %1210 = vmatpush.bf16.msrb.mxu3 %v2014_v18  ;;  %2667 = vmatmul.msk.bf16.vlgmr.msrb.gmra.mxu0 %vm1002_vm2, %v3081_v26  ;;  %v2026_v18 = vor.u32 %v2719_v9, %v2025_v8  ;;  %v1056_v25 = vand.u32 %v2590_v15, %v2912_v5  ;;  %v2443_v28 = vld [vmem:[%s4576_s0 + $0x3e8] sm:$0xf0]  ;;  %v2449_v29 = vld [vmem:[%s4576_s0 + $0x368] sm:$0xf]  ;;  %v2823_v30 = vld [vmem:[%s4576_s0 + $0x3ec] sm:$0xf0] }
  0x2e   :  { %1219 = vmatpush.bf16.msra.mxu0 %v1035_v17  ;;  %2668 = vmatmul.msk.bf16.vlgmr.msrb.gmra.mxu1 %vm1002_vm2, %v3081_v26  ;;  %v2022_v17 = vor.u32 %v2701_v6, %v2019_v7  ;;  %v2446_v34 = vor.u32 %v2805_v27, %v2443_v28  ;;  %v2450_v37 = vor.u32 %v2823_v30, %v2449_v29  ;;  %v2771_v39 = vld [vmem:[%s4576_s0 + $0x254] sm:$0xf]  ;;  %v2307_v40 = vld [vmem:[%s4576_s0 + $0x2d8] sm:$0xf0]  ;;  %v2313_v41 = vld [vmem:[%s4576_s0 + $0x258] sm:$0xf] }
  0x2f   :  { %1232 = vmatpush.bf16.msra.mxu1 %v1038_v19  ;;  %2669 = vmatmul.msk.bf16.vlgmr.msrb.gmra.mxu2 %vm1002_vm2, %v3081_v26  ;;  %v2030_v19 = vor.u32 %v2702_v10, %v2027_v11  ;;  %v2789_v42 = vld [vmem:[%s4576_s0 + $0x2dc] sm:$0xf0]  ;;  %v2772_v43 = vld [vmem:[%s4576_s0 + $0x25c] sm:$0xf]  ;;  %v2310_v47 = vor.u32 %v2771_v39, %v2307_v40  ;;  %v2754_v48 = vld [vmem:[%s4576_s0 + $0x1c4] sm:$0xf0] }
  0x30   :  { %1245 = vmatpush.bf16.msra.mxu2 %v1041_v22  ;;  %2670 = vmatmul.msk.bf16.vlgmr.msrb.gmra.mxu3 %vm1002_vm2, %v3081_v26  ;;  %v2441_v22 = vld [vmem:[%s4576_s0 + $0x360] sm:$0xf]  ;;  %v2314_v51 = vor.u32 %v2789_v42, %v2313_v41  ;;  %v2177_v53 = vld [vmem:[%s4576_s0 + $0x148] sm:$0xf]  ;;  %v2755_v54 = vld [vmem:[%s4576_s0 + $0x1cc] sm:$0xf0] }
  0x31   :  { %1258 = vmatpush.bf16.msra.mxu3 %v1044_v23  ;;  %v2822_v23 = vld [vmem:[%s4576_s0 + $0x3e4] sm:$0xf0]  ;;  %v2738_v55 = vld [vmem:[%s4576_s0 + $0x14c] sm:$0xf]  ;;  %v2179_v56 = vld [vmem:[%s4576_s0 + $0x1d0] sm:$0xf0]  ;;  %v2178_v6 = vor.u32 %v2755_v54, %v2177_v53 }
  0x32   :  { %1220 = vmatpush.bf16.msra.mxu0 %v2426_v31  ;;  %v2806_v31 = vld [vmem:[%s4576_s0 + $0x36c] sm:$0xf]  ;;  %v2442_v33 = vor.u32 %v2822_v23, %v2441_v22  ;;  %v2593_v57 = vld [vmem:[%s4576_s0 + $0x480] sm:$0xf]  ;;  %v2858_v58 = vld [vmem:[%s4576_s0 + $0x504] sm:$0x30]  ;;  %v2182_v7 = vor.u32 %v2738_v55, %v2179_v56 }
  0x33   :  { %1233 = vmatpush.bf16.msra.mxu1 %v2430_v32  ;;  %v2451_v32 = vld [vmem:[%s4576_s0 + $0x3f0] sm:$0xf0]  ;;  %v2033_v59 = vld [vmem:[%s4576_s0 + $0x30] sm:$0xf]  ;;  %v2720_v60 = vld [vmem:[%s4576_s0 + $0xb4] sm:$0xf0]  ;;  %v2594_v14 = vor.u32 %v2858_v58, %v2593_v57 }
  0x34   :  { %1246 = vmatpush.bf16.msra.mxu2 %v2434_v35  ;;  %v2305_v35 = vld [vmem:[%s4576_s0 + $0x250] sm:$0xf]  ;;  %v2454_v38 = vor.u32 %v2806_v31, %v2451_v32  ;;  %v2841_v61 = vld [vmem:[%s4576_s0 + $0x484] sm:$0xf]  ;;  %v2703_v8 = vld [vmem:[%s4576_s0 + $0x34] sm:$0xf] }
  0x35   :  { %1259 = vmatpush.bf16.msra.mxu3 %v2438_v36  ;;  %v2788_v36 = vld [vmem:[%s4576_s0 + $0x2d4] sm:$0xf0]  ;;  %v2859_v2 = vld [vmem:[%s4576_s0 + $0x50c] sm:$0x30]  ;;  %v2035_v9 = vld [vmem:[%s4576_s0 + $0xb8] sm:$0xf0]  ;;  %v1059_v22 = vand.u32 %v2594_v14, %v2912_v5 }
  0x36   :  { %1221 = vmatpush.bf16.msra.mxu0 %v2290_v44  ;;  %v2315_v44 = vld [vmem:[%s4576_s0 + $0x2e0] sm:$0xf0]  ;;  %v2306_v46 = vor.u32 %v2788_v36, %v2305_v35  ;;  %v2041_v10 = vld [vmem:[%s4576_s0 + $0x38] sm:$0xf]  ;;  %v2721_v11 = vld [vmem:[%s4576_s0 + $0xbc] sm:$0xf0] }
  0x37   :  { %1234 = vmatpush.bf16.msra.mxu1 %v2294_v45  ;;  %v2169_v45 = vld [vmem:[%s4576_s0 + $0x140] sm:$0xf]  ;;  %v2318_v52 = vor.u32 %v2772_v43, %v2315_v44  ;;  %v2704_v12 = vld [vmem:[%s4576_s0 + $0x3c] sm:$0xf]  ;;  %v2043_v13 = vld [vmem:[%s4576_s0 + $0xc0] sm:$0xf0] }
  0x38   :  { %1247 = vmatpush.bf16.msra.mxu2 %v2298_v49  ;;  %v2737_v49 = vld [vmem:[%s4576_s0 + $0x144] sm:$0xf]  ;;  %v2170_v0 = vor.u32 %v2754_v48, %v2169_v45  ;;  %v2807_v29 = vld [vmem:[%s4576_s0 + $0x374] sm:$0xf]  ;;  %v2459_v30 = vld [vmem:[%s4576_s0 + $0x3f8] sm:$0xf0] }
  0x39   :  { %1260 = vmatpush.bf16.msra.mxu3 %v2302_v50  ;;  %v2171_v50 = vld [vmem:[%s4576_s0 + $0x1c8] sm:$0xf0]  ;;  %v2465_v31 = vld [vmem:[%s4576_s0 + $0x378] sm:$0xf]  ;;  %v2825_v32 = vld [vmem:[%s4576_s0 + $0x3fc] sm:$0xf0]  ;;  %v2462_v36 = vor.u32 %v2807_v29, %v2459_v30 }
  0x3a   :  { %1222 = vmatpush.bf16.msra.mxu0 %v2154_v62  ;;  %v2595_v62 = vld [vmem:[%s4576_s0 + $0x508] sm:$0x30]  ;;  %v2174_v1 = vor.u32 %v2737_v49, %v2171_v50  ;;  %v2466_v39 = vor.u32 %v2825_v32, %v2465_v31  ;;  %v2773_v41 = vld [vmem:[%s4576_s0 + $0x264] sm:$0xf]  ;;  %v2329_v43 = vld [vmem:[%s4576_s0 + $0x268] sm:$0xf] }
  0x3b   :  { %1235 = vmatpush.bf16.msra.mxu1 %v2158_v63  ;;  %v2601_v63 = vld [vmem:[%s4576_s0 + $0x488] sm:$0xf]  ;;  %v2598_v15 = vor.u32 %v2841_v61, %v2595_v62  ;;  %v2323_v42 = vld [vmem:[%s4576_s0 + $0x2e8] sm:$0xf0]  ;;  %v2791_v44 = vld [vmem:[%s4576_s0 + $0x2ec] sm:$0xf0] }
  0x3c   :  { %1248 = vmatpush.bf16.msra.mxu2 %v2162_v3  ;;  %v2842_v3 = vld [vmem:[%s4576_s0 + $0x48c] sm:$0xf]  ;;  %v2326_v49 = vor.u32 %v2773_v41, %v2323_v42  ;;  %v2756_v50 = vld [vmem:[%s4576_s0 + $0x1d4] sm:$0xf0]  ;;  %v2330_v53 = vor.u32 %v2791_v44, %v2329_v43  ;;  %v2757_v56 = vld [vmem:[%s4576_s0 + $0x1dc] sm:$0xf0] }
  0x3d   :  { %1261 = vmatpush.bf16.msra.mxu3 %v2166_v4  ;;  %v2603_v4 = vld [vmem:[%s4576_s0 + $0x510] sm:$0x30]  ;;  %v1062_v23 = vand.u32 %v2598_v15, %v2912_v5  ;;  %v2774_v45 = vld [vmem:[%s4576_s0 + $0x26c] sm:$0xf]  ;;  %v2193_v55 = vld [vmem:[%s4576_s0 + $0x158] sm:$0xf] }
  0x3e   :  { %1223 = vmatpush.bf16.msra.mxu0 %v2018_v16  ;;  %v2602_v16 = vor.u32 %v2859_v2, %v2601_v63  ;;  %v2740_v57 = vld [vmem:[%s4576_s0 + $0x15c] sm:$0xf]  ;;  %v2195_v58 = vld [vmem:[%s4576_s0 + $0x1e0] sm:$0xf0]  ;;  %v2049_v61 = vld [vmem:[%s4576_s0 + $0x40] sm:$0xf] }
  0x3f   :  { %1236 = vmatpush.bf16.msra.mxu1 %v2022_v17  ;;  %v2606_v17 = vor.u32 %v2842_v3, %v2603_v4  ;;  %v2722_v62 = vld [vmem:[%s4576_s0 + $0xc4] sm:$0xf0]  ;;  %v2843_v63 = vld [vmem:[%s4576_s0 + $0x494] sm:$0xf]  ;;  %v2861_v4 = vld [vmem:[%s4576_s0 + $0x51c] sm:$0x30] }
  0x40   :  { %1249 = vmatpush.bf16.msra.mxu2 %v2026_v18  ;;  %v2034_v18 = vor.u32 %v2720_v60, %v2033_v59  ;;  %v1065_v27 = vand.u32 %v2602_v16, %v2912_v5  ;;  %v2609_v59 = vld [vmem:[%s4576_s0 + $0x490] sm:$0xf]  ;;  %v2860_v60 = vld [vmem:[%s4576_s0 + $0x514] sm:$0x30]  ;;  %v2706_v14 = vld [vmem:[%s4576_s0 + $0x4c] sm:$0xf] }
  0x41   :  { %1262 = vmatpush.bf16.msra.mxu3 %v2030_v19  ;;  %2671 = vmatmul.msk.bf16.vlgmr.msra.gmra.mxu0 %vm1002_vm2, %v3081_v26  ;;  %v2038_v19 = vor.u32 %v2703_v8, %v2035_v9  ;;  %v1068_v28 = vand.u32 %v2606_v17, %v2912_v5  ;;  %v2194_v8 = vor.u32 %v2757_v56, %v2193_v55  ;;  %v2059_v15 = vld [vmem:[%s4576_s0 + $0xd0] sm:$0xf0]  ;;  %v2809_v31 = vld [vmem:[%s4576_s0 + $0x384] sm:$0xf]  ;;  %v2475_v32 = vld [vmem:[%s4576_s0 + $0x408] sm:$0xf0] }
  0x42   :  { %1271 = vmatpush.bf16.msrb.mxu0 %v1047_v20  ;;  %2672 = vmatmul.msk.bf16.vlgmr.msra.gmra.mxu1 %vm1002_vm2, %v3081_v26  ;;  %v2042_v20 = vor.u32 %v2721_v11, %v2041_v10  ;;  %v2198_v9 = vor.u32 %v2740_v57, %v2195_v58  ;;  %v2705_v10 = vld [vmem:[%s4576_s0 + $0x44] sm:$0xf]  ;;  %v2051_v11 = vld [vmem:[%s4576_s0 + $0xc8] sm:$0xf0]  ;;  %v2610_v16 = vor.u32 %v2860_v60, %v2609_v59  ;;  %v2775_v43 = vld [vmem:[%s4576_s0 + $0x274] sm:$0xf] }
  0x43   :  { %1284 = vmatpush.bf16.msrb.mxu1 %v1050_v21  ;;  %2673 = vmatmul.msk.bf16.vlgmr.msra.gmra.mxu2 %vm1002_vm2, %v3081_v26  ;;  %v2046_v21 = vor.u32 %v2704_v12, %v2043_v13  ;;  %v2057_v12 = vld [vmem:[%s4576_s0 + $0x48] sm:$0xf]  ;;  %v2723_v13 = vld [vmem:[%s4576_s0 + $0xcc] sm:$0xf0]  ;;  %v2339_v44 = vld [vmem:[%s4576_s0 + $0x2f8] sm:$0xf0] }
  0x44   :  { %1297 = vmatpush.bf16.msrb.mxu2 %v1053_v24  ;;  %2674 = vmatmul.msk.bf16.vlgmr.msra.gmra.mxu3 %vm1002_vm2, %v3081_v26  ;;  %v2457_v24 = vld [vmem:[%s4576_s0 + $0x370] sm:$0xf]  ;;  %v2209_v57 = vld [vmem:[%s4576_s0 + $0x168] sm:$0xf]  ;;  %v2742_v59 = vld [vmem:[%s4576_s0 + $0x16c] sm:$0xf] }
  0x45   :  { %1310 = vmatpush.bf16.msrb.mxu3 %v1056_v25  ;;  %v2824_v25 = vld [vmem:[%s4576_s0 + $0x3f4] sm:$0xf0]  ;;  %v2759_v58 = vld [vmem:[%s4576_s0 + $0x1ec] sm:$0xf0]  ;;  %v2211_v60 = vld [vmem:[%s4576_s0 + $0x1f0] sm:$0xf0] }
  0x46   :  { %1272 = vmatpush.bf16.msrb.mxu0 %v2442_v33  ;;  %v2808_v33 = vld [vmem:[%s4576_s0 + $0x37c] sm:$0xf]  ;;  %v2458_v35 = vor.u32 %v2824_v25, %v2457_v24  ;;  %v1071_v24 = vand.u32 %v2610_v16, %v2912_v5  ;;  %vm1919_vm9 = vsmask.f32 2304  ;;  %vm1921_vm10 = vcmask 1046532  }
  0x47   :  { %1285 = vmatpush.bf16.msrb.mxu1 %v2446_v34  ;;  %v2467_v34 = vld [vmem:[%s4576_s0 + $0x400] sm:$0xf0]  ;;  %v2708_v16 = vld [vmem:[%s4576_s0 + $0x5c] sm:$0xf]  ;;  %vm1922_vm11 = vsmask.f32 6400  ;;  %vm4382_vm12 = vmand %vm1918_vm8, %vm1919_vm9 }
  0x48   :  { %1298 = vmatpush.bf16.msrb.mxu2 %v2450_v37  ;;  %v2321_v37 = vld [vmem:[%s4576_s0 + $0x260] sm:$0xf]  ;;  %v2470_v40 = vor.u32 %v2808_v33, %v2467_v34  ;;  %v2481_v33 = vld [vmem:[%s4576_s0 + $0x388] sm:$0xf]  ;;  %v2827_v34 = vld [vmem:[%s4576_s0 + $0x40c] sm:$0xf0] }
  0x49   :  { %1311 = vmatpush.bf16.msrb.mxu3 %v2454_v38  ;;  %v2790_v38 = vld [vmem:[%s4576_s0 + $0x2e4] sm:$0xf0]  ;;  %v2482_v41 = vor.u32 %v2827_v34, %v2481_v33  ;;  %v2811_v33 = vld [vmem:[%s4576_s0 + $0x394] sm:$0xf]  ;;  %v2491_v34 = vld [vmem:[%s4576_s0 + $0x418] sm:$0xf0] }
  0x4a   :  { %1273 = vmatpush.bf16.msrb.mxu0 %v2306_v46  ;;  %v2331_v46 = vld [vmem:[%s4576_s0 + $0x2f0] sm:$0xf0]  ;;  %v2322_v48 = vor.u32 %v2790_v38, %v2321_v37  ;;  %v2478_v38 = vor.u32 %v2809_v31, %v2475_v32  ;;  %vm1923_vm13 = vmand %vm1921_vm10, %vm1922_vm11  ;;  %vm1973_vm15 = vcmask 63492  }
  0x4b   :  { %1286 = vmatpush.bf16.msrb.mxu1 %v2310_v47  ;;  %v2185_v47 = vld [vmem:[%s4576_s0 + $0x150] sm:$0xf]  ;;  %v2334_v54 = vor.u32 %v2774_v45, %v2331_v46  ;;  %v2345_v45 = vld [vmem:[%s4576_s0 + $0x278] sm:$0xf]  ;;  %v2793_v46 = vld [vmem:[%s4576_s0 + $0x2fc] sm:$0xf0] }
  0x4c   :  { %1299 = vmatpush.bf16.msrb.mxu2 %v2314_v51  ;;  %v2739_v51 = vld [vmem:[%s4576_s0 + $0x154] sm:$0xf]  ;;  %v2186_v2 = vor.u32 %v2756_v50, %v2185_v47  ;;  %v2776_v47 = vld [vmem:[%s4576_s0 + $0x27c] sm:$0xf]  ;;  %v2346_v55 = vor.u32 %v2793_v46, %v2345_v45  ;;  %v2777_v45 = vld [vmem:[%s4576_s0 + $0x284] sm:$0xf] }
  0x4d   :  { %1312 = vmatpush.bf16.msrb.mxu3 %v2318_v52  ;;  %v2187_v52 = vld [vmem:[%s4576_s0 + $0x1d8] sm:$0xf0]  ;;  %v2355_v46 = vld [vmem:[%s4576_s0 + $0x308] sm:$0xf0]  ;;  %vm4408_vm14 = vmor %vm1923_vm13, %vm4382_vm12 }
  0x4e   :  { %1274 = vmatpush.bf16.msrb.mxu0 %v2170_v0  ;;  %v2611_v0 = vld [vmem:[%s4576_s0 + $0x518] sm:$0x30]  ;;  %v2190_v3 = vor.u32 %v2739_v51, %v2187_v52  ;;  %v2342_v51 = vor.u32 %v2775_v43, %v2339_v44  ;;  %v2758_v52 = vld [vmem:[%s4576_s0 + $0x1e4] sm:$0xf0] }
  0x4f   :  { %1287 = vmatpush.bf16.msrb.mxu1 %v2174_v1  ;;  %v2617_v1 = vld [vmem:[%s4576_s0 + $0x498] sm:$0xf]  ;;  %v2614_v17 = vor.u32 %v2843_v63, %v2611_v0  ;;  %v2065_v63 = vld [vmem:[%s4576_s0 + $0x50] sm:$0xf] }
  0x50   :  { %1300 = vmatpush.bf16.msrb.mxu2 %v2178_v6  ;;  %v2844_v6 = vld [vmem:[%s4576_s0 + $0x49c] sm:$0xf]  ;;  %v2724_v0 = vld [vmem:[%s4576_s0 + $0xd4] sm:$0xf0] }
  0x51   :  { %1313 = vmatpush.bf16.msrb.mxu3 %v2182_v7  ;;  %v2619_v7 = vld [vmem:[%s4576_s0 + $0x520] sm:$0x30]  ;;  %v1074_v25 = vand.u32 %v2614_v17, %v2912_v5 }
  0x52   :  { %1275 = vmatpush.bf16.msrb.mxu0 %v2034_v18  ;;  %v2618_v18 = vor.u32 %v2861_v4, %v2617_v1  ;;  %v2845_v1 = vld [vmem:[%s4576_s0 + $0x4a4] sm:$0xf] }
  0x53   :  { %1288 = vmatpush.bf16.msrb.mxu1 %v2038_v19  ;;  %v2622_v19 = vor.u32 %v2844_v6, %v2619_v7  ;;  %v2863_v7 = vld [vmem:[%s4576_s0 + $0x52c] sm:$0x30]  ;;  %v2075_v17 = vld [vmem:[%s4576_s0 + $0xe0] sm:$0xf0] }
  0x54   :  { %1301 = vmatpush.bf16.msrb.mxu2 %v2042_v20  ;;  %v2050_v20 = vor.u32 %v2722_v62, %v2049_v61  ;;  %v1077_v29 = vand.u32 %v2618_v18, %v2912_v5  ;;  %v2625_v61 = vld [vmem:[%s4576_s0 + $0x4a0] sm:$0xf]  ;;  %v2862_v62 = vld [vmem:[%s4576_s0 + $0x524] sm:$0x30] }
  0x55   :  { %1314 = vmatpush.bf16.msrb.mxu3 %v2046_v21  ;;  %2675 = vmatmul.msk.bf16.vlgmr.msrb.gmra.mxu0 %vm1002_vm2, %v3081_v26  ;;  %v2054_v21 = vor.u32 %v2705_v10, %v2051_v11  ;;  %v1080_v30 = vand.u32 %v2622_v19, %v2912_v5  ;;  %v2210_v10 = vor.u32 %v2759_v58, %v2209_v57  ;;  %v2225_v58 = vld [vmem:[%s4576_s0 + $0x178] sm:$0xf] }
  0x56   :  { %1323 = vmatpush.bf16.msra.mxu0 %v1059_v22  ;;  %2676 = vmatmul.msk.bf16.vlgmr.msrb.gmra.mxu1 %vm1002_vm2, %v3081_v26  ;;  %v2058_v22 = vor.u32 %v2723_v13, %v2057_v12  ;;  %v2214_v11 = vor.u32 %v2742_v59, %v2211_v60  ;;  %v2707_v12 = vld [vmem:[%s4576_s0 + $0x54] sm:$0xf]  ;;  %v2067_v13 = vld [vmem:[%s4576_s0 + $0xd8] sm:$0xf0]  ;;  %v2626_v18 = vor.u32 %v2862_v62, %v2625_v61  ;;  %v2761_v59 = vld [vmem:[%s4576_s0 + $0x1fc] sm:$0xf0] }
  0x57   :  { %1336 = vmatpush.bf16.msra.mxu1 %v1062_v23  ;;  %2677 = vmatmul.msk.bf16.vlgmr.msrb.gmra.mxu2 %vm1002_vm2, %v3081_v26  ;;  %v2062_v23 = vor.u32 %v2706_v14, %v2059_v15  ;;  %v2073_v14 = vld [vmem:[%s4576_s0 + $0x58] sm:$0xf]  ;;  %v2725_v15 = vld [vmem:[%s4576_s0 + $0xdc] sm:$0xf0]  ;;  %v2744_v60 = vld [vmem:[%s4576_s0 + $0x17c] sm:$0xf] }
  0x58   :  { %1349 = vmatpush.bf16.msra.mxu2 %v1065_v27  ;;  %2678 = vmatmul.msk.bf16.vlgmr.msrb.gmra.mxu3 %vm1002_vm2, %v3081_v26  ;;  %v2473_v27 = vld [vmem:[%s4576_s0 + $0x380] sm:$0xf]  ;;  %v2227_v61 = vld [vmem:[%s4576_s0 + $0x200] sm:$0xf0]  ;;  %v2641_v62 = vld [vmem:[%s4576_s0 + $0x4b0] sm:$0xf] }
  0x59   :  { %1362 = vmatpush.bf16.msra.mxu3 %v1068_v28  ;;  %v2826_v28 = vld [vmem:[%s4576_s0 + $0x404] sm:$0xf0] }
  0x5a   :  { %1324 = vmatpush.bf16.msra.mxu0 %v2458_v35  ;;  %v2810_v35 = vld [vmem:[%s4576_s0 + $0x38c] sm:$0xf]  ;;  %v2474_v37 = vor.u32 %v2826_v28, %v2473_v27  ;;  %v1083_v27 = vand.u32 %v2626_v18, %v2912_v5  ;;  %v2091_v18 = vld [vmem:[%s4576_s0 + $0xf0] sm:$0xf0] }
  0x5b   :  { %1337 = vmatpush.bf16.msra.mxu1 %v2462_v36  ;;  %v2483_v36 = vld [vmem:[%s4576_s0 + $0x410] sm:$0xf0] }
  0x5c   :  { %1350 = vmatpush.bf16.msra.mxu2 %v2466_v39  ;;  %v2337_v39 = vld [vmem:[%s4576_s0 + $0x270] sm:$0xf]  ;;  %v2486_v42 = vor.u32 %v2810_v35, %v2483_v36  ;;  %v2497_v35 = vld [vmem:[%s4576_s0 + $0x398] sm:$0xf]  ;;  %v2829_v36 = vld [vmem:[%s4576_s0 + $0x41c] sm:$0xf0] }
  0x5d   :  { %1363 = vmatpush.bf16.msra.mxu3 %v2470_v40  ;;  %v2792_v40 = vld [vmem:[%s4576_s0 + $0x2f4] sm:$0xf0]  ;;  %v2498_v43 = vor.u32 %v2829_v36, %v2497_v35  ;;  %v2507_v35 = vld [vmem:[%s4576_s0 + $0x428] sm:$0xf0]  ;;  %v2513_v36 = vld [vmem:[%s4576_s0 + $0x3a8] sm:$0xf] }
  0x5e   :  { %1325 = vmatpush.bf16.msra.mxu0 %v2322_v48  ;;  %v2347_v48 = vld [vmem:[%s4576_s0 + $0x300] sm:$0xf0]  ;;  %v2338_v50 = vor.u32 %v2792_v40, %v2337_v39  ;;  %v2494_v40 = vor.u32 %v2811_v33, %v2491_v34 }
  0x5f   :  { %1338 = vmatpush.bf16.msra.mxu1 %v2326_v49  ;;  %v2201_v49 = vld [vmem:[%s4576_s0 + $0x160] sm:$0xf]  ;;  %v2350_v56 = vor.u32 %v2776_v47, %v2347_v48  ;;  %v2361_v47 = vld [vmem:[%s4576_s0 + $0x288] sm:$0xf]  ;;  %v2795_v48 = vld [vmem:[%s4576_s0 + $0x30c] sm:$0xf0] }
  0x60   :  { %1351 = vmatpush.bf16.msra.mxu2 %v2330_v53  ;;  %v2741_v53 = vld [vmem:[%s4576_s0 + $0x164] sm:$0xf]  ;;  %v2202_v4 = vor.u32 %v2758_v52, %v2201_v49  ;;  %v2778_v49 = vld [vmem:[%s4576_s0 + $0x28c] sm:$0xf] }
  0x61   :  { %1364 = vmatpush.bf16.msra.mxu3 %v2334_v54  ;;  %v2203_v54 = vld [vmem:[%s4576_s0 + $0x1e8] sm:$0xf0]  ;;  %v2813_v34 = vld [vmem:[%s4576_s0 + $0x3a4] sm:$0xf] }
  0x62   :  { %1326 = vmatpush.bf16.msra.mxu0 %v2186_v2  ;;  %v2627_v2 = vld [vmem:[%s4576_s0 + $0x528] sm:$0x30]  ;;  %v2206_v6 = vor.u32 %v2741_v53, %v2203_v54  ;;  %v2358_v53 = vor.u32 %v2777_v45, %v2355_v46  ;;  %v2760_v54 = vld [vmem:[%s4576_s0 + $0x1f4] sm:$0xf0]  ;;  %v2779_v46 = vld [vmem:[%s4576_s0 + $0x294] sm:$0xf] }
  0x63   :  { %1339 = vmatpush.bf16.msra.mxu1 %v2190_v3  ;;  %v2633_v3 = vld [vmem:[%s4576_s0 + $0x4a8] sm:$0xf]  ;;  %v2630_v19 = vor.u32 %v2845_v1, %v2627_v2  ;;  %v2847_v2 = vld [vmem:[%s4576_s0 + $0x4b4] sm:$0xf] }
  0x64   :  { %1352 = vmatpush.bf16.msra.mxu2 %v2194_v8  ;;  %v2846_v8 = vld [vmem:[%s4576_s0 + $0x4ac] sm:$0xf]  ;;  %v2726_v1 = vld [vmem:[%s4576_s0 + $0xe4] sm:$0xf0] }
  0x65   :  { %1365 = vmatpush.bf16.msra.mxu3 %v2198_v9  ;;  %v2635_v9 = vld [vmem:[%s4576_s0 + $0x530] sm:$0x30]  ;;  %v1086_v28 = vand.u32 %v2630_v19, %v2912_v5 }
  0x66   :  { %1327 = vmatpush.bf16.msra.mxu0 %v2050_v20  ;;  %v2634_v20 = vor.u32 %v2863_v7, %v2633_v3  ;;  %v2643_v3 = vld [vmem:[%s4576_s0 + $0x538] sm:$0x30] }
  0x67   :  { %1340 = vmatpush.bf16.msra.mxu1 %v2054_v21  ;;  %v2638_v21 = vor.u32 %v2846_v8, %v2635_v9  ;;  %v2865_v8 = vld [vmem:[%s4576_s0 + $0x53c] sm:$0x30]  ;;  %v2848_v9 = vld [vmem:[%s4576_s0 + $0x4bc] sm:$0xf] }
  0x68   :  { %1353 = vmatpush.bf16.msra.mxu2 %v2058_v22  ;;  %v2066_v22 = vor.u32 %v2724_v0, %v2065_v63  ;;  %v1089_v31 = vand.u32 %v2634_v20, %v2912_v5  ;;  %v2864_v63 = vld [vmem:[%s4576_s0 + $0x534] sm:$0x30]  ;;  %v2081_v0 = vld [vmem:[%s4576_s0 + $0x60] sm:$0xf]  ;;  %v2646_v20 = vor.u32 %v2847_v2, %v2643_v3  ;;  %v2849_v2 = vld [vmem:[%s4576_s0 + $0x4c4] sm:$0xf] }
  0x69   :  { %1366 = vmatpush.bf16.msra.mxu3 %v2062_v23  ;;  %2679 = vmatmul.msk.bf16.vlgmr.msra.gmra.mxu0 %vm1002_vm2, %v3081_v26  ;;  %v2070_v23 = vor.u32 %v2707_v12, %v2067_v13  ;;  %v1092_v32 = vand.u32 %v2638_v21, %v2912_v5  ;;  %v2230_v12 = vor.u32 %v2744_v60, %v2227_v61  ;;  %v2709_v13 = vld [vmem:[%s4576_s0 + $0x64] sm:$0xf]  ;;  %v2241_v60 = vld [vmem:[%s4576_s0 + $0x188] sm:$0xf]  ;;  %v2763_v61 = vld [vmem:[%s4576_s0 + $0x20c] sm:$0xf0] }
  0x6a   :  { %1375 = vmatpush.bf16.msrb.mxu0 %v1071_v24  ;;  %2680 = vmatmul.msk.bf16.vlgmr.msra.gmra.mxu1 %vm1002_vm2, %v3081_v26  ;;  %v2074_v24 = vor.u32 %v2725_v15, %v2073_v14  ;;  %v2083_v14 = vld [vmem:[%s4576_s0 + $0xe8] sm:$0xf0]  ;;  %v2089_v15 = vld [vmem:[%s4576_s0 + $0x68] sm:$0xf]  ;;  %v2642_v19 = vor.u32 %v2864_v63, %v2641_v62  ;;  %v2243_v63 = vld [vmem:[%s4576_s0 + $0x210] sm:$0xf0] }
  0x6b   :  { %1388 = vmatpush.bf16.msrb.mxu1 %v1074_v25  ;;  %2681 = vmatmul.msk.bf16.vlgmr.msra.gmra.mxu2 %vm1002_vm2, %v3081_v26  ;;  %v2078_v25 = vor.u32 %v2708_v16, %v2075_v17  ;;  %v2727_v16 = vld [vmem:[%s4576_s0 + $0xec] sm:$0xf0]  ;;  %v2710_v17 = vld [vmem:[%s4576_s0 + $0x6c] sm:$0xf] }
  0x6c   :  { %1401 = vmatpush.bf16.msrb.mxu2 %v1077_v29  ;;  %2682 = vmatmul.msk.bf16.vlgmr.msra.gmra.mxu3 %vm1002_vm2, %v3081_v26  ;;  %v2489_v29 = vld [vmem:[%s4576_s0 + $0x390] sm:$0xf]  ;;  %v2746_v62 = vld [vmem:[%s4576_s0 + $0x18c] sm:$0xf] }
  0x6d   :  { %1414 = vmatpush.bf16.msrb.mxu3 %v1080_v30  ;;  %v2828_v30 = vld [vmem:[%s4576_s0 + $0x414] sm:$0xf0]  ;;  %v2659_v3 = vld [vmem:[%s4576_s0 + $0x548] sm:$0x30] }
  0x6e   :  { %1376 = vmatpush.bf16.msrb.mxu0 %v2474_v37  ;;  %v2812_v37 = vld [vmem:[%s4576_s0 + $0x39c] sm:$0xf]  ;;  %v2490_v39 = vor.u32 %v2828_v30, %v2489_v29  ;;  %v1098_v29 = vand.u32 %v2646_v20, %v2912_v5  ;;  %v2505_v30 = vld [vmem:[%s4576_s0 + $0x3a0] sm:$0xf] }
  0x6f   :  { %1389 = vmatpush.bf16.msrb.mxu1 %v2478_v38  ;;  %v2499_v38 = vld [vmem:[%s4576_s0 + $0x420] sm:$0xf0] }
  0x70   :  { %1402 = vmatpush.bf16.msrb.mxu2 %v2482_v41  ;;  %v2353_v41 = vld [vmem:[%s4576_s0 + $0x280] sm:$0xf]  ;;  %v2502_v44 = vor.u32 %v2812_v37, %v2499_v38  ;;  %v2831_v37 = vld [vmem:[%s4576_s0 + $0x42c] sm:$0xf0]  ;;  %v2814_v38 = vld [vmem:[%s4576_s0 + $0x3ac] sm:$0xf] }
  0x71   :  { %1415 = vmatpush.bf16.msrb.mxu3 %v2486_v42  ;;  %v2794_v42 = vld [vmem:[%s4576_s0 + $0x304] sm:$0xf0] }
  0x72   :  { %1377 = vmatpush.bf16.msrb.mxu0 %v2338_v50  ;;  %v2363_v50 = vld [vmem:[%s4576_s0 + $0x310] sm:$0xf0]  ;;  %v2354_v52 = vor.u32 %v2794_v42, %v2353_v41  ;;  %v2510_v41 = vor.u32 %v2813_v34, %v2507_v35  ;;  %v2369_v42 = vld [vmem:[%s4576_s0 + $0x290] sm:$0xf]  ;;  %v2781_v34 = vld [vmem:[%s4576_s0 + $0x2a4] sm:$0xf] }
  0x73   :  { %1390 = vmatpush.bf16.msrb.mxu1 %v2342_v51  ;;  %v2217_v51 = vld [vmem:[%s4576_s0 + $0x170] sm:$0xf]  ;;  %v2366_v57 = vor.u32 %v2778_v49, %v2363_v50  ;;  %v3899_v49 = vld [vmem:[%s4577_s1] sm:$0x7]  ;;  %v2387_v35 = vld [vmem:[%s4576_s0 + $0x328] sm:$0xf0] }
  0x74   :  { %1403 = vmatpush.bf16.msrb.mxu2 %v2346_v55  ;;  %v2743_v55 = vld [vmem:[%s4576_s0 + $0x174] sm:$0xf]  ;;  %v2797_v50 = vld [vmem:[%s4576_s0 + $0x31c] sm:$0xf0] }
  0x75   :  { %1416 = vmatpush.bf16.msrb.mxu3 %v2350_v56  ;;  %v2362_v56 = vor.u32 %v2795_v48, %v2361_v47  ;;  %v2371_v47 = vld [vmem:[%s4576_s0 + $0x318] sm:$0xf0]  ;;  %v2377_v48 = vld [vmem:[%s4576_s0 + $0x298] sm:$0xf] }
  0x76   :  { %1378 = vmatpush.bf16.msrb.mxu0 %v2202_v4  ;;  %v2649_v4 = vld [vmem:[%s4576_s0 + $0x4b8] sm:$0xf] }
  0x77   :  { %1391 = vmatpush.bf16.msrb.mxu1 %v2206_v6  ;;  %v2218_v6 = vor.u32 %v2760_v54, %v2217_v51  ;;  %v2650_v21 = vor.u32 %v2865_v8, %v2649_v4  ;;  %v2780_v51 = vld [vmem:[%s4576_s0 + $0x29c] sm:$0xf]  ;;  %v2374_v54 = vor.u32 %v2779_v46, %v2371_v47  ;;  %v2728_v8 = vld [vmem:[%s4576_s0 + $0xf4] sm:$0xf0]  ;;  %v2113_v46 = vld [vmem:[%s4576_s0 + $0x80] sm:$0xf] }
  0x78   :  { %1404 = vmatpush.bf16.msrb.mxu2 %v2210_v10  ;;  %v2651_v10 = vld [vmem:[%s4576_s0 + $0x540] sm:$0x30] }
  0x79   :  { %1417 = vmatpush.bf16.msrb.mxu3 %v2214_v11  ;;  %v2226_v11 = vor.u32 %v2761_v59, %v2225_v58  ;;  %v2235_v59 = vld [vmem:[%s4576_s0 + $0x208] sm:$0xf0] }
  0x7a   :  { %1379 = vmatpush.bf16.msrb.mxu0 %v2066_v22  ;;  %v2654_v22 = vor.u32 %v2848_v9, %v2651_v10  ;;  %v2242_v9 = vor.u32 %v2763_v61, %v2241_v60  ;;  %v2246_v10 = vor.u32 %v2746_v62, %v2243_v63 }
  0x7b   :  { %1392 = vmatpush.bf16.msrb.mxu1 %v2070_v23  ;;  %v2082_v23 = vor.u32 %v2726_v1, %v2081_v0  ;;  %v2657_v0 = vld [vmem:[%s4576_s0 + $0x4c0] sm:$0xf]  ;;  %v2866_v1 = vld [vmem:[%s4576_s0 + $0x544] sm:$0x30] }
  0x7c   :  { %1405 = vmatpush.bf16.msrb.mxu2 %v2074_v24  ;;  %v2086_v24 = vor.u32 %v2709_v13, %v2083_v14  ;;  %v1104_v33 = vand.u32 %v2654_v22, %v2912_v5  ;;  %v2105_v13 = vld [vmem:[%s4576_s0 + $0x78] sm:$0xf]  ;;  %v2729_v14 = vld [vmem:[%s4576_s0 + $0xfc] sm:$0xf0] }
  0x7d   :  { %1418 = vmatpush.bf16.msrb.mxu3 %v2078_v25  ;;  %2683 = vmatmul.msk.bf16.vlgmr.msrb.gmra.mxu0 %vm1002_vm2, %v3081_v26  ;;  %v2090_v25 = vor.u32 %v2727_v16, %v2089_v15  ;;  %v2712_v15 = vld [vmem:[%s4576_s0 + $0x7c] sm:$0xf]  ;;  %v2107_v16 = vld [vmem:[%s4576_s0 + $0x100] sm:$0xf0] }
  0x7e   :  { %1427 = vmatpush.bf16.msra.mxu0 %v1083_v27  ;;  %2684 = vmatmul.msk.bf16.vlgmr.msrb.gmra.mxu1 %vm1002_vm2, %v3081_v26  ;;  %v2094_v27 = vor.u32 %v2710_v17, %v2091_v18  ;;  %v2658_v17 = vor.u32 %v2866_v1, %v2657_v0  ;;  %v2662_v18 = vor.u32 %v2849_v2, %v2659_v3 }
  0x7f   :  { %1440 = vmatpush.bf16.msra.mxu1 %v1086_v28  ;;  %2685 = vmatmul.msk.bf16.vlgmr.msrb.gmra.mxu2 %vm1002_vm2, %v3081_v26  ;;  %v1095_v28 = vand.u32 %v2642_v19, %v2912_v5  ;;  %v2110_v22 = vor.u32 %v2712_v15, %v2107_v16 }
  0x80   :  { %1453 = vmatpush.bf16.msra.mxu2 %v1089_v31  ;;  %2686 = vmatmul.msk.bf16.vlgmr.msrb.gmra.mxu3 %vm1002_vm2, %v3081_v26  ;;  %v2219_v26 = vld [vmem:[%s4576_s0 + $0x1f8] sm:$0xf0]  ;;  %v2830_v31 = vld [vmem:[%s4576_s0 + $0x424] sm:$0xf0] }
  0x81   :  { %1466 = vmatpush.bf16.msra.mxu3 %v1092_v32  ;;  %v2222_v7 = vor.u32 %v2743_v55, %v2219_v26  ;;  %v1101_v32 = vand.u32 %v2650_v21, %v2912_v5  ;;  %v2233_v55 = vld [vmem:[%s4576_s0 + $0x180] sm:$0xf]  ;;  %v2762_v26 = vld [vmem:[%s4576_s0 + $0x204] sm:$0xf0]  ;;  %v2106_v21 = vor.u32 %v2729_v14, %v2105_v13 }
  0x82   :  { %1428 = vmatpush.bf16.msra.mxu0 %v2490_v39  ;;  %v2515_v39 = vld [vmem:[%s4576_s0 + $0x430] sm:$0xf0]  ;;  %v2234_v4 = vor.u32 %v2762_v26, %v2233_v55 }
  0x83   :  { %1441 = vmatpush.bf16.msra.mxu1 %v2494_v40  ;;  %v2506_v40 = vor.u32 %v2830_v31, %v2505_v30  ;;  %v2518_v45 = vor.u32 %v2814_v38, %v2515_v39  ;;  %v2385_v31 = vld [vmem:[%s4576_s0 + $0x2a0] sm:$0xf]  ;;  %v2390_v38 = vor.u32 %v2781_v34, %v2387_v35  ;;  %v2249_v39 = vld [vmem:[%s4576_s0 + $0x190] sm:$0xf] }
  0x84   :  { %1454 = vmatpush.bf16.msra.mxu2 %v2498_v43  ;;  %v2796_v43 = vld [vmem:[%s4576_s0 + $0x314] sm:$0xf0] }
  0x85   :  { %1467 = vmatpush.bf16.msra.mxu3 %v2502_v44  ;;  %v2514_v44 = vor.u32 %v2831_v37, %v2513_v36 }
  0x86   :  { %1429 = vmatpush.bf16.msra.mxu0 %v2354_v52  ;;  %v2379_v52 = vld [vmem:[%s4576_s0 + $0x320] sm:$0xf0] }
  0x87   :  { %1442 = vmatpush.bf16.msra.mxu1 %v2358_v53  ;;  %v2370_v53 = vor.u32 %v2796_v43, %v2369_v42  ;;  %v2382_v58 = vor.u32 %v2780_v51, %v2379_v52  ;;  %v2251_v42 = vld [vmem:[%s4576_s0 + $0x218] sm:$0xf0]  ;;  %v2115_v51 = vld [vmem:[%s4576_s0 + $0x108] sm:$0xf0] }
  0x88   :  { %1455 = vmatpush.bf16.msra.mxu2 %v2362_v56  ;;  %v2745_v56 = vld [vmem:[%s4576_s0 + $0x184] sm:$0xf] }
  0x89   :  { %1468 = vmatpush.bf16.msra.mxu3 %v2366_v57  ;;  %v2378_v57 = vor.u32 %v2797_v50, %v2377_v48  ;;  %v2730_v48 = vld [vmem:[%s4576_s0 + $0x104] sm:$0xf0]  ;;  %v2713_v50 = vld [vmem:[%s4576_s0 + $0x84] sm:$0xf] }
  0x8a   :  { %1430 = vmatpush.bf16.msra.mxu0 %v2218_v6  ;;  %v2238_v6 = vor.u32 %v2745_v56, %v2235_v59  ;;  %v2118_v55 = vor.u32 %v2713_v50, %v2115_v51 }
  0x8b   :  { %1443 = vmatpush.bf16.msra.mxu1 %v2222_v7  ;;  %v2097_v7 = vld [vmem:[%s4576_s0 + $0x70] sm:$0xf] }
  0x8c   :  { %1456 = vmatpush.bf16.msra.mxu2 %v2226_v11  ;;  %v2711_v11 = vld [vmem:[%s4576_s0 + $0x74] sm:$0xf]  ;;  %v2098_v19 = vor.u32 %v2728_v8, %v2097_v7 }
  0x8d   :  { %1469 = vmatpush.bf16.msra.mxu3 %v2230_v12  ;;  %v2099_v12 = vld [vmem:[%s4576_s0 + $0xf8] sm:$0xf0] }
  0x8e   :  { %1431 = vmatpush.bf16.msra.mxu0 %v2082_v23  ;;  %v2102_v20 = vor.u32 %v2711_v11, %v2099_v12  ;;  %v1107_v23 = vand.u32 %v2658_v17, %v2912_v5 }
  0x8f   :  { %1444 = vmatpush.bf16.msra.mxu1 %v2086_v24  ;;  %v1110_v24 = vand.u32 %v2662_v18, %v2912_v5 }
  0x90   :  { %1457 = vmatpush.bf16.msra.mxu2 %v2090_v25  ;;  %v2521_v25 = vld [vmem:[%s4576_s0 + $0x3b0] sm:$0xf] }
  0x91   :  { %1470 = vmatpush.bf16.msra.mxu3 %v2094_v27  ;;  %2687 = vmatmul.msk.bf16.vlgmr.msra.gmra.mxu0 %vm1002_vm2, %v3899_v49  ;;  %v2832_v27 = vld [vmem:[%s4576_s0 + $0x434] sm:$0xf0] }
  0x92   :  { %1479 = vmatpush.bf16.msrb.mxu0 %v1095_v28  ;;  %2688 = vmatmul.msk.bf16.vlgmr.msra.gmra.mxu1 %vm1002_vm2, %v3899_v49  ;;  %v2815_v28 = vld [vmem:[%s4576_s0 + $0x3b4] sm:$0xf]  ;;  %v2522_v5 = vor.u32 %v2832_v27, %v2521_v25 }
  0x93   :  { %1492 = vmatpush.bf16.msrb.mxu1 %v1098_v29  ;;  %2689 = vmatmul.msk.bf16.vlgmr.msra.gmra.mxu2 %vm1002_vm2, %v3899_v49  ;;  %v2523_v29 = vld [vmem:[%s4576_s0 + $0x438] sm:$0xf0] }
  0x94   :  { %1505 = vmatpush.bf16.msrb.mxu2 %v1101_v32  ;;  %2690 = vmatmul.msk.bf16.vlgmr.msra.gmra.mxu3 %vm1002_vm2, %v3899_v49  ;;  %v2526_v30 = vor.u32 %v2815_v28, %v2523_v29 }
  0x95   :  { %1518 = vmatpush.bf16.msrb.mxu3 %v1104_v33  ;;  %v2798_v33 = vld [vmem:[%s4576_s0 + $0x324] sm:$0xf0] }
  0x96   :  { %1480 = vmatpush.bf16.msrb.mxu0 %v2506_v40  ;;  %v3999_v32 = vpop.f32.mrf.mxu0  ;;  %v2386_v37 = vor.u32 %v2798_v33, %v2385_v31  ;;  %v2764_v40 = vld [vmem:[%s4576_s0 + $0x214] sm:$0xf0] }
  0x97   :  { %1493 = vmatpush.bf16.msrb.mxu1 %v2510_v41  ;;  %v4014_v36 = vpop.f32.mrf.mxu1  ;;  %v2747_v41 = vld [vmem:[%s4576_s0 + $0x194] sm:$0xf]  ;;  %v2250_v43 = vor.u32 %v2764_v40, %v2249_v39  ;;  %v1554_v7 = vsel %vm1006_vm0, %v3999_v32, 0.0 }
  0x98   :  { %1506 = vmatpush.bf16.msrb.mxu2 %v2514_v44  ;;  %v2254_v44 = vor.u32 %v2747_v41, %v2251_v42  ;;  %v1555_v8 = vsel %vm1006_vm0, %v4014_v36, 0.0 }
  0x99   :  { %1519 = vmatpush.bf16.msrb.mxu3 %v2518_v45 }
  0x9a   :  { %1481 = vmatpush.bf16.msrb.mxu0 %v2370_v53 }
  0x9b   :  { %1494 = vmatpush.bf16.msrb.mxu1 %v2374_v54  ;;  %v2114_v54 = vor.u32 %v2730_v48, %v2113_v46 }
  0x9c   :  { %1507 = vmatpush.bf16.msrb.mxu2 %v2378_v57 }
  0x9d   :  { %1520 = vmatpush.bf16.msrb.mxu3 %v2382_v58 }
  0x9e   :  { %1482 = vmatpush.bf16.msrb.mxu0 %v2234_v4  ;;  %v4028_v45 = vpop.f32.mrf.mxu2  ;;  %v1123_v47 = vpop.f32.mrf.mxu0 }
  0x9f   :  { %1495 = vmatpush.bf16.msrb.mxu1 %v2238_v6  ;;  %v4042_v52 = vpop.f32.mrf.mxu3  ;;  %v1136_v53 = vpop.f32.mrf.mxu1  ;;  %v1557_v12 = vsel %vm1006_vm0, %v4028_v45, 0.0 }
  0xa0   :  { %1508 = vmatpush.bf16.msrb.mxu2 %v2242_v9  ;;  %v1556_v9 = vadd.f32 %v1555_v8, %v1554_v7  ;;  %v1559_v16 = vsel %vm1006_vm0, %v4042_v52, 0.0 }
  0xa1   :  { %1521 = vmatpush.bf16.msrb.mxu3 %v2246_v10 }
  0xa2   :  { %1483 = vmatpush.bf16.msrb.mxu0 %v2098_v19  ;;  %v1558_v15 = vadd.f32 %v1557_v12, %v1556_v9 }
  0xa3   :  { %1496 = vmatpush.bf16.msrb.mxu1 %v2102_v20 }
  0xa4   :  { %1509 = vmatpush.bf16.msrb.mxu2 %v2106_v21  ;;  %v1560_v18 = vadd.f32 %v1559_v16, %v1558_v15 }
  0xa5   :  { %1522 = vmatpush.bf16.msrb.mxu3 %v2110_v22  ;;  %2691 = vmatmul.msk.bf16.vlgmr.msrb.gmra.mxu0 %vm1002_vm2, %v3899_v49 }
  0xa6   :  { %1531 = vmatpush.bf16.msra.mxu0 %v1107_v23  ;;  %2692 = vmatmul.msk.bf16.vlgmr.msrb.gmra.mxu1 %vm1002_vm2, %v3899_v49  ;;  %v1149_v26 = vpop.f32.mrf.mxu2 }
  0xa7   :  { %1544 = vmatpush.bf16.msra.mxu1 %v1110_v24  ;;  %2693 = vmatmul.msk.bf16.vlgmr.msrb.gmra.mxu2 %vm1002_vm2, %v3899_v49  ;;  %v1162_v56 = vpop.f32.mrf.mxu3 }
  0xa8   :  { %2694 = vmatmul.msk.bf16.vlgmr.msrb.gmra.mxu3 %vm1002_vm2, %v3899_v49 }
  0xaa   :  { %1532 = vmatpush.bf16.msra.mxu0 %v2522_v5  ;;  %v4048_v57 = vpop.f32.mrf.mxu0 }
  0xab   :  { %1545 = vmatpush.bf16.msra.mxu1 %v2526_v30  ;;  %v4050_v58 = vpop.f32.mrf.mxu1  ;;  %v1561_v17 = vsel %vm1006_vm0, %v4048_v57, 0.0 }
  0xac   :  { %v1562_v19 = vadd.f32 %v1561_v17, %v1560_v18  ;;  %v1563_v22 = vsel %vm1006_vm0, %v4050_v58, 0.0 }
  0xae   :  { %1533 = vmatpush.bf16.msra.mxu0 %v2386_v37  ;;  %v1564_v27 = vadd.f32 %v1563_v22, %v1562_v19 }
  0xaf   :  { %1546 = vmatpush.bf16.msra.mxu1 %v2390_v38 }
  0xb2   :  { %1534 = vmatpush.bf16.msra.mxu0 %v2250_v43  ;;  %v4052_v59 = vpop.f32.mrf.mxu2  ;;  %v1175_v61 = vpop.f32.mrf.mxu0 }
  0xb3   :  { %1547 = vmatpush.bf16.msra.mxu1 %v2254_v44  ;;  %v4054_v60 = vpop.f32.mrf.mxu3  ;;  %v1188_v62 = vpop.f32.mrf.mxu1  ;;  %v1565_v25 = vsel %vm1006_vm0, %v4052_v59, 0.0 }
  0xb4   :  { %v1566_v28 = vadd.f32 %v1565_v25, %v1564_v27  ;;  %v1567_v29 = vsel %vm1006_vm0, %v4054_v60, 0.0 }
  0xb6   :  { %1535 = vmatpush.bf16.msra.mxu0 %v2114_v54  ;;  %v1568_v33 = vadd.f32 %v1567_v29, %v1566_v28 }
  0xb7   :  { %1548 = vmatpush.bf16.msra.mxu1 %v2118_v55 }
  0xb9   :  { %2695 = vmatmul.msk.bf16.vlgmr.msra.gmra.mxu0 %vm1002_vm2, %v3899_v49 }
  0xba   :  { %2696 = vmatmul.msk.bf16.vlgmr.msra.gmra.mxu1 %vm1002_vm2, %v3899_v49  ;;  %v1201_v63 = vpop.f32.mrf.mxu2 }
  0xbb   :  { %v1214_v0 = vpop.f32.mrf.mxu3 }
  0xbe   :  { %v4056_v1 = vpop.f32.mrf.mxu0 }
  0xbf   :  { %v4058_v2 = vpop.f32.mrf.mxu1  ;;  %v1569_v31 = vsel %vm1006_vm0, %v4056_v1, 0.0 }
  0xc0   :  { %v1570_v37 = vadd.f32 %v1569_v31, %v1568_v33  ;;  %v1571_v38 = vsel %vm1006_vm0, %v4058_v2, 0.0 }
  0xc2   :  { %v1572_v40 = vadd.f32 %v1571_v38, %v1570_v37 }
  0xc6   :  { %v4060_v3 = vpop.f32.mrf.mxu2  ;;  %v1227_v49 = vpop.f32.mrf.mxu0 }
  0xc7   :  { %v4062_v4 = vpop.f32.mrf.mxu3  ;;  %v1240_v6 = vpop.f32.mrf.mxu1  ;;  %v1573_v39 = vsel %vm1006_vm0, %v4060_v3, 0.0 }
  0xc8   :  { %v1574_v41 = vadd.f32 %v1573_v39, %v1572_v40  ;;  %v1575_v44 = vsel %vm1006_vm0, %v4062_v4, 0.0 }
  0xca   :  { %v1576_v50 = vadd.f32 %v1575_v44, %v1574_v41 }
  0xce   :  { %v1253_v10 = vpop.f32.mrf.mxu2 }
  0xcf   :  { %v1266_v11 = vpop.f32.mrf.mxu3 }
  0xd2   :  { %v4070_v13 = vpop.f32.mrf.mxu0 }
  0xd3   :  { %v4072_v14 = vpop.f32.mrf.mxu1  ;;  %v1577_v48 = vsel %vm1006_vm0, %v4070_v13, 0.0 }
  0xd4   :  { %v1578_v51 = vadd.f32 %v1577_v48, %v1576_v50  ;;  %v1579_v53 = vsel %vm1006_vm0, %v4072_v14, 0.0 }
  0xd6   :  { %v1580_v56 = vadd.f32 %v1579_v53, %v1578_v51 }
  0xda   :  { %v4078_v20 = vpop.f32.mrf.mxu2  ;;  %v1279_v23 = vpop.f32.mrf.mxu0 }
  0xdb   :  { %v4080_v21 = vpop.f32.mrf.mxu3  ;;  %v1292_v24 = vpop.f32.mrf.mxu1  ;;  %v1581_v26 = vsel %vm1006_vm0, %v4078_v20, 0.0 }
  0xdc   :  { %v1582_v63 = vadd.f32 %v1581_v26, %v1580_v56  ;;  %v1583_v0 = vsel %vm1006_vm0, %v4080_v21, 0.0 }
  0xde   :  { %v1584_v6 = vadd.f32 %v1583_v0, %v1582_v63 }
  0xe2   :  { %v1305_v5 = vpop.f32.mrf.mxu2 }
  0xe3   :  { %v1318_v30 = vpop.f32.mrf.mxu3 }
  0xe6   :  { %v4090_v34 = vpop.f32.mrf.mxu0 }
  0xe7   :  { %v4092_v35 = vpop.f32.mrf.mxu1  ;;  %v1585_v49 = vsel %vm1006_vm0, %v4090_v34, 0.0 }
  0xe8   :  { %v1586_v7 = vadd.f32 %v1585_v49, %v1584_v6  ;;  %v1587_v10 = vsel %vm1006_vm0, %v4092_v35, 0.0 }
  0xea   :  { %v1588_v16 = vadd.f32 %v1587_v10, %v1586_v7 }
  0xee   :  { %v4098_v42 = vpop.f32.mrf.mxu2  ;;  %v1331_v46 = vpop.f32.mrf.mxu0 }
  0xef   :  { %v4100_v43 = vpop.f32.mrf.mxu3  ;;  %v1344_v47 = vpop.f32.mrf.mxu1  ;;  %v1589_v15 = vsel %vm1006_vm0, %v4098_v42, 0.0 }
  0xf0   :  { %v1590_v17 = vadd.f32 %v1589_v15, %v1588_v16  ;;  %v1591_v18 = vsel %vm1006_vm0, %v4100_v43, 0.0 }
  0xf2   :  { %v1592_v24 = vadd.f32 %v1591_v18, %v1590_v17 }
  0xf6   :  { %v1357_v54 = vpop.f32.mrf.mxu2 }
  0xf7   :  { %v1370_v55 = vpop.f32.mrf.mxu3 }
  0xfa   :  { %v4110_v61 = vpop.f32.mrf.mxu0 }
  0xfb   :  { %v4112_v62 = vpop.f32.mrf.mxu1  ;;  %v1593_v23 = vsel %vm1006_vm0, %v4110_v61, 0.0 }
  0xfc   :  { %v1594_v28 = vadd.f32 %v1593_v23, %v1592_v24  ;;  %v1595_v29 = vsel %vm1006_vm0, %v4112_v62, 0.0 }
  0xfe   :  { %v1596_v30 = vadd.f32 %v1595_v29, %v1594_v28 }
 0x102   :  { %v4118_v8 = vpop.f32.mrf.mxu2  ;;  %v1383_v11 = vpop.f32.mrf.mxu0 }
 0x103   :  { %v4120_v9 = vpop.f32.mrf.mxu3  ;;  %v1396_v12 = vpop.f32.mrf.mxu1  ;;  %v1597_v5 = vsel %vm1006_vm0, %v4118_v8, 0.0 }
 0x104   :  { %v1598_v31 = vadd.f32 %v1597_v5, %v1596_v30  ;;  %v1599_v38 = vsel %vm1006_vm0, %v4120_v9, 0.0 }
 0x106   :  { %v1600_v44 = vadd.f32 %v1599_v38, %v1598_v31 }
 0x10a   :  { %v1409_v19 = vpop.f32.mrf.mxu2 }
 0x10b   :  { %v1422_v22 = vpop.f32.mrf.mxu3 }
 0x10e   :  { %v4130_v25 = vpop.f32.mrf.mxu0 }
 0x10f   :  { %v4132_v27 = vpop.f32.mrf.mxu1  ;;  %v1601_v41 = vsel %vm1006_vm0, %v4130_v25, 0.0 }
 0x110   :  { %v1602_v46 = vadd.f32 %v1601_v41, %v1600_v44  ;;  %v1603_v47 = vsel %vm1006_vm0, %v4132_v27, 0.0 }
 0x112   :  { %v1604_v53 = vadd.f32 %v1603_v47, %v1602_v46 }
 0x116   :  { %v4138_v33 = vpop.f32.mrf.mxu2  ;;  %v1435_v39 = vpop.f32.mrf.mxu0 }
 0x117   :  { %v4140_v37 = vpop.f32.mrf.mxu3  ;;  %v1448_v40 = vpop.f32.mrf.mxu1  ;;  %v1605_v51 = vsel %vm1006_vm0, %v4138_v33, 0.0 }
 0x118   :  { %v1606_v26 = vadd.f32 %v1605_v51, %v1604_v53  ;;  %v1607_v56 = vsel %vm1006_vm0, %v4140_v37, 0.0  ;;  %v2881_v40 = vmov 4232.0  }
 0x119   :  { %2875 = vrcp.f32 %v2881_v40 }
 0x11a   :  { %v1608_v0 = vadd.f32 %v1607_v56, %v1606_v26 }
 0x11e   :  { %v1461_v48 = vpop.f32.mrf.mxu2 }
 0x11f   :  { %v1474_v50 = vpop.f32.mrf.mxu3  ;;  %v2876_v41 = vpop.eup %2875 }
 0x120   :  { %v1625_v44 = vmul.f32 4232.0, %v2876_v41  ;;  %vm1629_vm4 = vweird.f32 %v2876_v41 }
 0x122   :  { %v4150_v54 = vpop.f32.mrf.mxu0  ;;  %v1626_v46 = vsub.f32 1.0, %v1625_v44 }
 0x123   :  { %v4152_v55 = vpop.f32.mrf.mxu1  ;;  %v1609_v63 = vsel %vm1006_vm0, %v4150_v54, 0.0 }
 0x124   :  { %v1610_v7 = vadd.f32 %v1609_v63, %v1608_v0  ;;  %v1611_v12 = vsel %vm1006_vm0, %v4152_v55, 0.0  ;;  %v1627_v47 = vmul.f32 %v2876_v41, %v1626_v46 }
 0x126   :  { %v1612_v16 = vadd.f32 %v1611_v12, %v1610_v7  ;;  %v1628_v48 = vadd.f32 %v2876_v41, %v1627_v47 }
 0x128   :  { %v4176_v50 = vsel %vm1629_vm4, %v2876_v41, %v1628_v48 }
 0x12a   :  { %v4158_v49 = vpop.f32.mrf.mxu2  ;;  %v1487_v10 = vpop.f32.mrf.mxu0 }
 0x12b   :  { %v4160_v6 = vpop.f32.mrf.mxu3  ;;  %v1500_v11 = vpop.f32.mrf.mxu1  ;;  %v1613_v15 = vsel %vm1006_vm0, %v4158_v49, 0.0 }
 0x12c   :  { %v1614_v17 = vadd.f32 %v1613_v15, %v1612_v16  ;;  %v1615_v18 = vsel %vm1006_vm0, %v4160_v6, 0.0 }
 0x12e   :  { %v1616_v28 = vadd.f32 %v1615_v18, %v1614_v17 }
 0x132   :  { %v1513_v19 = vpop.f32.mrf.mxu2 }
 0x133   :  { %v1526_v22 = vpop.f32.mrf.mxu3 }
 0x136   :  { %v4168_v23 = vpop.f32.mrf.mxu0 }
 0x137   :  { %v4170_v24 = vpop.f32.mrf.mxu1  ;;  %v1617_v29 = vsel %vm1006_vm0, %v4168_v23, 0.0 }
 0x138   :  { %v1620_v5 = vsel %vm1619_vm3, %v4170_v24, 0.0  ;;  %v1618_v30 = vadd.f32 %v1617_v29, %v1616_v28 }
 0x13a   :  { %v1621_v31 = vadd.f32 %v1620_v5, %v1618_v30 }
 0x13c   :  { %1622 = vadd.xlane.f32.xlu0 %v1621_v31 }
 0x13e   :  { %v1539_v38 = vpop.f32.mrf.mxu0 }
 0x13f   :  { %v1552_v39 = vpop.f32.mrf.mxu1 }
 0x1af   :  { %v1623_v51 = vpop.xlane.xlu0 %1622 }
 0x1b0   :  { %v4179_v53 = vmul.f32 %v4176_v50, %v1623_v51 }
 0x1b2   :  { %v1632_v26 = vsub.f32 %v3999_v32, %v4179_v53  ;;  %v1633_v56 = vsub.f32 %v4014_v36, %v4179_v53  ;;  %v1634_v63 = vsub.f32 %v4028_v45, %v4179_v53  ;;  %v1635_v0 = vsub.f32 %v4042_v52, %v4179_v53 }
 0x1b3   :  { %v1636_v11 = vsub.f32 %v4048_v57, %v4179_v53  ;;  %v1637_v15 = vsub.f32 %v4050_v58, %v4179_v53  ;;  %v1638_v22 = vsub.f32 %v4052_v59, %v4179_v53  ;;  %v1639_v30 = vsub.f32 %v4054_v60, %v4179_v53 }
 0x1b4   :  { %v1666_v7 = vmul.f32 %v1632_v26, %v1632_v26  ;;  %v1667_v10 = vmul.f32 %v1633_v56, %v1633_v56  ;;  %v1668_v12 = vmul.f32 %v1634_v63, %v1634_v63  ;;  %v1669_v16 = vmul.f32 %v1635_v0, %v1635_v0 }
 0x1b5   :  { %v1670_v28 = vmul.f32 %v1636_v11, %v1636_v11  ;;  %v1671_v31 = vmul.f32 %v1637_v15, %v1637_v15  ;;  %v1640_v40 = vsub.f32 %v4056_v1, %v4179_v53  ;;  %v1672_v41 = vmul.f32 %v1638_v22, %v1638_v22 }
 0x1b6   :  { %v1700_v17 = vsel %vm1006_vm0, %v1666_v7, 0.0  ;;  %v1701_v18 = vsel %vm1006_vm0, %v1667_v10, 0.0  ;;  %v1703_v29 = vsel %vm1006_vm0, %v1668_v12, 0.0  ;;  %v1705_v38 = vsel %vm1006_vm0, %v1669_v16, 0.0 }
 0x1b7   :  { %v1702_v19 = vadd.f32 %v1701_v18, %v1700_v17  ;;  %v1707_v44 = vsel %vm1006_vm0, %v1670_v28, 0.0  ;;  %v1641_v47 = vsub.f32 %v4058_v2, %v4179_v53  ;;  %v1673_v48 = vmul.f32 %v1639_v30, %v1639_v30 }
 0x1b8   :  { %v1709_v51 = vsel %vm1006_vm0, %v1671_v31, 0.0  ;;  %v1642_v56 = vsub.f32 %v4060_v3, %v4179_v53  ;;  %v1674_v63 = vmul.f32 %v1640_v40, %v1640_v40  ;;  %v1711_v0 = vsel %vm1006_vm0, %v1672_v41, 0.0 }
 0x1b9   :  { %v1704_v5 = vadd.f32 %v1703_v29, %v1702_v19  ;;  %v1643_v10 = vsub.f32 %v4062_v4, %v4179_v53  ;;  %v1675_v11 = vmul.f32 %v1641_v47, %v1641_v47  ;;  %v1713_v12 = vsel %vm1006_vm0, %v1673_v48, 0.0 }
 0x1ba   :  { %v1644_v16 = vsub.f32 %v4070_v13, %v4179_v53  ;;  %v1676_v17 = vmul.f32 %v1642_v56, %v1642_v56  ;;  %v1715_v18 = vsel %vm1006_vm0, %v1674_v63, 0.0  ;;  %v1645_v22 = vsub.f32 %v4072_v14, %v4179_v53 }
 0x1bb   :  { %v1706_v39 = vadd.f32 %v1705_v38, %v1704_v5  ;;  %v1677_v28 = vmul.f32 %v1643_v10, %v1643_v10  ;;  %v1717_v29 = vsel %vm1006_vm0, %v1675_v11, 0.0  ;;  %v1646_v30 = vsub.f32 %v4078_v20, %v4179_v53 }
 0x1bc   :  { %v1678_v31 = vmul.f32 %v1644_v16, %v1644_v16  ;;  %v1719_v38 = vsel %vm1006_vm0, %v1676_v17, 0.0  ;;  %v1647_v40 = vsub.f32 %v4080_v21, %v4179_v53  ;;  %v1679_v41 = vmul.f32 %v1645_v22, %v1645_v22 }
 0x1bd   :  { %v1708_v46 = vadd.f32 %v1707_v44, %v1706_v39  ;;  %v1721_v44 = vsel %vm1006_vm0, %v1677_v28, 0.0  ;;  %v1648_v47 = vsub.f32 %v4090_v34, %v4179_v53  ;;  %v1680_v48 = vmul.f32 %v1646_v30, %v1646_v30 }
 0x1be   :  { %v1649_v56 = vsub.f32 %v4092_v35, %v4179_v53  ;;  %v1681_v63 = vmul.f32 %v1647_v40, %v1647_v40  ;;  %v1650_v10 = vsub.f32 %v4098_v42, %v4179_v53  ;;  %v1651_v16 = vsub.f32 %v4100_v43, %v4179_v53 }
 0x1bf   :  { %v1710_v26 = vadd.f32 %v1709_v51, %v1708_v46  ;;  %v1723_v51 = vsel %vm1006_vm0, %v1678_v31, 0.0  ;;  %v1682_v11 = vmul.f32 %v1648_v47, %v1648_v47  ;;  %v1652_v22 = vsub.f32 %v4110_v61, %v4179_v53 }
 0x1c0   :  { %v1683_v17 = vmul.f32 %v1649_v56, %v1649_v56  ;;  %v1684_v28 = vmul.f32 %v1650_v10, %v1650_v10  ;;  %v1653_v30 = vsub.f32 %v4112_v62, %v4179_v53  ;;  %v1685_v31 = vmul.f32 %v1651_v16, %v1651_v16 }
 0x1c1   :  { %v1712_v7 = vadd.f32 %v1711_v0, %v1710_v26  ;;  %v1725_v0 = vsel %vm1006_vm0, %v1679_v41, 0.0  ;;  %v1654_v40 = vsub.f32 %v4118_v8, %v4179_v53  ;;  %v1686_v41 = vmul.f32 %v1652_v22, %v1652_v22 }
 0x1c2   :  { %v1655_v47 = vsub.f32 %v4120_v9, %v4179_v53  ;;  %v1656_v56 = vsub.f32 %v4130_v25, %v4179_v53  ;;  %v1657_v10 = vsub.f32 %v4132_v27, %v4179_v53  ;;  %v1658_v16 = vsub.f32 %v4138_v33, %v4179_v53 }
 0x1c3   :  { %v1714_v15 = vadd.f32 %v1713_v12, %v1712_v7  ;;  %v1727_v12 = vsel %vm1006_vm0, %v1680_v48, 0.0  ;;  %v1687_v48 = vmul.f32 %v1653_v30, %v1653_v30  ;;  %v1659_v22 = vsub.f32 %v4140_v37, %v4179_v53 }
 0x1c4   :  { %v1660_v30 = vsub.f32 %v4150_v54, %v4179_v53 }
 0x1c5   :  { %v1716_v19 = vadd.f32 %v1715_v18, %v1714_v15  ;;  %v1729_v18 = vsel %vm1006_vm0, %v1681_v63, 0.0  ;;  %v1688_v63 = vmul.f32 %v1654_v40, %v1654_v40  ;;  %v1661_v40 = vsub.f32 %v4152_v55, %v4179_v53 }
 0x1c7   :  { %v1718_v5 = vadd.f32 %v1717_v29, %v1716_v19  ;;  %v1731_v29 = vsel %vm1006_vm0, %v1682_v11, 0.0  ;;  %v1689_v11 = vmul.f32 %v1655_v47, %v1655_v47  ;;  %v1662_v47 = vsub.f32 %v4158_v49, %v4179_v53 }
 0x1c9   :  { %v1720_v39 = vadd.f32 %v1719_v38, %v1718_v5  ;;  %v1733_v38 = vsel %vm1006_vm0, %v1683_v17, 0.0  ;;  %v1690_v17 = vmul.f32 %v1656_v56, %v1656_v56  ;;  %v1663_v56 = vsub.f32 %v4160_v6, %v4179_v53 }
 0x1cb   :  { %v1722_v46 = vadd.f32 %v1721_v44, %v1720_v39  ;;  %v1735_v44 = vsel %vm1006_vm0, %v1684_v28, 0.0  ;;  %v1691_v28 = vmul.f32 %v1657_v10, %v1657_v10  ;;  %v1664_v10 = vsub.f32 %v4168_v23, %v4179_v53 }
 0x1cd   :  { %v1724_v26 = vadd.f32 %v1723_v51, %v1722_v46  ;;  %v1737_v51 = vsel %vm1006_vm0, %v1685_v31, 0.0  ;;  %v1692_v31 = vmul.f32 %v1658_v16, %v1658_v16  ;;  %v1665_v16 = vsub.f32 %v4170_v24, %v4179_v53 }
 0x1cf   :  { %v1726_v7 = vadd.f32 %v1725_v0, %v1724_v26  ;;  %v1739_v0 = vsel %vm1006_vm0, %v1686_v41, 0.0  ;;  %v1693_v41 = vmul.f32 %v1659_v22, %v1659_v22  ;;  %v1698_v22 = vmul.f32 %v1664_v10, %v1664_v10 }
 0x1d1   :  { %v1728_v15 = vadd.f32 %v1727_v12, %v1726_v7  ;;  %v1741_v12 = vsel %vm1006_vm0, %v1687_v48, 0.0  ;;  %v1694_v48 = vmul.f32 %v1660_v30, %v1660_v30 }
 0x1d3   :  { %v1730_v19 = vadd.f32 %v1729_v18, %v1728_v15  ;;  %v1743_v18 = vsel %vm1006_vm0, %v1688_v63, 0.0  ;;  %v1695_v63 = vmul.f32 %v1661_v40, %v1661_v40 }
 0x1d5   :  { %v1732_v5 = vadd.f32 %v1731_v29, %v1730_v19  ;;  %v1745_v29 = vsel %vm1006_vm0, %v1689_v11, 0.0  ;;  %v1696_v11 = vmul.f32 %v1662_v47, %v1662_v47 }
 0x1d7   :  { %v1734_v39 = vadd.f32 %v1733_v38, %v1732_v5  ;;  %v1747_v38 = vsel %vm1006_vm0, %v1690_v17, 0.0  ;;  %v1697_v17 = vmul.f32 %v1663_v56, %v1663_v56 }
 0x1d9   :  { %v1736_v46 = vadd.f32 %v1735_v44, %v1734_v39  ;;  %v1749_v44 = vsel %vm1006_vm0, %v1691_v28, 0.0  ;;  %v1759_v28 = vsel %vm1006_vm0, %v1696_v11, 0.0  ;;  %v1761_v30 = vsel %vm1006_vm0, %v1697_v17, 0.0 }
 0x1db   :  { %v1738_v26 = vadd.f32 %v1737_v51, %v1736_v46  ;;  %v1751_v51 = vsel %vm1006_vm0, %v1692_v31, 0.0 }
 0x1dd   :  { %v1740_v7 = vadd.f32 %v1739_v0, %v1738_v26  ;;  %v1753_v0 = vsel %vm1006_vm0, %v1693_v41, 0.0 }
 0x1df   :  { %v1742_v15 = vadd.f32 %v1741_v12, %v1740_v7  ;;  %v1755_v12 = vsel %vm1006_vm0, %v1694_v48, 0.0 }
 0x1e1   :  { %v1744_v19 = vadd.f32 %v1743_v18, %v1742_v15  ;;  %v1757_v18 = vsel %vm1006_vm0, %v1695_v63, 0.0 }
 0x1e3   :  { %v1746_v5 = vadd.f32 %v1745_v29, %v1744_v19 }
 0x1e5   :  { %v1748_v39 = vadd.f32 %v1747_v38, %v1746_v5  ;;  %v1699_v5 = vmul.f32 %v1665_v16, %v1665_v16  ;;  %v1763_v38 = vsel %vm1006_vm0, %v1698_v22, 0.0  ;;  %vm4517_vm0 = vmand %vm1973_vm15, %vm1922_vm11 }
 0x1e6   :  { %vm1975_vm1 = vmor %vm4517_vm0, %vm4382_vm12 }
 0x1e7   :  { %v1750_v46 = vadd.f32 %v1749_v44, %v1748_v39  ;;  %v1765_v40 = vsel %vm1619_vm3, %v1699_v5, 0.0  ;;  %v2882_v44 = vmov 0  }
 0x1e8   :  { %2872 = vset.pattern.permute.xlu1 %v2882_v44 }
 0x1e9   :  { %v1752_v26 = vadd.f32 %v1751_v51, %v1750_v46 }
 0x1eb   :  { %v1754_v7 = vadd.f32 %v1753_v0, %v1752_v26 }
 0x1ed   :  { %v1756_v15 = vadd.f32 %v1755_v12, %v1754_v7  ;;  %v1770_v7 = vld [vmem:[%s4578_s2] sm:$0x1f] }
 0x1ef   :  { %v1758_v19 = vadd.f32 %v1757_v18, %v1756_v15 }
 0x1f1   :  { %v1760_v29 = vadd.f32 %v1759_v28, %v1758_v19 }
 0x1f3   :  { %v1762_v31 = vadd.f32 %v1761_v30, %v1760_v29 }
 0x1f5   :  { %v1764_v39 = vadd.f32 %v1763_v38, %v1762_v31 }
 0x1f7   :  { %v1766_v41 = vadd.f32 %v1765_v40, %v1764_v39 }
 0x1f9   :  { %1767 = vadd.xlane.f32.xlu0 %v1766_v41 }
 0x26c   :  { %v1768_v46 = vpop.xlane.xlu0 %1767 }
 0x26d   :  { %v1769_v47 = vmul.f32 %v1768_v46, %v4176_v50  ;;  %v2884_v50 = vmov 1  }
 0x26e   :  { %2873 = vset.pattern.permute.xlu2 %v2884_v50  ;;  %2874 = vset.pattern.permute.xlu0 %v2884_v50 }
 0x26f   :  { %v1771_v48 = vadd.f32 1e-05, %v1769_v47 }
 0x271   :  { %2877 = vrsqrt.f32 %v1771_v48  ;;  %vm1778_vm6 = vweird.f32 %v1771_v48 }
 0x277   :  { %v2878_v51 = vpop.eup %2877 }
 0x278   :  { %v1773_v26 = vmul.f32 %v2878_v51, %v1771_v48  ;;  %vm1779_vm5 = vweird.f32 %v2878_v51 }
 0x279   :  { %vm1780_vm7 = vmor %vm1778_vm6, %vm1779_vm5 }
 0x27a   :  { %v1774_v56 = vmul.f32 %v2878_v51, %v1773_v26 }
 0x27c   :  { %v1775_v63 = vmul.f32 0.5, %v1774_v56 }
 0x27e   :  { %v1776_v0 = vsub.f32 1.5, %v1775_v63 }
 0x280   :  { %v1777_v10 = vmul.f32 %v2878_v51, %v1776_v0 }
 0x282   :  { %v1781_v11 = vsel %vm1780_vm7, %v2878_v51, %v1777_v10 }
 0x283   :  { %v1782_v12 = vmul.f32 %v1781_v11, %v1770_v7 }
 0x285   :  { %v1783_v15 = vmul.f32 %v1782_v12, %v4179_v53 }
 0x287   :  { %1785 = vrot.lane.b32.xlu1 %v1783_v15, %s2883_s19 }
 0x28f   :  { %1791 = vperm.xlu1 %2872, %v1782_v12  }
 0x2f9   :  { %v1786_v16 = vpop.permute.xlu1 %1785 }
 0x2fa   :  { %v1788_v17 = vsub.f32 %v1770_v7, %v1786_v16 }
 0x2fc   :  { %1830 = vperm.xlu2 %2873, %v1788_v17  }
 0x301   :  { %v1792_v18 = vpop.permute.xlu1 %1791 }
 0x302   :  { %v1794_v19 = vmul.f32 %v1792_v18, %v3999_v32  ;;  %v1795_v22 = vmul.f32 %v1792_v18, %v4014_v36  ;;  %v1796_v28 = vmul.f32 %v1792_v18, %v4028_v45  ;;  %v1797_v29 = vmul.f32 %v1792_v18, %v4042_v52 }
 0x303   :  { %v1798_v53 = vmul.f32 %v1792_v18, %v4048_v57  ;;  %v1799_v5 = vmul.f32 %v1792_v18, %v4050_v58  ;;  %v1800_v30 = vmul.f32 %v1792_v18, %v4052_v59  ;;  %v1801_v31 = vmul.f32 %v1792_v18, %v4054_v60 }
 0x304   :  { %v1802_v38 = vmul.f32 %v1792_v18, %v4056_v1  ;;  %v1803_v39 = vmul.f32 %v1792_v18, %v4058_v2  ;;  %v1804_v32 = vmul.f32 %v1792_v18, %v4060_v3  ;;  %v1805_v36 = vmul.f32 %v1792_v18, %v4062_v4 }
 0x305   :  { %v1806_v45 = vmul.f32 %v1792_v18, %v4070_v13  ;;  %v1807_v52 = vmul.f32 %v1792_v18, %v4072_v14  ;;  %v1808_v57 = vmul.f32 %v1792_v18, %v4078_v20  ;;  %v1809_v58 = vmul.f32 %v1792_v18, %v4080_v21 }
 0x306   :  { %v1810_v59 = vmul.f32 %v1792_v18, %v4090_v34  ;;  %v1811_v60 = vmul.f32 %v1792_v18, %v4092_v35  ;;  %v1812_v1 = vmul.f32 %v1792_v18, %v4098_v42  ;;  %v1813_v2 = vmul.f32 %v1792_v18, %v4100_v43 }
 0x307   :  { %v1814_v3 = vmul.f32 %v1792_v18, %v4110_v61  ;;  %v1815_v4 = vmul.f32 %v1792_v18, %v4112_v62  ;;  %v1816_v13 = vmul.f32 %v1792_v18, %v4118_v8  ;;  %v1817_v14 = vmul.f32 %v1792_v18, %v4120_v9 }
 0x308   :  { %v1818_v20 = vmul.f32 %v1792_v18, %v4130_v25  ;;  %v1819_v21 = vmul.f32 %v1792_v18, %v4132_v27  ;;  %v1820_v34 = vmul.f32 %v1792_v18, %v4138_v33  ;;  %v1821_v35 = vmul.f32 %v1792_v18, %v4140_v37 }
 0x309   :  { %v1822_v42 = vmul.f32 %v1792_v18, %v4150_v54  ;;  %v1823_v43 = vmul.f32 %v1792_v18, %v4152_v55  ;;  %v1824_v61 = vmul.f32 %v1792_v18, %v4158_v49  ;;  %v1825_v62 = vmul.f32 %v1792_v18, %v4160_v6 }
 0x30a   :  { %v1826_v8 = vmul.f32 %v1792_v18, %v4168_v23  ;;  %v1827_v9 = vmul.f32 %v1792_v18, %v4170_v24 }
 0x356   :  { %v4312_v40 = vpop.permute.xlu2 %1830 }
 0x357   :  { %v1833_v25 = vadd.f32 %v4312_v40, %v1794_v19  ;;  %v1834_v27 = vadd.f32 %v4312_v40, %v1795_v22  ;;  %v1835_v33 = vadd.f32 %v4312_v40, %v1796_v28  ;;  %v1836_v37 = vadd.f32 %v4312_v40, %v1797_v29 }
 0x358   :  { %v1837_v54 = vadd.f32 %v4312_v40, %v1798_v53  ;;  %v1838_v55 = vadd.f32 %v4312_v40, %v1799_v5  ;;  %v1839_v49 = vadd.f32 %v4312_v40, %v1800_v30  ;;  %v1840_v6 = vadd.f32 %v4312_v40, %v1801_v31 }
 0x359   :  { %v1841_v23 = vadd.f32 %v4312_v40, %v1802_v38  ;;  %v1842_v24 = vadd.f32 %v4312_v40, %v1803_v39  ;;  %v1843_v41 = vadd.f32 %v4312_v40, %v1804_v32  ;;  %v1844_v44 = vadd.f32 %v4312_v40, %v1805_v36 }
 0x35a   :  { %v1845_v46 = vadd.f32 %v4312_v40, %v1806_v45  ;;  %v1846_v47 = vadd.f32 %v4312_v40, %v1807_v52  ;;  %v4339_v48 = vadd.f32 %v4312_v40, %v1808_v57  ;;  %v4342_v51 = vadd.f32 %v4312_v40, %v1809_v58 }
 0x35b   :  { %v4345_v26 = vadd.f32 %v4312_v40, %v1810_v59  ;;  %v4348_v56 = vadd.f32 %v4312_v40, %v1811_v60  ;;  %v4351_v63 = vadd.f32 %v4312_v40, %v1812_v1  ;;  %v4354_v0 = vadd.f32 %v4312_v40, %v1813_v2  ;;  %v1925_v1 = vld [vmem:[%s4579_s3] sm:$0x77] }
 0x35c   :  { %v4357_v7 = vadd.f32 %v4312_v40, %v1814_v3  ;;  %v4360_v10 = vadd.f32 %v4312_v40, %v1815_v4  ;;  %v4363_v11 = vadd.f32 %v4312_v40, %v1816_v13  ;;  %v4366_v12 = vadd.f32 %v4312_v40, %v1817_v14 }
 0x35d   :  { %v4369_v15 = vadd.f32 %v4312_v40, %v1818_v20  ;;  %v4372_v50 = vadd.f32 %v4312_v40, %v1819_v21  ;;  %v4375_v16 = vadd.f32 %v4312_v40, %v1820_v34  ;;  %v4378_v17 = vadd.f32 %v4312_v40, %v1821_v35  ;;  %v1928_v20 = vld [vmem:[%s4579_s3 + $0x8] sm:$0x77]  ;;  %v1931_v21 = vld [vmem:[%s4579_s3 + $0x10] sm:$0x77] }
 0x35e   :  { %v1867_v18 = vmax.f32 %v1833_v25, 0.0  ;;  %v1868_v19 = vmax.f32 %v1834_v27, 0.0  ;;  %v1869_v22 = vmax.f32 %v1835_v33, 0.0  ;;  %v1870_v28 = vmax.f32 %v1836_v37, 0.0 }
 0x35f   :  { %v1871_v29 = vmax.f32 %v1837_v54, 0.0  ;;  %v1872_v53 = vmax.f32 %v1838_v55, 0.0  ;;  %v4387_v30 = vadd.f32 %v4312_v40, %v1822_v42  ;;  %v4390_v31 = vadd.f32 %v4312_v40, %v1823_v43  ;;  %v1940_v55 = vld [vmem:[%s4579_s3 + $0x28] sm:$0x77] }
 0x360   :  { %v1873_v38 = vmax.f32 %v1839_v49, 0.0  ;;  %v1874_v39 = vmax.f32 %v1840_v6, 0.0  ;;  %v4395_v32 = vadd.f32 %v4312_v40, %v1824_v61  ;;  %v4398_v36 = vadd.f32 %v4312_v40, %v1825_v62  ;;  %v1934_v61 = vld [vmem:[%s4579_s3 + $0x18] sm:$0x77] }
 0x361   :  { %v1875_v45 = vmax.f32 %v1841_v23, 0.0  ;;  %v1876_v52 = vmax.f32 %v1842_v24, 0.0  ;;  %v4401_v57 = vadd.f32 %v4312_v40, %v1826_v8  ;;  %v1877_v58 = vmax.f32 %v1843_v41, 0.0  ;;  %v1943_v41 = vld [vmem:[%s4579_s3 + $0x30] sm:$0x77] }
 0x362   :  { %v1878_v59 = vmax.f32 %v1844_v44, 0.0  ;;  %v1879_v60 = vmax.f32 %v1845_v46, 0.0  ;;  %v1880_v2 = vmax.f32 %v1846_v47, 0.0  ;;  %v1901_v3 = vpack.c.bf16 %v1868_v19, %v1867_v18 }
 0x363   :  { %v1902_v4 = vpack.c.bf16 %v1870_v28, %v1869_v22  ;;  %v1903_v13 = vpack.c.bf16 %v1872_v53, %v1871_v29  ;;  %v4419_v34 = vadd.f32 %v4312_v40, %v1827_v9  ;;  %v1881_v35 = vmax.f32 %v4339_v48, 0.0  ;;  %v1937_v40 = vld [vmem:[%s4579_s3 + $0x20] sm:$0x77] }
 0x364   :  { %v1882_v42 = vmax.f32 %v4342_v51, 0.0  ;;  %v1904_v43 = vpack.c.bf16 %v1874_v39, %v1873_v38  ;;  %v1883_v62 = vmax.f32 %v4345_v26, 0.0  ;;  %v1884_v8 = vmax.f32 %v4348_v56, 0.0  ;;  %v1946_v51 = vld [vmem:[%s4579_s3 + $0x38] sm:$0x77] }
 0x365   :  { %v1885_v25 = vmax.f32 %v4351_v63, 0.0  ;;  %v1905_v27 = vpack.c.bf16 %v1876_v52, %v1875_v45  ;;  %v1886_v9 = vmax.f32 %v4354_v0, 0.0  ;;  %v1887_v33 = vmax.f32 %v4357_v7, 0.0  ;;  %v1949_v7 = vld [vmem:[%s4579_s3 + $0x40] sm:$0x77] }
 0x366   :  { %v1888_v37 = vmax.f32 %v4360_v10, 0.0  ;;  %v1906_v54 = vpack.c.bf16 %v1878_v59, %v1877_v58  ;;  %v1907_v49 = vpack.c.bf16 %v1880_v2, %v1879_v60  ;;  %v1926_v6 = vsel %vm4408_vm14, %v1901_v3, %v1925_v1  ;;  %v1964_v58 = vld [vmem:[%s4579_s3 + $0x68] sm:$0x77]  ;;  %v1967_v2 = vld [vmem:[%s4579_s3 + $0x70] sm:$0x77] }
 0x367   :  { %v1929_v23 = vsel %vm4408_vm14, %v1902_v4, %v1928_v20  ;;  %v1932_v24 = vsel %vm4408_vm14, %v1903_v13, %v1931_v21  ;;  %v1889_v44 = vmax.f32 %v4363_v11, 0.0  ;;  %v1890_v46 = vmax.f32 %v4366_v12, 0.0  ;;  %1927 = vst [vmem:[%s4579_s3] sm:$0x77] %v1926_v6  ;;  %v1970_v13 = vld [vmem:[%s4579_s3 + $0x78] sm:$0x77] }
 0x368   :  { %v1908_v47 = vpack.c.bf16 %v1882_v42, %v1881_v35  ;;  %v1935_v48 = vsel %vm4408_vm14, %v1904_v43, %v1934_v61  ;;  %v1891_v26 = vmax.f32 %v4369_v15, 0.0  ;;  %v1892_v56 = vmax.f32 %v4372_v50, 0.0  ;;  %1930 = vst [vmem:[%s4579_s3 + $0x8] sm:$0x77] %v1929_v23  ;;  %v1952_v50 = vld [vmem:[%s4579_s3 + $0x48] sm:$0x77] }
 0x369   :  { %v1909_v63 = vpack.c.bf16 %v1884_v8, %v1883_v62  ;;  %v1938_v0 = vsel %vm4408_vm14, %v1905_v27, %v1937_v40  ;;  %v1893_v10 = vmax.f32 %v4375_v16, 0.0  ;;  %v1894_v11 = vmax.f32 %v4378_v17, 0.0  ;;  %1933 = vst [vmem:[%s4579_s3 + $0x10] sm:$0x77] %v1932_v24  ;;  %v1955_v17 = vld [vmem:[%s4579_s3 + $0x50] sm:$0x77] }
 0x36a   :  { %v1910_v12 = vpack.c.bf16 %v1886_v9, %v1885_v25  ;;  %v1941_v15 = vsel %vm4408_vm14, %v1906_v54, %v1940_v55  ;;  %v1895_v18 = vmax.f32 %v4387_v30, 0.0  ;;  %v1896_v19 = vmax.f32 %v4390_v31, 0.0  ;;  %1936 = vst [vmem:[%s4579_s3 + $0x18] sm:$0x77] %v1935_v48  ;;  %v1958_v31 = vld [vmem:[%s4579_s3 + $0x58] sm:$0x77] }
 0x36b   :  { %v1911_v22 = vpack.c.bf16 %v1888_v37, %v1887_v33  ;;  %v1944_v16 = vsel %vm4408_vm14, %v1907_v49, %v1943_v41  ;;  %v1897_v28 = vmax.f32 %v4395_v32, 0.0  ;;  %v1898_v29 = vmax.f32 %v4398_v36, 0.0  ;;  %1939 = vst [vmem:[%s4579_s3 + $0x20] sm:$0x77] %v1938_v0  ;;  %v1961_v36 = vld [vmem:[%s4579_s3 + $0x60] sm:$0x77] }
 0x36c   :  { %v1912_v53 = vpack.c.bf16 %v1890_v46, %v1889_v44  ;;  %v1947_v30 = vsel %vm4408_vm14, %v1908_v47, %v1946_v51  ;;  %v1899_v38 = vmax.f32 %v4401_v57, 0.0  ;;  %v1900_v39 = vmax.f32 %v4419_v34, 0.0  ;;  %1942 = vst [vmem:[%s4579_s3 + $0x28] sm:$0x77] %v1941_v15  ;;  %v1976_v34 = vld [vmem:[%s4579_s3 + $0x80] sm:$0x77] }
 0x36d   :  { %v1913_v45 = vpack.c.bf16 %v1892_v56, %v1891_v26  ;;  %v1950_v32 = vsel %vm4408_vm14, %v1909_v63, %v1949_v7  ;;  %v1914_v52 = vpack.c.bf16 %v1894_v11, %v1893_v10  ;;  %1945 = vst [vmem:[%s4579_s3 + $0x30] sm:$0x77] %v1944_v16  ;;  %v1953_v57 = vsel %vm4408_vm14, %v1910_v12, %v1952_v50 }
 0x36e   :  { %v1915_v60 = vpack.c.bf16 %v1896_v19, %v1895_v18  ;;  %1948 = vst [vmem:[%s4579_s3 + $0x38] sm:$0x77] %v1947_v30  ;;  %v1956_v1 = vsel %vm4408_vm14, %v1911_v22, %v1955_v17  ;;  %v1916_v3 = vpack.c.bf16 %v1898_v29, %v1897_v28  ;;  %v1959_v4 = vsel %vm4408_vm14, %v1912_v53, %v1958_v31 }
 0x36f   :  { %1951 = vst [vmem:[%s4579_s3 + $0x40] sm:$0x77] %v1950_v32  ;;  %v1917_v20 = vpack.c.bf16 %v1900_v39, %v1899_v38  ;;  %v1962_v21 = vsel %vm4408_vm14, %v1913_v45, %v1961_v36  ;;  %v1965_v35 = vsel %vm4408_vm14, %v1914_v52, %v1964_v58 }
 0x370   :  { %1954 = vst [vmem:[%s4579_s3 + $0x48] sm:$0x77] %v1953_v57  ;;  %v1968_v5 = vsel %vm4408_vm14, %v1915_v60, %v1967_v2  ;;  %v1971_v42 = vsel %vm4408_vm14, %v1916_v3, %v1970_v13 }
 0x371   :  { %1957 = vst [vmem:[%s4579_s3 + $0x50] sm:$0x77] %v1956_v1  ;;  %v1977_v43 = vsel %vm1975_vm1, %v1917_v20, %v1976_v34 }
 0x372   :  { %1960 = vst [vmem:[%s4579_s3 + $0x58] sm:$0x77] %v1959_v4 }
 0x373   :  { %1963 = vst [vmem:[%s4579_s3 + $0x60] sm:$0x77] %v1962_v21 }
 0x374   :  { %1966 = vst [vmem:[%s4579_s3 + $0x68] sm:$0x77] %v1965_v35 }
 0x375   :  { %1969 = vst [vmem:[%s4579_s3 + $0x70] sm:$0x77] %v1968_v5 }
 0x376   :  { %1972 = vst [vmem:[%s4579_s3 + $0x78] sm:$0x77] %v1971_v42 }
 0x377   :  { %1978 = vst [vmem:[%s4579_s3 + $0x80] sm:$0x77] %v1977_v43 }

// kernel: feature_extractor_forward.4
= control target key start
LH: loop header
LB: loop body
LE: loop exit
PB: predicated region body
PF: predicated region fallthrough
CT: control target
= control target key end

     0   :  { %vm1167_vm0 = vcmask 1041408   ;;  %vm1163_vm1 = vcmask 949248   ;;  %vm1498_vm2 = vcmask 1044480   ;;  %vm1508_vm3 = vcmask 667648   ;;  %s2569_s17 = smov 1   ;;  %s3864_s0 = inlined_call_operand.vmem [shape: bf16[500,722], index: 0, kind: input, shape index: {}]   ;;  %s3865_s1 = inlined_call_operand.vmem [shape: bf16[5,500], index: 1, kind: input, shape index: {}]   ;;  %s3866_s2 = inlined_call_operand.vmem [shape: f32[5,2], index: 2, kind: input, shape index: {}]   ;;  %s3867_s3 = inlined_call_operand.vmem [shape: bf16[5,722], index: 3, kind: output, shape index: {}]  }
   0x1   :  { %v1790_v0 = vld [vmem:[%s3864_s0 + $0x150] sm:$0xf]  ;;  %v2415_v1 = vld [vmem:[%s3864_s0 + $0x164] sm:$0xf0]  ;;  %v1766_v10 = vld [vmem:[%s3864_s0 + $0x120] sm:$0xf] }
   0x2   :  { %v1982_v2 = vld [vmem:[%s3864_s0 + $0x2d0] sm:$0xf]  ;;  %v1791_v3 = vor.u32 %v2415_v1, %v1790_v0  ;;  %v2463_v4 = vld [vmem:[%s3864_s0 + $0x2e4] sm:$0xf0]  ;;  %v2409_v11 = vld [vmem:[%s3864_s0 + $0x134] sm:$0xf0] }
   0x3   :  { %v2174_v5 = vld [vmem:[%s3864_s0 + $0x450] sm:$0xf]  ;;  %v2511_v6 = vld [vmem:[%s3864_s0 + $0x464] sm:$0xf0]  ;;  %v1983_v7 = vor.u32 %v2463_v4, %v1982_v2  ;;  %v1767_v13 = vor.u32 %v2409_v11, %v1766_v10  ;;  %v1958_v14 = vld [vmem:[%s3864_s0 + $0x2a0] sm:$0xf] }
   0x4   :  { %v2175_v8 = vor.u32 %v2511_v6, %v2174_v5  ;;  %v2612_v9 = vld [vmem:[%s3864_s0 + $0x5d0] sm:$0x33]  ;;  %1186 = vmatpush.bf16.msra.mxu0 %v1791_v3  ;;  %v2457_v15 = vld [vmem:[%s3864_s0 + $0x2b4] sm:$0xf0]  ;;  %v2150_v16 = vld [vmem:[%s3864_s0 + $0x420] sm:$0xf] }
   0x5   :  { %v779_v12 = vunpack.c.l.b16 %v2612_v9  ;;  %1199 = vmatpush.bf16.msra.mxu1 %v1983_v7  ;;  %v1959_v17 = vor.u32 %v2457_v15, %v1958_v14  ;;  %v2505_v18 = vld [vmem:[%s3864_s0 + $0x434] sm:$0xf0]  ;;  %v2342_v19 = vld [vmem:[%s3864_s0 + $0x5a0] sm:$0xf]  ;;  %v1742_v23 = vld [vmem:[%s3864_s0 + $0xf0] sm:$0xf] }
   0x6   :  { %1212 = vmatpush.bf16.msra.mxu2 %v2175_v8  ;;  %v2553_v20 = vld [vmem:[%s3864_s0 + $0x5b4] sm:$0xf0]  ;;  %v2151_v22 = vor.u32 %v2505_v18, %v2150_v16  ;;  %v2403_v24 = vld [vmem:[%s3864_s0 + $0x104] sm:$0xf0]  ;;  %v1934_v25 = vld [vmem:[%s3864_s0 + $0x270] sm:$0xf] }
   0x7   :  { %v971_v21 = vpack.c.b16 %v779_v12, %v779_v12  ;;  %v2451_v26 = vld [vmem:[%s3864_s0 + $0x284] sm:$0xf0]  ;;  %v2126_v27 = vld [vmem:[%s3864_s0 + $0x3f0] sm:$0xf]  ;;  %v1743_v30 = vor.u32 %v2403_v24, %v1742_v23  ;;  %v2343_v31 = vor.u32 %v2553_v20, %v2342_v19  ;;  %v1718_v34 = vld [vmem:[%s3864_s0 + $0xc0] sm:$0xf]  ;;  %v780_v23 = vunpack.c.h.b16 %v2612_v9 }
   0x8   :  { %v2499_v28 = vld [vmem:[%s3864_s0 + $0x404] sm:$0xf0]  ;;  %1187 = vmatpush.bf16.msra.mxu0 %v1767_v13  ;;  %v1935_v32 = vor.u32 %v2451_v26, %v1934_v25  ;;  %v2318_v33 = vld [vmem:[%s3864_s0 + $0x570] sm:$0xf]  ;;  %v2397_v35 = vld [vmem:[%s3864_s0 + $0xd4] sm:$0xf0] }
   0x9   :  { %v1169_v29 = vsel %vm1167_vm0, %v971_v21, 0  ;;  %1200 = vmatpush.bf16.msra.mxu1 %v1959_v17  ;;  %v2127_v36 = vor.u32 %v2499_v28, %v2126_v27  ;;  %v2547_v37 = vld [vmem:[%s3864_s0 + $0x584] sm:$0xf0]  ;;  %v1910_v38 = vld [vmem:[%s3864_s0 + $0x240] sm:$0xf]  ;;  %v1719_v42 = vor.u32 %v2397_v35, %v1718_v34  ;;  %vm1597_vm8 = vcmask 1042432  }
   0xa   :  { %1225 = vmatpush.bf16.msra.mxu3 %v1169_v29  ;;  %1213 = vmatpush.bf16.msra.mxu2 %v2151_v22  ;;  %v2445_v39 = vld [vmem:[%s3864_s0 + $0x254] sm:$0xf0]  ;;  %v2102_v40 = vld [vmem:[%s3864_s0 + $0x3c0] sm:$0xf]  ;;  %v2319_v43 = vor.u32 %v2547_v37, %v2318_v33  ;;  %v1694_v46 = vld [vmem:[%s3864_s0 + $0x90] sm:$0xf] }
   0xb   :  { %v2493_v41 = vld [vmem:[%s3864_s0 + $0x3d4] sm:$0xf0]  ;;  %v1911_v44 = vor.u32 %v2445_v39, %v1910_v38  ;;  %v2294_v45 = vld [vmem:[%s3864_s0 + $0x540] sm:$0xf]  ;;  %v2391_v47 = vld [vmem:[%s3864_s0 + $0xa4] sm:$0xf0] }
   0xc   :  { %1188 = vmatpush.bf16.msra.mxu0 %v1743_v30  ;;  %v2103_v48 = vor.u32 %v2493_v41, %v2102_v40  ;;  %v2541_v49 = vld [vmem:[%s3864_s0 + $0x554] sm:$0xf0]  ;;  %v1886_v50 = vld [vmem:[%s3864_s0 + $0x210] sm:$0xf]  ;;  %v2439_v51 = vld [vmem:[%s3864_s0 + $0x224] sm:$0xf0]  ;;  %v1695_v54 = vor.u32 %v2391_v47, %v1694_v46 }
   0xd   :  { %1201 = vmatpush.bf16.msra.mxu1 %v1935_v32  ;;  %v2078_v52 = vld [vmem:[%s3864_s0 + $0x390] sm:$0xf]  ;;  %v2487_v53 = vld [vmem:[%s3864_s0 + $0x3a4] sm:$0xf0]  ;;  %v2295_v55 = vor.u32 %v2541_v49, %v2294_v45  ;;  %v1887_v56 = vor.u32 %v2439_v51, %v1886_v50  ;;  %v1670_v58 = vld [vmem:[%s3864_s0 + $0x60] sm:$0xf] }
   0xe   :  { %1226 = vmatpush.bf16.msra.mxu3 %v2343_v31  ;;  %1214 = vmatpush.bf16.msra.mxu2 %v2127_v36  ;;  %v2270_v57 = vld [vmem:[%s3864_s0 + $0x510] sm:$0xf]  ;;  %v2385_v59 = vld [vmem:[%s3864_s0 + $0x74] sm:$0xf0]  ;;  %v2079_v60 = vor.u32 %v2487_v53, %v2078_v52  ;;  %v2535_v61 = vld [vmem:[%s3864_s0 + $0x524] sm:$0xf0]  ;;  %v972_v36 = vpack.c.b16 %v780_v23, %v780_v23 }
   0xf   :  { %v1862_v62 = vld [vmem:[%s3864_s0 + $0x1e0] sm:$0xf]  ;;  %v2433_v63 = vld [vmem:[%s3864_s0 + $0x1f4] sm:$0xf0]  ;;  %v1671_v2 = vor.u32 %v2385_v59, %v1670_v58  ;;  %v2271_v3 = vor.u32 %v2535_v61, %v2270_v57  ;;  %v1646_v6 = vld [vmem:[%s3864_s0 + $0x30] sm:$0xf] }
  0x10   :  { %1189 = vmatpush.bf16.msra.mxu0 %v1719_v42  ;;  %v2054_v0 = vld [vmem:[%s3864_s0 + $0x360] sm:$0xf]  ;;  %v2481_v1 = vld [vmem:[%s3864_s0 + $0x374] sm:$0xf0]  ;;  %v1863_v4 = vor.u32 %v2433_v63, %v1862_v62  ;;  %v2379_v7 = vld [vmem:[%s3864_s0 + $0x44] sm:$0xf0] }
  0x11   :  { %1202 = vmatpush.bf16.msra.mxu1 %v1911_v44  ;;  %v2246_v5 = vld [vmem:[%s3864_s0 + $0x4e0] sm:$0xf]  ;;  %v2055_v8 = vor.u32 %v2481_v1, %v2054_v0  ;;  %v2529_v10 = vld [vmem:[%s3864_s0 + $0x4f4] sm:$0xf0]  ;;  %v1838_v11 = vld [vmem:[%s3864_s0 + $0x1b0] sm:$0xf]  ;;  %v1647_v15 = vor.u32 %v2379_v7, %v1646_v6 }
  0x12   :  { %1227 = vmatpush.bf16.msra.mxu3 %v2319_v43  ;;  %1215 = vmatpush.bf16.msra.mxu2 %v2103_v48  ;;  %v2427_v12 = vld [vmem:[%s3864_s0 + $0x1c4] sm:$0xf0]  ;;  %v2030_v13 = vld [vmem:[%s3864_s0 + $0x330] sm:$0xf]  ;;  %v2247_v18 = vor.u32 %v2529_v10, %v2246_v5  ;;  %v1622_v20 = vld [vmem:[%s3864_s0] sm:$0xf] }
  0x13   :  { %v2475_v14 = vld [vmem:[%s3864_s0 + $0x344] sm:$0xf0]  ;;  %v2222_v16 = vld [vmem:[%s3864_s0 + $0x4b0] sm:$0xf]  ;;  %v1839_v19 = vor.u32 %v2427_v12, %v1838_v11  ;;  %v2373_v21 = vld [vmem:[%s3864_s0 + $0x14] sm:$0xf0] }
  0x14   :  { %1190 = vmatpush.bf16.msra.mxu0 %v1695_v54  ;;  %v2523_v17 = vld [vmem:[%s3864_s0 + $0x4c4] sm:$0xf0]  ;;  %v1814_v22 = vld [vmem:[%s3864_s0 + $0x180] sm:$0xf]  ;;  %v2031_v24 = vor.u32 %v2475_v14, %v2030_v13  ;;  %v2421_v25 = vld [vmem:[%s3864_s0 + $0x194] sm:$0xf0]  ;;  %v1623_v30 = vor.u32 %v2373_v21, %v1622_v20 }
  0x15   :  { %1203 = vmatpush.bf16.msra.mxu1 %v1887_v56  ;;  %v2006_v26 = vld [vmem:[%s3864_s0 + $0x300] sm:$0xf]  ;;  %v2469_v27 = vld [vmem:[%s3864_s0 + $0x314] sm:$0xf0]  ;;  %v2412_v28 = vld [vmem:[%s3864_s0 + $0x154] sm:$0xf]  ;;  %v2223_v34 = vor.u32 %v2523_v17, %v2222_v16  ;;  %v1815_v35 = vor.u32 %v2421_v25, %v1814_v22 }
  0x16   :  { %1228 = vmatpush.bf16.msra.mxu3 %v2295_v55  ;;  %1216 = vmatpush.bf16.msra.mxu2 %v2079_v60  ;;  %v1792_v9 = vld [vmem:[%s3864_s0 + $0x168] sm:$0xf0]  ;;  %v2460_v29 = vld [vmem:[%s3864_s0 + $0x2d4] sm:$0xf]  ;;  %v2007_v37 = vor.u32 %v2469_v27, %v2006_v26  ;;  %v2198_v39 = vld [vmem:[%s3864_s0 + $0x480] sm:$0xf] }
  0x17   :  { %v1984_v31 = vld [vmem:[%s3864_s0 + $0x2e8] sm:$0xf0]  ;;  %v2508_v32 = vld [vmem:[%s3864_s0 + $0x454] sm:$0xf]  ;;  %v1795_v38 = vor.u32 %v2412_v28, %v1792_v9  ;;  %v2517_v40 = vld [vmem:[%s3864_s0 + $0x494] sm:$0xf0] }
  0x18   :  { %1191 = vmatpush.bf16.msra.mxu0 %v1671_v2  ;;  %v2176_v33 = vld [vmem:[%s3864_s0 + $0x468] sm:$0xf0]  ;;  %v2406_v41 = vld [vmem:[%s3864_s0 + $0x124] sm:$0xf]  ;;  %v1987_v42 = vor.u32 %v2460_v29, %v1984_v31  ;;  %v1768_v44 = vld [vmem:[%s3864_s0 + $0x138] sm:$0xf0]  ;;  %v2199_v50 = vor.u32 %v2517_v40, %v2198_v39 }
  0x19   :  { %1204 = vmatpush.bf16.msra.mxu1 %v1863_v4  ;;  %v2179_v43 = vor.u32 %v2508_v32, %v2176_v33  ;;  %v2454_v45 = vld [vmem:[%s3864_s0 + $0x2a4] sm:$0xf]  ;;  %v1960_v46 = vld [vmem:[%s3864_s0 + $0x2b8] sm:$0xf0]  ;;  %v15_v49 = vld [vmem:[%s3865_s1 + $0x8] sm:$0x77]  ;;  %v1771_v54 = vor.u32 %v2406_v41, %v1768_v44 }
  0x1a   :  { %1229 = vmatpush.bf16.msra.mxu3 %v2271_v3  ;;  %1217 = vmatpush.bf16.msra.mxu2 %v2055_v8  ;;  %v2502_v47 = vld [vmem:[%s3864_s0 + $0x424] sm:$0xf]  ;;  %v2152_v48 = vld [vmem:[%s3864_s0 + $0x438] sm:$0xf0]  ;;  %v1172_v51 = vsel %vm1167_vm0, %v972_v36, 0  ;;  %v209_v52 = vunpack.c.l.b16 %v15_v49  ;;  %v210_v53 = vunpack.c.h.b16 %v15_v49  ;;  %v1963_v58 = vor.u32 %v2454_v45, %v1960_v46 }
  0x1b   :  { %v2550_v55 = vld [vmem:[%s3864_s0 + $0x5a4] sm:$0xf]  ;;  %v2344_v56 = vld [vmem:[%s3864_s0 + $0x5b8] sm:$0xf0]  ;;  %v2400_v57 = vld [vmem:[%s3864_s0 + $0xf4] sm:$0xf]  ;;  %v2155_v59 = vor.u32 %v2502_v47, %v2152_v48 }
  0x1c   :  { %1192 = vmatpush.bf16.msra.mxu0 %v1647_v15  ;;  %v1744_v60 = vld [vmem:[%s3864_s0 + $0x108] sm:$0xf0]  ;;  %v2448_v61 = vld [vmem:[%s3864_s0 + $0x274] sm:$0xf]  ;;  %v2840_v62 = vpack.c.b16 %v209_v52, %v209_v52  ;;  %v14_v63 = vld [vmem:[%s3865_s1] sm:$0x77]  ;;  %v2854_v3 = vpack.c.b16 %v210_v53, %v210_v53  ;;  %v2347_v6 = vor.u32 %v2550_v55, %v2344_v56 }
  0x1d   :  { %1205 = vmatpush.bf16.msra.mxu1 %v1839_v19  ;;  %v1936_v0 = vld [vmem:[%s3864_s0 + $0x288] sm:$0xf0]  ;;  %v2496_v1 = vld [vmem:[%s3864_s0 + $0x3f4] sm:$0xf]  ;;  %v207_v4 = vunpack.c.l.b16 %v14_v63  ;;  %v208_v5 = vunpack.c.h.b16 %v14_v63  ;;  %v1747_v7 = vor.u32 %v2400_v57, %v1744_v60  ;;  %v2394_v15 = vld [vmem:[%s3864_s0 + $0xc4] sm:$0xf] }
  0x1e   :  { %1230 = vmatpush.bf16.msra.mxu3 %v2247_v18  ;;  %1218 = vmatpush.bf16.msra.mxu2 %v2031_v24  ;;  %v2128_v2 = vld [vmem:[%s3864_s0 + $0x408] sm:$0xf0]  ;;  %v2544_v8 = vld [vmem:[%s3864_s0 + $0x574] sm:$0xf]  ;;  %v1939_v13 = vor.u32 %v2448_v61, %v1936_v0  ;;  %v1720_v16 = vld [vmem:[%s3864_s0 + $0xd8] sm:$0xf0] }
  0x1f   :  { %v2320_v10 = vld [vmem:[%s3864_s0 + $0x588] sm:$0xf0]  ;;  %v2863_v11 = vpack.c.b16 %v207_v4, %v207_v4  ;;  %v2865_v12 = vpack.c.b16 %v208_v5, %v208_v5  ;;  %v2131_v14 = vor.u32 %v2496_v1, %v2128_v2  ;;  %v2442_v17 = vld [vmem:[%s3864_s0 + $0x244] sm:$0xf]  ;;  %v1912_v18 = vld [vmem:[%s3864_s0 + $0x258] sm:$0xf0]  ;;  %v1723_v22 = vor.u32 %v2394_v15, %v1720_v16 }
  0x20   :  { %1193 = vmatpush.bf16.msra.mxu0 %v1623_v30  ;;  %v2490_v19 = vld [vmem:[%s3864_s0 + $0x3c4] sm:$0xf]  ;;  %v2104_v20 = vld [vmem:[%s3864_s0 + $0x3d8] sm:$0xf0]  ;;  %v2323_v21 = vor.u32 %v2544_v8, %v2320_v10  ;;  %v1915_v25 = vor.u32 %v2442_v17, %v1912_v18  ;;  %v2388_v27 = vld [vmem:[%s3864_s0 + $0x94] sm:$0xf] }
  0x21   :  { %1206 = vmatpush.bf16.msra.mxu1 %v1815_v35  ;;  %v2538_v23 = vld [vmem:[%s3864_s0 + $0x544] sm:$0xf]  ;;  %v2296_v24 = vld [vmem:[%s3864_s0 + $0x558] sm:$0xf0]  ;;  %v2107_v26 = vor.u32 %v2490_v19, %v2104_v20  ;;  %v1696_v28 = vld [vmem:[%s3864_s0 + $0xa8] sm:$0xf0] }
  0x22   :  { %1231 = vmatpush.bf16.msra.mxu3 %v2223_v34  ;;  %1219 = vmatpush.bf16.msra.mxu2 %v2007_v37  ;;  %v2436_v9 = vld [vmem:[%s3864_s0 + $0x214] sm:$0xf]  ;;  %v1888_v29 = vld [vmem:[%s3864_s0 + $0x228] sm:$0xf0]  ;;  %v2299_v32 = vor.u32 %v2538_v23, %v2296_v24  ;;  %v1699_v33 = vor.u32 %v2388_v27, %v1696_v28  ;;  %v1672_v39 = vld [vmem:[%s3864_s0 + $0x78] sm:$0xf0] }
  0x23   :  { %1194 = vmatmul.bf16.vlgmr.msra.gmra.mxu0 %v2863_v11  ;;  %v2484_v30 = vld [vmem:[%s3864_s0 + $0x394] sm:$0xf]  ;;  %v2080_v31 = vld [vmem:[%s3864_s0 + $0x3a8] sm:$0xf0]  ;;  %v1891_v36 = vor.u32 %v2436_v9, %v1888_v29  ;;  %v2430_v40 = vld [vmem:[%s3864_s0 + $0x1e4] sm:$0xf] }
  0x24   :  { %1238 = vmatpush.bf16.msrb.mxu0 %v1795_v38  ;;  %1207 = vmatmul.bf16.vlgmr.msra.gmra.mxu1 %v2865_v12  ;;  %v2532_v34 = vld [vmem:[%s3864_s0 + $0x514] sm:$0xf]  ;;  %v2272_v35 = vld [vmem:[%s3864_s0 + $0x528] sm:$0xf0]  ;;  %v2083_v37 = vor.u32 %v2484_v30, %v2080_v31  ;;  %v2382_v38 = vld [vmem:[%s3864_s0 + $0x64] sm:$0xf] }
  0x25   :  { %1251 = vmatpush.bf16.msrb.mxu1 %v1987_v42  ;;  %1220 = vmatmul.bf16.vlgmr.msra.gmra.mxu2 %v2840_v62  ;;  %v1864_v41 = vld [vmem:[%s3864_s0 + $0x1f8] sm:$0xf0]  ;;  %v2478_v42 = vld [vmem:[%s3864_s0 + $0x364] sm:$0xf]  ;;  %v2275_v44 = vor.u32 %v2532_v34, %v2272_v35  ;;  %v1675_v45 = vor.u32 %v2382_v38, %v1672_v39  ;;  %v2424_v52 = vld [vmem:[%s3864_s0 + $0x1b4] sm:$0xf] }
  0x26   :  { %1264 = vmatpush.bf16.msrb.mxu2 %v2179_v43  ;;  %1232 = vmatpush.bf16.msra.mxu3 %v2199_v50  ;;  %v2056_v43 = vld [vmem:[%s3864_s0 + $0x378] sm:$0xf0]  ;;  %v2526_v46 = vld [vmem:[%s3864_s0 + $0x4e4] sm:$0xf]  ;;  %v1867_v48 = vor.u32 %v2430_v40, %v1864_v41  ;;  %v2376_v50 = vld [vmem:[%s3864_s0 + $0x34] sm:$0xf] }
  0x27   :  { %v2248_v47 = vld [vmem:[%s3864_s0 + $0x4f8] sm:$0xf0]  ;;  %v2059_v49 = vor.u32 %v2478_v42, %v2056_v43  ;;  %v1840_v53 = vld [vmem:[%s3864_s0 + $0x1c8] sm:$0xf0]  ;;  %v2370_v61 = vld [vmem:[%s3864_s0 + $0x4] sm:$0xf] }
  0x28   :  { %1239 = vmatpush.bf16.msrb.mxu0 %v1771_v54  ;;  %v2472_v54 = vld [vmem:[%s3864_s0 + $0x334] sm:$0xf]  ;;  %v2032_v55 = vld [vmem:[%s3864_s0 + $0x348] sm:$0xf0]  ;;  %v2964_v56 = vld [vmem:[%s3864_s0 + $0x5d8] sm:$0x33]  ;;  %v2251_v57 = vor.u32 %v2526_v46, %v2248_v47  ;;  %v1843_v63 = vor.u32 %v2424_v52, %v1840_v53 }
  0x29   :  { %1252 = vmatpush.bf16.msrb.mxu1 %v1963_v58  ;;  %2364 = vmatmul.msk.bf16.vlgmr.msra.gmra.mxu3 %vm1163_vm1, %v2854_v3  ;;  %v2224_v60 = vld [vmem:[%s3864_s0 + $0x4c8] sm:$0xf0]  ;;  %v2035_v0 = vor.u32 %v2472_v54, %v2032_v55  ;;  %v1624_v1 = vld [vmem:[%s3864_s0 + $0x18] sm:$0xf0]  ;;  %v2418_v2 = vld [vmem:[%s3864_s0 + $0x184] sm:$0xf]  ;;  %v781_v8 = vunpack.c.l.b16 %v2964_v56 }
  0x2a   :  { %1277 = vmatpush.bf16.msrb.mxu3 %v1172_v51  ;;  %1265 = vmatpush.bf16.msrb.mxu2 %v2155_v59  ;;  %v1648_v51 = vld [vmem:[%s3864_s0 + $0x48] sm:$0xf0]  ;;  %v2520_v59 = vld [vmem:[%s3864_s0 + $0x4b4] sm:$0xf]  ;;  %v1816_v4 = vld [vmem:[%s3864_s0 + $0x198] sm:$0xf0]  ;;  %v1627_v16 = vor.u32 %v2370_v61, %v1624_v1 }
  0x2b   :  { %v1651_v58 = vor.u32 %v2376_v50, %v1648_v51  ;;  %v2466_v5 = vld [vmem:[%s3864_s0 + $0x304] sm:$0xf]  ;;  %v2416_v10 = vld [vmem:[%s3864_s0 + $0x16c] sm:$0xf0]  ;;  %v2227_v15 = vor.u32 %v2520_v59, %v2224_v60  ;;  %v2182_v17 = vld [vmem:[%s3864_s0 + $0x458] sm:$0xf]  ;;  %v1819_v19 = vor.u32 %v2418_v2, %v1816_v4 }
  0x2c   :  { %1240 = vmatpush.bf16.msrb.mxu0 %v1747_v7  ;;  %v1798_v7 = vld [vmem:[%s3864_s0 + $0x158] sm:$0xf]  ;;  %v2512_v18 = vld [vmem:[%s3864_s0 + $0x46c] sm:$0xf0]  ;;  %v2410_v28 = vld [vmem:[%s3864_s0 + $0x13c] sm:$0xf0] }
  0x2d   :  { %1253 = vmatpush.bf16.msrb.mxu1 %v1939_v13  ;;  %v1990_v13 = vld [vmem:[%s3864_s0 + $0x2d8] sm:$0xf]  ;;  %v1799_v23 = vor.u32 %v2416_v10, %v1798_v7  ;;  %v2183_v27 = vor.u32 %v2512_v18, %v2182_v17  ;;  %v1966_v9 = vld [vmem:[%s3864_s0 + $0x2a8] sm:$0xf]  ;;  %v2458_v29 = vld [vmem:[%s3864_s0 + $0x2bc] sm:$0xf0] }
  0x2e   :  { %1278 = vmatpush.bf16.msrb.mxu3 %v2347_v6  ;;  %1266 = vmatpush.bf16.msrb.mxu2 %v2131_v14  ;;  %v2008_v6 = vld [vmem:[%s3864_s0 + $0x318] sm:$0xf0]  ;;  %v2464_v14 = vld [vmem:[%s3864_s0 + $0x2ec] sm:$0xf0]  ;;  %v2158_v31 = vld [vmem:[%s3864_s0 + $0x428] sm:$0xf] }
  0x2f   :  { %v2011_v20 = vor.u32 %v2466_v5, %v2008_v6  ;;  %v1991_v24 = vor.u32 %v2464_v14, %v1990_v13  ;;  %v1750_v38 = vld [vmem:[%s3864_s0 + $0xf8] sm:$0xf]  ;;  %v2404_v40 = vld [vmem:[%s3864_s0 + $0x10c] sm:$0xf0]  ;;  %v1726_v50 = vld [vmem:[%s3864_s0 + $0xc8] sm:$0xf] }
  0x30   :  { %1241 = vmatpush.bf16.msrb.mxu0 %v1723_v22  ;;  %v2200_v22 = vld [vmem:[%s3864_s0 + $0x498] sm:$0xf0]  ;;  %v1942_v41 = vld [vmem:[%s3864_s0 + $0x278] sm:$0xf]  ;;  %v2452_v42 = vld [vmem:[%s3864_s0 + $0x28c] sm:$0xf0]  ;;  %v1751_v46 = vor.u32 %v2404_v40, %v1750_v38 }
  0x31   :  { %1254 = vmatpush.bf16.msrb.mxu1 %v1915_v25  ;;  %v973_v25 = vpack.c.b16 %v781_v8, %v781_v8  ;;  %v2134_v43 = vld [vmem:[%s3864_s0 + $0x3f8] sm:$0xf]  ;;  %v1943_v47 = vor.u32 %v2452_v42, %v1942_v41  ;;  %v2398_v52 = vld [vmem:[%s3864_s0 + $0xdc] sm:$0xf0]  ;;  %v1918_v53 = vld [vmem:[%s3864_s0 + $0x248] sm:$0xf] }
  0x32   :  { %1279 = vmatpush.bf16.msrb.mxu3 %v2323_v21  ;;  %1267 = vmatpush.bf16.msrb.mxu2 %v2107_v26  ;;  %v2514_v21 = vld [vmem:[%s3864_s0 + $0x484] sm:$0xf]  ;;  %v1774_v26 = vld [vmem:[%s3864_s0 + $0x128] sm:$0xf]  ;;  %v2446_v54 = vld [vmem:[%s3864_s0 + $0x25c] sm:$0xf0]  ;;  %v1727_v59 = vor.u32 %v2398_v52, %v1726_v50 }
  0x33   :  { %v2203_v30 = vor.u32 %v2514_v21, %v2200_v22  ;;  %v1175_v34 = vsel %vm1167_vm0, %v973_v25, 0  ;;  %v1775_v35 = vor.u32 %v2410_v28, %v1774_v26  ;;  %v2110_v55 = vld [vmem:[%s3864_s0 + $0x3c8] sm:$0xf]  ;;  %v1919_v60 = vor.u32 %v2446_v54, %v1918_v53  ;;  %v2392_v2 = vld [vmem:[%s3864_s0 + $0xac] sm:$0xf0] }
  0x34   :  { %1242 = vmatpush.bf16.msrb.mxu0 %v1699_v33  ;;  %v2350_v33 = vld [vmem:[%s3864_s0 + $0x5a8] sm:$0xf]  ;;  %v1894_v4 = vld [vmem:[%s3864_s0 + $0x218] sm:$0xf]  ;;  %v2440_v5 = vld [vmem:[%s3864_s0 + $0x22c] sm:$0xf0] }
  0x35   :  { %1255 = vmatpush.bf16.msrb.mxu1 %v1891_v36  ;;  %v1967_v36 = vor.u32 %v2458_v29, %v1966_v9  ;;  %v2302_v61 = vld [vmem:[%s3864_s0 + $0x548] sm:$0xf]  ;;  %v2086_v6 = vld [vmem:[%s3864_s0 + $0x398] sm:$0xf]  ;;  %v2488_v7 = vld [vmem:[%s3864_s0 + $0x3ac] sm:$0xf0]  ;;  %v1895_v13 = vor.u32 %v2440_v5, %v1894_v4 }
  0x36   :  { %1280 = vmatpush.bf16.msrb.mxu3 %v2299_v32  ;;  %1268 = vmatpush.bf16.msrb.mxu2 %v2083_v37  ;;  %v2506_v32 = vld [vmem:[%s3864_s0 + $0x43c] sm:$0xf0]  ;;  %v2278_v14 = vld [vmem:[%s3864_s0 + $0x518] sm:$0xf]  ;;  %v2087_v17 = vor.u32 %v2488_v7, %v2086_v6  ;;  %v2062_v21 = vld [vmem:[%s3864_s0 + $0x368] sm:$0xf] }
  0x37   :  { %v2554_v37 = vld [vmem:[%s3864_s0 + $0x5bc] sm:$0xf0]  ;;  %v2159_v39 = vor.u32 %v2506_v32, %v2158_v31  ;;  %v2254_v26 = vld [vmem:[%s3864_s0 + $0x4e8] sm:$0xf]  ;;  %v1654_v28 = vld [vmem:[%s3864_s0 + $0x38] sm:$0xf] }
  0x38   :  { %1243 = vmatpush.bf16.msrb.mxu0 %v1675_v45  ;;  %v2351_v45 = vor.u32 %v2554_v37, %v2350_v33  ;;  %v2386_v18 = vld [vmem:[%s3864_s0 + $0x7c] sm:$0xf0]  ;;  %v2380_v29 = vld [vmem:[%s3864_s0 + $0x4c] sm:$0xf0]  ;;  %v2038_v32 = vld [vmem:[%s3864_s0 + $0x338] sm:$0xf] }
  0x39   :  { %1256 = vmatpush.bf16.msrb.mxu1 %v1867_v48  ;;  %v2326_v48 = vld [vmem:[%s3864_s0 + $0x578] sm:$0xf]  ;;  %v2482_v22 = vld [vmem:[%s3864_s0 + $0x37c] sm:$0xf0]  ;;  %v2428_v31 = vld [vmem:[%s3864_s0 + $0x1cc] sm:$0xf0]  ;;  %v1655_v37 = vor.u32 %v2380_v29, %v1654_v28 }
  0x3a   :  { %1281 = vmatpush.bf16.msrb.mxu3 %v2275_v44  ;;  %1269 = vmatpush.bf16.msrb.mxu2 %v2059_v49  ;;  %v2500_v44 = vld [vmem:[%s3864_s0 + $0x40c] sm:$0xf0]  ;;  %v2063_v9 = vor.u32 %v2482_v22, %v2062_v21  ;;  %v2374_v40 = vld [vmem:[%s3864_s0 + $0x1c] sm:$0xf0]  ;;  %v1822_v41 = vld [vmem:[%s3864_s0 + $0x188] sm:$0xf] }
  0x3b   :  { %v2548_v49 = vld [vmem:[%s3864_s0 + $0x58c] sm:$0xf0]  ;;  %v2135_v51 = vor.u32 %v2500_v44, %v2134_v43  ;;  %v2422_v43 = vld [vmem:[%s3864_s0 + $0x19c] sm:$0xf0]  ;;  %v2014_v44 = vld [vmem:[%s3864_s0 + $0x308] sm:$0xf] }
  0x3c   :  { %1244 = vmatpush.bf16.msrb.mxu0 %v1651_v58  ;;  %v2327_v58 = vor.u32 %v2548_v49, %v2326_v48  ;;  %v2476_v33 = vld [vmem:[%s3864_s0 + $0x34c] sm:$0xf0]  ;;  %v1800_v48 = vld [vmem:[%s3864_s0 + $0x170] sm:$0xf0]  ;;  %v2461_v49 = vld [vmem:[%s3864_s0 + $0x2dc] sm:$0xf]  ;;  %v1823_v54 = vor.u32 %v2422_v43, %v1822_v41 }
  0x3d   :  { %1257 = vmatpush.bf16.msrb.mxu1 %v1843_v63  ;;  %v2542_v63 = vld [vmem:[%s3864_s0 + $0x55c] sm:$0xf0]  ;;  %v2039_v42 = vor.u32 %v2476_v33, %v2038_v32  ;;  %v2184_v52 = vld [vmem:[%s3864_s0 + $0x470] sm:$0xf0]  ;;  %v1968_v5 = vld [vmem:[%s3864_s0 + $0x2c0] sm:$0xf0] }
  0x3e   :  { %1282 = vmatpush.bf16.msrb.mxu3 %v2251_v57  ;;  %1270 = vmatpush.bf16.msrb.mxu2 %v2035_v0  ;;  %v2494_v57 = vld [vmem:[%s3864_s0 + $0x3dc] sm:$0xf0]  ;;  %v1702_v0 = vld [vmem:[%s3864_s0 + $0x98] sm:$0xf]  ;;  %v2303_v8 = vor.u32 %v2542_v63, %v2302_v61  ;;  %v2503_v6 = vld [vmem:[%s3864_s0 + $0x42c] sm:$0xf] }
  0x3f   :  { %v2111_v1 = vor.u32 %v2494_v57, %v2110_v55  ;;  %v1703_v10 = vor.u32 %v2392_v2, %v1702_v0  ;;  %v2206_v55 = vld [vmem:[%s3864_s0 + $0x488] sm:$0xf]  ;;  %v2518_v57 = vld [vmem:[%s3864_s0 + $0x49c] sm:$0xf0]  ;;  %v2407_v0 = vld [vmem:[%s3864_s0 + $0x12c] sm:$0xf] }
  0x40   :  { %1245 = vmatpush.bf16.msrb.mxu0 %v1627_v16  ;;  %v1678_v16 = vld [vmem:[%s3864_s0 + $0x68] sm:$0xf]  ;;  %v2455_v2 = vld [vmem:[%s3864_s0 + $0x2ac] sm:$0xf]  ;;  %v2207_v4 = vor.u32 %v2518_v57, %v2206_v55  ;;  %v2160_v7 = vld [vmem:[%s3864_s0 + $0x440] sm:$0xf0] }
  0x41   :  { %1258 = vmatpush.bf16.msrb.mxu1 %v1819_v19  ;;  %v1870_v19 = vld [vmem:[%s3864_s0 + $0x1e8] sm:$0xf]  ;;  %v2497_v21 = vld [vmem:[%s3864_s0 + $0x3fc] sm:$0xf]  ;;  %v2136_v22 = vld [vmem:[%s3864_s0 + $0x410] sm:$0xf0] }
  0x42   :  { %1283 = vmatpush.bf16.msrb.mxu3 %v2227_v15  ;;  %1271 = vmatpush.bf16.msrb.mxu2 %v2011_v20  ;;  %v2536_v15 = vld [vmem:[%s3864_s0 + $0x52c] sm:$0xf0]  ;;  %v2434_v20 = vld [vmem:[%s3864_s0 + $0x1fc] sm:$0xf0]  ;;  %v2139_v28 = vor.u32 %v2497_v21, %v2136_v22  ;;  %v1728_v29 = vld [vmem:[%s3864_s0 + $0xe0] sm:$0xf0] }
  0x43   :  { %1246 = vmatmul.bf16.vlgmr.msrb.gmra.mxu0 %v2863_v11  ;;  %v1871_v25 = vor.u32 %v2434_v20, %v1870_v19  ;;  %v2449_v19 = vld [vmem:[%s3864_s0 + $0x27c] sm:$0xf]  ;;  %v1944_v20 = vld [vmem:[%s3864_s0 + $0x290] sm:$0xf0]  ;;  %v2491_v32 = vld [vmem:[%s3864_s0 + $0x3cc] sm:$0xf] }
  0x44   :  { %1290 = vmatpush.bf16.msra.mxu0 %v1799_v23  ;;  %1259 = vmatmul.bf16.vlgmr.msrb.gmra.mxu1 %v2865_v12  ;;  %v2279_v23 = vor.u32 %v2536_v15, %v2278_v14  ;;  %v2352_v14 = vld [vmem:[%s3864_s0 + $0x5c0] sm:$0xf0]  ;;  %v1971_v15 = vor.u32 %v2455_v2, %v1968_v5  ;;  %v1704_v41 = vld [vmem:[%s3864_s0 + $0xb0] sm:$0xf0]  ;;  %v2479_v55 = vld [vmem:[%s3864_s0 + $0x36c] sm:$0xf] }
  0x45   :  { %1303 = vmatpush.bf16.msra.mxu1 %v1991_v24  ;;  %1272 = vmatmul.bf16.vlgmr.msrb.gmra.mxu2 %v2840_v62  ;;  %v1679_v24 = vor.u32 %v2386_v18, %v1678_v16  ;;  %v2163_v16 = vor.u32 %v2503_v6, %v2160_v7  ;;  %v1752_v18 = vld [vmem:[%s3864_s0 + $0x110] sm:$0xf0]  ;;  %v2112_v33 = vld [vmem:[%s3864_s0 + $0x3e0] sm:$0xf0]  ;;  %v2473_v6 = vld [vmem:[%s3864_s0 + $0x33c] sm:$0xf] }
  0x46   :  { %1316 = vmatpush.bf16.msra.mxu2 %v2183_v27  ;;  %1284 = vmatpush.bf16.msrb.mxu3 %v2203_v30  ;;  %v2530_v27 = vld [vmem:[%s3864_s0 + $0x4fc] sm:$0xf0]  ;;  %v1846_v30 = vld [vmem:[%s3864_s0 + $0x1b8] sm:$0xf]  ;;  %v1896_v43 = vld [vmem:[%s3864_s0 + $0x230] sm:$0xf0] }
  0x47   :  { %v1847_v38 = vor.u32 %v2428_v31, %v1846_v30  ;;  %v2443_v30 = vld [vmem:[%s3864_s0 + $0x24c] sm:$0xf]  ;;  %v1920_v31 = vld [vmem:[%s3864_s0 + $0x260] sm:$0xf0]  ;;  %v1656_v2 = vld [vmem:[%s3864_s0 + $0x50] sm:$0xf0] }
  0x48   :  { %1291 = vmatpush.bf16.msra.mxu0 %v1775_v35  ;;  %v2230_v35 = vld [vmem:[%s3864_s0 + $0x4b8] sm:$0xf]  ;;  %v2064_v57 = vld [vmem:[%s3864_s0 + $0x380] sm:$0xf0]  ;;  %v1848_v5 = vld [vmem:[%s3864_s0 + $0x1d0] sm:$0xf0] }
  0x49   :  { %1304 = vmatpush.bf16.msra.mxu1 %v1967_v36  ;;  %2365 = vmatmul.msk.bf16.vlgmr.msrb.gmra.mxu3 %vm1163_vm1, %v2854_v3  ;;  %v2524_v36 = vld [vmem:[%s3864_s0 + $0x4cc] sm:$0xf0]  ;;  %v2040_v7 = vld [vmem:[%s3864_s0 + $0x350] sm:$0xf0]  ;;  %v1824_v21 = vld [vmem:[%s3864_s0 + $0x1a0] sm:$0xf0] }
  0x4a   :  { %1329 = vmatpush.bf16.msra.mxu3 %v1175_v34  ;;  %1317 = vmatpush.bf16.msra.mxu2 %v2159_v39  ;;  %v2255_v34 = vor.u32 %v2530_v27, %v2254_v26  ;;  %v1630_v39 = vld [vmem:[%s3864_s0 + $0x8] sm:$0xf]  ;;  %v2231_v50 = vor.u32 %v2524_v36, %v2230_v35  ;;  %v2328_v26 = vld [vmem:[%s3864_s0 + $0x590] sm:$0xf0]  ;;  %v1947_v27 = vor.u32 %v2449_v19, %v1944_v20  ;;  %v2539_v36 = vld [vmem:[%s3864_s0 + $0x54c] sm:$0xf] }
  0x4b   :  { %v1631_v53 = vor.u32 %v2374_v40, %v1630_v39  ;;  %v2115_v39 = vor.u32 %v2491_v32, %v2112_v33  ;;  %v2389_v40 = vld [vmem:[%s3864_s0 + $0x9c] sm:$0xf]  ;;  %v2043_v19 = vor.u32 %v2473_v6, %v2040_v7  ;;  %v2419_v20 = vld [vmem:[%s3864_s0 + $0x18c] sm:$0xf]  ;;  %v2208_v33 = vld [vmem:[%s3864_s0 + $0x4a0] sm:$0xf0] }
  0x4c   :  { %1292 = vmatpush.bf16.msra.mxu0 %v1751_v46  ;;  %v782_v46 = vunpack.c.h.b16 %v2964_v56  ;;  %v2509_v56 = vld [vmem:[%s3864_s0 + $0x45c] sm:$0xf]  ;;  %v2467_v22 = vld [vmem:[%s3864_s0 + $0x30c] sm:$0xf]  ;;  %v2447_v6 = vld [vmem:[%s3864_s0 + $0x264] sm:$0xf0] }
  0x4d   :  { %1305 = vmatpush.bf16.msra.mxu1 %v1943_v47  ;;  %v2413_v47 = vld [vmem:[%s3864_s0 + $0x15c] sm:$0xf]  ;;  %v2187_v63 = vor.u32 %v2509_v56, %v2184_v52  ;;  %v2383_v56 = vld [vmem:[%s3864_s0 + $0x6c] sm:$0xf]  ;;  %v1680_v52 = vld [vmem:[%s3864_s0 + $0x80] sm:$0xf0] }
  0x4e   :  { %1330 = vmatpush.bf16.msra.mxu3 %v2351_v45  ;;  %1318 = vmatpush.bf16.msra.mxu2 %v2135_v51  ;;  %v2470_v45 = vld [vmem:[%s3864_s0 + $0x31c] sm:$0xf0]  ;;  %v1992_v51 = vld [vmem:[%s3864_s0 + $0x2f0] sm:$0xf0]  ;;  %v2515_v32 = vld [vmem:[%s3864_s0 + $0x48c] sm:$0xf] }
  0x4f   :  { %v1995_v61 = vor.u32 %v2461_v49, %v1992_v51  ;;  %v2280_v49 = vld [vmem:[%s3864_s0 + $0x530] sm:$0xf0]  ;;  %vm1598_vm9 = vsmask.f32 2304  ;;  %vm1600_vm10 = vcmask 1046532   ;;  %vm1610_vm12 = vcmask 669700  }
  0x50   :  { %1293 = vmatpush.bf16.msra.mxu0 %v1727_v59  ;;  %v1803_v59 = vor.u32 %v2413_v47, %v1800_v48  ;;  %v1707_v47 = vor.u32 %v2389_v40, %v1704_v41  ;;  %v2533_v48 = vld [vmem:[%s3864_s0 + $0x51c] sm:$0xf]  ;;  %v2211_v41 = vor.u32 %v2515_v32, %v2208_v33  ;;  %v1878_v32 = vld [vmem:[%s3864_s0 + $0x1f0] sm:$0xf]  ;;  %v2435_v33 = vld [vmem:[%s3864_s0 + $0x204] sm:$0xf0] }
  0x51   :  { %1306 = vmatpush.bf16.msra.mxu1 %v1919_v60  ;;  %v974_v60 = vpack.c.b16 %v782_v46, %v782_v46  ;;  %vm1601_vm11 = vsmask.f32 6400  ;;  %vm3823_vm13 = vmand %vm1597_vm8, %vm1598_vm9 }
  0x52   :  { %1331 = vmatpush.bf16.msra.mxu3 %v2327_v58  ;;  %1319 = vmatpush.bf16.msra.mxu2 %v2111_v1  ;;  %v2015_v58 = vor.u32 %v2470_v45, %v2014_v44  ;;  %v1776_v1 = vld [vmem:[%s3864_s0 + $0x140] sm:$0xf0]  ;;  %v2485_v44 = vld [vmem:[%s3864_s0 + $0x39c] sm:$0xf]  ;;  %v2088_v45 = vld [vmem:[%s3864_s0 + $0x3b0] sm:$0xf0] }
  0x53   :  { %v2091_v51 = vor.u32 %v2485_v44, %v2088_v45  ;;  %v2459_v44 = vld [vmem:[%s3864_s0 + $0x2c4] sm:$0xf0]  ;;  %v2166_v45 = vld [vmem:[%s3864_s0 + $0x430] sm:$0xf]  ;;  %vm3828_vm14 = vmand %vm1600_vm10, %vm1601_vm11 }
  0x54   :  { %1294 = vmatpush.bf16.msra.mxu0 %v1703_v10  ;;  %v1779_v10 = vor.u32 %v2407_v0, %v1776_v1  ;;  %v2067_v1 = vor.u32 %v2479_v55, %v2064_v57  ;;  %v2453_v55 = vld [vmem:[%s3864_s0 + $0x294] sm:$0xf0]  ;;  %vm3834_vm15 = vmand %vm1610_vm12, %vm1601_vm11 }
  0x55   :  { %1307 = vmatpush.bf16.msra.mxu1 %v1895_v13  ;;  %v2551_v13 = vld [vmem:[%s3864_s0 + $0x5ac] sm:$0xf] }
  0x56   :  { %1332 = vmatpush.bf16.msra.mxu3 %v2303_v8  ;;  %1320 = vmatpush.bf16.msra.mxu2 %v2087_v17  ;;  %v1178_v8 = vsel %vm1167_vm0, %v974_v60, 0  ;;  %v2401_v17 = vld [vmem:[%s3864_s0 + $0xfc] sm:$0xf]  ;;  %v2527_v60 = vld [vmem:[%s3864_s0 + $0x4ec] sm:$0xf] }
  0x58   :  { %1295 = vmatpush.bf16.msra.mxu0 %v1679_v24  ;;  %v1755_v24 = vor.u32 %v2401_v17, %v1752_v18  ;;  %v1632_v17 = vld [vmem:[%s3864_s0 + $0x20] sm:$0xf0] }
  0x59   :  { %1308 = vmatpush.bf16.msra.mxu1 %v1871_v25  ;;  %v2545_v25 = vld [vmem:[%s3864_s0 + $0x57c] sm:$0xf] }
  0x5a   :  { %1333 = vmatpush.bf16.msra.mxu3 %v2279_v23  ;;  %1321 = vmatpush.bf16.msra.mxu2 %v2063_v9  ;;  %v2355_v23 = vor.u32 %v2551_v13, %v2352_v14  ;;  %v2395_v9 = vld [vmem:[%s3864_s0 + $0xcc] sm:$0xf]  ;;  %v2521_v13 = vld [vmem:[%s3864_s0 + $0x4bc] sm:$0xf] }
  0x5b   :  { %v1731_v35 = vor.u32 %v2395_v9, %v1728_v29  ;;  %v2465_v9 = vld [vmem:[%s3864_s0 + $0x2f4] sm:$0xf0]  ;;  %v2190_v29 = vld [vmem:[%s3864_s0 + $0x460] sm:$0xf] }
  0x5c   :  { %1296 = vmatpush.bf16.msra.mxu0 %v1655_v37  ;;  %v2304_v37 = vld [vmem:[%s3864_s0 + $0x560] sm:$0xf0] }
  0x5d   :  { %1309 = vmatpush.bf16.msra.mxu1 %v1847_v38  ;;  %v1923_v38 = vor.u32 %v2443_v30, %v1920_v31  ;;  %v2307_v46 = vor.u32 %v2539_v36, %v2304_v37  ;;  %v2513_v31 = vld [vmem:[%s3864_s0 + $0x474] sm:$0xf0] }
  0x5e   :  { %1334 = vmatpush.bf16.msra.mxu3 %v2255_v34  ;;  %1322 = vmatpush.bf16.msra.mxu2 %v2039_v42  ;;  %v2331_v34 = vor.u32 %v2545_v25, %v2328_v26  ;;  %v2437_v42 = vld [vmem:[%s3864_s0 + $0x21c] sm:$0xf]  ;;  %v1806_v25 = vld [vmem:[%s3864_s0 + $0x160] sm:$0xf]  ;;  %v2417_v26 = vld [vmem:[%s3864_s0 + $0x174] sm:$0xf0]  ;;  %v2191_v40 = vor.u32 %v2513_v31, %v2190_v29 }
  0x5f   :  { %v1807_v37 = vor.u32 %v2417_v26, %v1806_v25  ;;  %v2489_v25 = vld [vmem:[%s3864_s0 + $0x3b4] sm:$0xf0]  ;;  %v2286_v26 = vld [vmem:[%s3864_s0 + $0x520] sm:$0xf]  ;;  %v1686_v29 = vld [vmem:[%s3864_s0 + $0x70] sm:$0xf] }
  0x60   :  { %1297 = vmatpush.bf16.msra.mxu0 %v1631_v53  ;;  %v2431_v53 = vld [vmem:[%s3864_s0 + $0x1ec] sm:$0xf]  ;;  %v2387_v31 = vld [vmem:[%s3864_s0 + $0x84] sm:$0xf0] }
  0x61   :  { %1310 = vmatpush.bf16.msra.mxu1 %v1823_v54  ;;  %v1872_v54 = vld [vmem:[%s3864_s0 + $0x200] sm:$0xf0] }
  0x62   :  { %1335 = vmatpush.bf16.msra.mxu3 %v2231_v50  ;;  %1323 = vmatpush.bf16.msra.mxu2 %v2015_v58  ;;  %v1899_v50 = vor.u32 %v2437_v42, %v1896_v43  ;;  %v2283_v58 = vor.u32 %v2533_v48, %v2280_v49  ;;  %v1875_v0 = vor.u32 %v2431_v53, %v1872_v54  ;;  %v2411_v42 = vld [vmem:[%s3864_s0 + $0x144] sm:$0xf0]  ;;  %v1974_v43 = vld [vmem:[%s3864_s0 + $0x2b0] sm:$0xf]  ;;  %v2405_v53 = vld [vmem:[%s3864_s0 + $0x114] sm:$0xf0] }
  0x63   :  { %1298 = vmatmul.bf16.vlgmr.msra.gmra.mxu0 %v2863_v11  ;;  %v2358_v48 = vld [vmem:[%s3864_s0 + $0x5b0] sm:$0xf]  ;;  %v2555_v49 = vld [vmem:[%s3864_s0 + $0x5c4] sm:$0xf0]  ;;  %v1950_v54 = vld [vmem:[%s3864_s0 + $0x280] sm:$0xf] }
  0x64   :  { %1342 = vmatpush.bf16.msrb.mxu0 %v1803_v59  ;;  %1311 = vmatmul.bf16.vlgmr.msra.gmra.mxu1 %v2865_v12  ;;  %v1683_v59 = vor.u32 %v2383_v56, %v1680_v52  ;;  %v1758_v56 = vld [vmem:[%s3864_s0 + $0x100] sm:$0xf]  ;;  %v2359_v57 = vor.u32 %v2555_v49, %v2358_v48  ;;  %v2477_v48 = vld [vmem:[%s3864_s0 + $0x354] sm:$0xf0] }
  0x65   :  { %1355 = vmatpush.bf16.msrb.mxu1 %v1995_v61  ;;  %1324 = vmatmul.bf16.vlgmr.msra.gmra.mxu2 %v2840_v62  ;;  %v2256_v61 = vld [vmem:[%s3864_s0 + $0x500] sm:$0xf0]  ;;  %v2238_v49 = vld [vmem:[%s3864_s0 + $0x4c0] sm:$0xf] }
  0x66   :  { %1368 = vmatpush.bf16.msrb.mxu2 %v2187_v63  ;;  %1336 = vmatpush.bf16.msra.mxu3 %v2207_v4  ;;  %v2377_v63 = vld [vmem:[%s3864_s0 + $0x3c] sm:$0xf] }
  0x67   :  { %v2425_v4 = vld [vmem:[%s3864_s0 + $0x1bc] sm:$0xf]  ;;  %v1659_v14 = vor.u32 %v2377_v63, %v1656_v2  ;;  %v1759_v63 = vor.u32 %v2405_v53, %v1758_v56  ;;  %v2375_v53 = vld [vmem:[%s3864_s0 + $0x24] sm:$0xf0] }
  0x68   :  { %1343 = vmatpush.bf16.msrb.mxu0 %v1779_v10  ;;  %v2259_v10 = vor.u32 %v2527_v60, %v2256_v61  ;;  %v1851_v18 = vor.u32 %v2425_v4, %v1848_v5  ;;  %v2334_v60 = vld [vmem:[%s3864_s0 + $0x580] sm:$0xf]  ;;  %v2549_v61 = vld [vmem:[%s3864_s0 + $0x594] sm:$0xf0]  ;;  %v2399_v4 = vld [vmem:[%s3864_s0 + $0xe4] sm:$0xf0] }
  0x69   :  { %1356 = vmatpush.bf16.msrb.mxu1 %v1971_v15  ;;  %2366 = vmatmul.msk.bf16.vlgmr.msra.gmra.mxu3 %vm1163_vm1, %v2854_v3  ;;  %v2232_v15 = vld [vmem:[%s3864_s0 + $0x4d0] sm:$0xf0]  ;;  %v1926_v5 = vld [vmem:[%s3864_s0 + $0x250] sm:$0xf]  ;;  %v2335_v7 = vor.u32 %v2549_v61, %v2334_v60 }
  0x6a   :  { %1381 = vmatpush.bf16.msrb.mxu3 %v1178_v8  ;;  %1369 = vmatpush.bf16.msrb.mxu2 %v2163_v16  ;;  %v3355_v8 = vld [vmem:[%s3864_s0 + $0x5e0] sm:$0x33]  ;;  %v2371_v16 = vld [vmem:[%s3864_s0 + $0xc] sm:$0xf] }
  0x6b   :  { %v1635_v30 = vor.u32 %v2371_v16, %v1632_v17  ;;  %v1927_v17 = vor.u32 %v2447_v6, %v1926_v5  ;;  %v784_v60 = vunpack.c.h.b16 %v3355_v8 }
  0x6c   :  { %1344 = vmatpush.bf16.msrb.mxu0 %v1755_v24  ;;  %v2016_v24 = vld [vmem:[%s3864_s0 + $0x320] sm:$0xf0] }
  0x6d   :  { %1357 = vmatpush.bf16.msrb.mxu1 %v1947_v27  ;;  %v2235_v27 = vor.u32 %v2521_v13, %v2232_v15  ;;  %v2495_v13 = vld [vmem:[%s3864_s0 + $0x3e4] sm:$0xf0] }
  0x6e   :  { %1382 = vmatpush.bf16.msrb.mxu3 %v2355_v23  ;;  %1370 = vmatpush.bf16.msrb.mxu2 %v2139_v28  ;;  %v783_v23 = vunpack.c.l.b16 %v3355_v8  ;;  %v1998_v28 = vld [vmem:[%s3864_s0 + $0x2e0] sm:$0xf]  ;;  %v2543_v15 = vld [vmem:[%s3864_s0 + $0x564] sm:$0xf0]  ;;  %v2510_v8 = vld [vmem:[%s3864_s0 + $0x464] sm:$0xf] }
  0x70   :  { %1345 = vmatpush.bf16.msrb.mxu0 %v1731_v35  ;;  %v2019_v35 = vor.u32 %v2467_v22, %v2016_v24  ;;  %v975_v36 = vpack.c.b16 %v783_v23, %v783_v23  ;;  %v2441_v22 = vld [vmem:[%s3864_s0 + $0x234] sm:$0xf0]  ;;  %v2094_v24 = vld [vmem:[%s3864_s0 + $0x3a0] sm:$0xf] }
  0x71   :  { %1358 = vmatpush.bf16.msrb.mxu1 %v1923_v38  ;;  %v1999_v38 = vor.u32 %v2465_v9, %v1998_v28 }
  0x72   :  { %1383 = vmatpush.bf16.msrb.mxu3 %v2331_v34  ;;  %1371 = vmatpush.bf16.msrb.mxu2 %v2115_v39  ;;  %v1827_v34 = vor.u32 %v2419_v20, %v1824_v21  ;;  %v1782_v39 = vld [vmem:[%s3864_s0 + $0x130] sm:$0xf]  ;;  %v2393_v20 = vld [vmem:[%s3864_s0 + $0xb4] sm:$0xf0]  ;;  %v1902_v21 = vld [vmem:[%s3864_s0 + $0x220] sm:$0xf] }
  0x73   :  { %v1903_v9 = vor.u32 %v2441_v22, %v1902_v21  ;;  %v1976_v22 = vld [vmem:[%s3864_s0 + $0x2c8] sm:$0xf0] }
  0x74   :  { %1346 = vmatpush.bf16.msrb.mxu0 %v1707_v47  ;;  %v1181_v47 = vsel %vm1167_vm0, %v975_v36, 0  ;;  %v2483_v36 = vld [vmem:[%s3864_s0 + $0x384] sm:$0xf0] }
  0x75   :  { %1359 = vmatpush.bf16.msrb.mxu1 %v1899_v50  ;;  %v1783_v50 = vor.u32 %v2411_v42, %v1782_v39  ;;  %v1687_v39 = vor.u32 %v2387_v31, %v1686_v29  ;;  %v1760_v31 = vld [vmem:[%s3864_s0 + $0x118] sm:$0xf0] }
  0x76   :  { %1384 = vmatpush.bf16.msrb.mxu3 %v2307_v46  ;;  %1372 = vmatpush.bf16.msrb.mxu2 %v2091_v51  ;;  %v2507_v46 = vld [vmem:[%s3864_s0 + $0x444] sm:$0xf0]  ;;  %v1975_v51 = vor.u32 %v2459_v44, %v1974_v43  ;;  %v2381_v43 = vld [vmem:[%s3864_s0 + $0x54] sm:$0xf0]  ;;  %v1854_v44 = vld [vmem:[%s3864_s0 + $0x1c0] sm:$0xf] }
  0x77   :  { %v2167_v52 = vor.u32 %v2507_v46, %v2166_v45  ;;  %v2429_v45 = vld [vmem:[%s3864_s0 + $0x1d4] sm:$0xf0] }
  0x78   :  { %1347 = vmatpush.bf16.msrb.mxu0 %v1683_v59  ;;  %v2501_v59 = vld [vmem:[%s3864_s0 + $0x414] sm:$0xf0]  ;;  %v1855_v56 = vor.u32 %v2429_v45, %v1854_v44  ;;  %v2444_v44 = vld [vmem:[%s3864_s0 + $0x254] sm:$0xf]  ;;  %v1928_v45 = vld [vmem:[%s3864_s0 + $0x268] sm:$0xf0] }
  0x79   :  { %1360 = vmatpush.bf16.msrb.mxu1 %v1875_v0  ;;  %v1951_v0 = vor.u32 %v2453_v55, %v1950_v54  ;;  %v1830_v54 = vld [vmem:[%s3864_s0 + $0x190] sm:$0xf] }
  0x7a   :  { %1385 = vmatpush.bf16.msrb.mxu3 %v2283_v58  ;;  %1373 = vmatpush.bf16.msrb.mxu2 %v2067_v1  ;;  %v2142_v58 = vld [vmem:[%s3864_s0 + $0x400] sm:$0xf]  ;;  %v1734_v1 = vld [vmem:[%s3864_s0 + $0xd0] sm:$0xf] }
  0x7b   :  { %v2143_v2 = vor.u32 %v2501_v59, %v2142_v58  ;;  %v1735_v16 = vor.u32 %v2399_v4, %v1734_v1  ;;  %v2022_v58 = vld [vmem:[%s3864_s0 + $0x310] sm:$0xf]  ;;  %v2471_v59 = vld [vmem:[%s3864_s0 + $0x324] sm:$0xf0]  ;;  %v2462_v1 = vld [vmem:[%s3864_s0 + $0x2e4] sm:$0xf] }
  0x7c   :  { %1348 = vmatpush.bf16.msrb.mxu0 %v1659_v14  ;;  %v2310_v14 = vld [vmem:[%s3864_s0 + $0x550] sm:$0xf]  ;;  %v2192_v4 = vld [vmem:[%s3864_s0 + $0x478] sm:$0xf0] }
  0x7d   :  { %1361 = vmatpush.bf16.msrb.mxu1 %v1851_v18  ;;  %v1710_v18 = vld [vmem:[%s3864_s0 + $0xa0] sm:$0xf]  ;;  %v2311_v23 = vor.u32 %v2543_v15, %v2310_v14  ;;  %v976_v15 = vpack.c.b16 %v784_v60, %v784_v60 }
  0x7e   :  { %1386 = vmatpush.bf16.msrb.mxu3 %v2259_v10  ;;  %1374 = vmatpush.bf16.msrb.mxu2 %v2043_v19  ;;  %v2118_v10 = vld [vmem:[%s3864_s0 + $0x3d0] sm:$0xf]  ;;  %v1711_v28 = vor.u32 %v2393_v20, %v1710_v18  ;;  %v2408_v18 = vld [vmem:[%s3864_s0 + $0x134] sm:$0xf] }
  0x7f   :  { %v2119_v19 = vor.u32 %v2495_v13, %v2118_v10  ;;  %v2519_v10 = vld [vmem:[%s3864_s0 + $0x4a4] sm:$0xf0]  ;;  %v2023_v13 = vor.u32 %v2471_v59, %v2022_v58  ;;  %v2456_v20 = vld [vmem:[%s3864_s0 + $0x2b4] sm:$0xf]  ;;  %v2486_v58 = vld [vmem:[%s3864_s0 + $0x3a4] sm:$0xf] }
  0x80   :  { %1349 = vmatpush.bf16.msrb.mxu0 %v1635_v30  ;;  %v2095_v30 = vor.u32 %v2489_v25, %v2094_v24  ;;  %v2168_v24 = vld [vmem:[%s3864_s0 + $0x448] sm:$0xf0]  ;;  %v1184_v25 = vsel %vm1167_vm0, %v976_v15, 0  ;;  %v2096_v59 = vld [vmem:[%s3864_s0 + $0x3b8] sm:$0xf0]  ;;  %vm1603_vm0 = vmor %vm3828_vm14, %vm3823_vm13 }
  0x81   :  { %1362 = vmatpush.bf16.msrb.mxu1 %v1827_v34 }
  0x82   :  { %1387 = vmatpush.bf16.msrb.mxu3 %v2235_v27  ;;  %1375 = vmatpush.bf16.msrb.mxu2 %v2019_v35  ;;  %v2537_v27 = vld [vmem:[%s3864_s0 + $0x534] sm:$0xf0]  ;;  %v2070_v35 = vld [vmem:[%s3864_s0 + $0x370] sm:$0xf] }
  0x83   :  { %1350 = vmatmul.bf16.vlgmr.msrb.gmra.mxu0 %v2863_v11  ;;  %v2287_v34 = vor.u32 %v2537_v27, %v2286_v26  ;;  %v2071_v42 = vor.u32 %v2483_v36, %v2070_v35  ;;  %v2552_v27 = vld [vmem:[%s3864_s0 + $0x5b4] sm:$0xf]  ;;  %v2144_v35 = vld [vmem:[%s3864_s0 + $0x418] sm:$0xf0] }
  0x84   :  { %1394 = vmatpush.bf16.msra.mxu0 %v1807_v37  ;;  %1363 = vmatmul.bf16.vlgmr.msrb.gmra.mxu1 %v2865_v12  ;;  %v2262_v37 = vld [vmem:[%s3864_s0 + $0x4f0] sm:$0xf] }
  0x85   :  { %1407 = vmatpush.bf16.msra.mxu1 %v1999_v38  ;;  %1376 = vmatmul.bf16.vlgmr.msrb.gmra.mxu2 %v2840_v62  ;;  %v2531_v38 = vld [vmem:[%s3864_s0 + $0x504] sm:$0xf0] }
  0x86   :  { %1420 = vmatpush.bf16.msra.mxu2 %v2191_v40  ;;  %1388 = vmatpush.bf16.msrb.mxu3 %v2211_v41  ;;  %v1879_v40 = vor.u32 %v2435_v33, %v1878_v32  ;;  %v1662_v41 = vld [vmem:[%s3864_s0 + $0x40] sm:$0xf]  ;;  %v2263_v46 = vor.u32 %v2531_v38, %v2262_v37  ;;  %v2450_v32 = vld [vmem:[%s3864_s0 + $0x284] sm:$0xf]  ;;  %v1952_v33 = vld [vmem:[%s3864_s0 + $0x298] sm:$0xf0] }
  0x87   :  { %v2546_v38 = vld [vmem:[%s3864_s0 + $0x584] sm:$0xf] }
  0x88   :  { %1395 = vmatpush.bf16.msra.mxu0 %v1783_v50  ;;  %v2525_v50 = vld [vmem:[%s3864_s0 + $0x4d4] sm:$0xf0] }
  0x89   :  { %1408 = vmatpush.bf16.msra.mxu1 %v1975_v51  ;;  %2367 = vmatmul.msk.bf16.vlgmr.msrb.gmra.mxu3 %vm1163_vm1, %v2854_v3  ;;  %v1663_v51 = vor.u32 %v2381_v43, %v1662_v41  ;;  %v2239_v61 = vor.u32 %v2525_v50, %v2238_v49  ;;  %v1736_v43 = vld [vmem:[%s3864_s0 + $0xe8] sm:$0xf0]  ;;  %v2540_v50 = vld [vmem:[%s3864_s0 + $0x554] sm:$0xf] }
  0x8a   :  { %1433 = vmatpush.bf16.msra.mxu3 %v1181_v47  ;;  %1421 = vmatpush.bf16.msra.mxu2 %v2167_v52  ;;  %v2046_v47 = vld [vmem:[%s3864_s0 + $0x340] sm:$0xf]  ;;  %v1638_v52 = vld [vmem:[%s3864_s0 + $0x10] sm:$0xf] }
  0x8b   :  { %v2047_v55 = vor.u32 %v2477_v48, %v2046_v47  ;;  %v1639_v5 = vor.u32 %v2375_v53, %v1638_v52  ;;  %v2120_v47 = vld [vmem:[%s3864_s0 + $0x3e8] sm:$0xf0]  ;;  %v2390_v53 = vld [vmem:[%s3864_s0 + $0xa4] sm:$0xf] }
  0x8c   :  { %1396 = vmatpush.bf16.msra.mxu0 %v1759_v63  ;;  %v2414_v63 = vld [vmem:[%s3864_s0 + $0x164] sm:$0xf] }
  0x8d   :  { %1409 = vmatpush.bf16.msra.mxu1 %v1951_v0  ;;  %v1808_v0 = vld [vmem:[%s3864_s0 + $0x178] sm:$0xf0] }
  0x8e   :  { %1434 = vmatpush.bf16.msra.mxu3 %v2359_v57  ;;  %1422 = vmatpush.bf16.msra.mxu2 %v2143_v2  ;;  %v2423_v57 = vld [vmem:[%s3864_s0 + $0x1a4] sm:$0xf0]  ;;  %v2000_v2 = vld [vmem:[%s3864_s0 + $0x2f8] sm:$0xf0]  ;;  %v1811_v14 = vor.u32 %v2414_v63, %v1808_v0  ;;  %v2534_v63 = vld [vmem:[%s3864_s0 + $0x524] sm:$0xf] }
  0x8f   :  { %v1831_v6 = vor.u32 %v2423_v57, %v1830_v54  ;;  %v1712_v54 = vld [vmem:[%s3864_s0 + $0xb8] sm:$0xf0] }
  0x90   :  { %1397 = vmatpush.bf16.msra.mxu0 %v1735_v16  ;;  %v2003_v16 = vor.u32 %v2462_v1, %v2000_v2  ;;  %v1904_v57 = vld [vmem:[%s3864_s0 + $0x238] sm:$0xf0]  ;;  %v2099_v2 = vor.u32 %v2486_v58, %v2096_v59 }
  0x91   :  { %1410 = vmatpush.bf16.msra.mxu1 %v1927_v17  ;;  %v2195_v17 = vor.u32 %v2510_v8, %v2192_v4  ;;  %v2288_v0 = vld [vmem:[%s3864_s0 + $0x538] sm:$0xf0]  ;;  %v2384_v8 = vld [vmem:[%s3864_s0 + $0x74] sm:$0xf]  ;;  %v1688_v4 = vld [vmem:[%s3864_s0 + $0x88] sm:$0xf0] }
  0x92   :  { %1435 = vmatpush.bf16.msra.mxu3 %v2335_v7  ;;  %1423 = vmatpush.bf16.msra.mxu2 %v2119_v19  ;;  %v2214_v7 = vld [vmem:[%s3864_s0 + $0x490] sm:$0xf]  ;;  %v1784_v19 = vld [vmem:[%s3864_s0 + $0x148] sm:$0xf0]  ;;  %v2291_v15 = vor.u32 %v2534_v63, %v2288_v0 }
  0x93   :  { %v2215_v21 = vor.u32 %v2519_v10, %v2214_v7  ;;  %v1787_v26 = vor.u32 %v2408_v18, %v1784_v19  ;;  %v1880_v7 = vld [vmem:[%s3864_s0 + $0x208] sm:$0xf0]  ;;  %v2480_v10 = vld [vmem:[%s3864_s0 + $0x374] sm:$0xf] }
  0x94   :  { %1398 = vmatpush.bf16.msra.mxu0 %v1711_v28  ;;  %v2360_v28 = vld [vmem:[%s3864_s0 + $0x5c8] sm:$0xf0]  ;;  %v2528_v18 = vld [vmem:[%s3864_s0 + $0x4f4] sm:$0xf] }
  0x95   :  { %1411 = vmatpush.bf16.msra.mxu1 %v1903_v9  ;;  %v1979_v9 = vor.u32 %v2456_v20, %v1976_v22  ;;  %v2363_v36 = vor.u32 %v2552_v27, %v2360_v28  ;;  %v2264_v19 = vld [vmem:[%s3864_s0 + $0x508] sm:$0xf0]  ;;  %v1856_v27 = vld [vmem:[%s3864_s0 + $0x1d8] sm:$0xf0]  ;;  %v2474_v28 = vld [vmem:[%s3864_s0 + $0x344] sm:$0xf] }
  0x96   :  { %1436 = vmatpush.bf16.msra.mxu3 %v2311_v23  ;;  %1424 = vmatpush.bf16.msra.mxu2 %v2095_v30  ;;  %v2504_v23 = vld [vmem:[%s3864_s0 + $0x434] sm:$0xf]  ;;  %v2402_v30 = vld [vmem:[%s3864_s0 + $0x104] sm:$0xf] }
  0x97   :  { %v2171_v29 = vor.u32 %v2504_v23, %v2168_v24  ;;  %v1763_v37 = vor.u32 %v2402_v30, %v1760_v31  ;;  %v2378_v23 = vld [vmem:[%s3864_s0 + $0x44] sm:$0xf]  ;;  %v1664_v24 = vld [vmem:[%s3864_s0 + $0x58] sm:$0xf0] }
  0x98   :  { %1399 = vmatpush.bf16.msra.mxu0 %v1687_v39  ;;  %v2336_v39 = vld [vmem:[%s3864_s0 + $0x598] sm:$0xf0]  ;;  %v1667_v31 = vor.u32 %v2378_v23, %v1664_v24 }
  0x99   :  { %1412 = vmatpush.bf16.msra.mxu1 %v1879_v40  ;;  %v1955_v40 = vor.u32 %v2450_v32, %v1952_v33  ;;  %v2339_v48 = vor.u32 %v2546_v38, %v2336_v39  ;;  %v2522_v32 = vld [vmem:[%s3864_s0 + $0x4c4] sm:$0xf]  ;;  %v2240_v33 = vld [vmem:[%s3864_s0 + $0x4d8] sm:$0xf0]  ;;  %v1640_v38 = vld [vmem:[%s3864_s0 + $0x28] sm:$0xf0] }
  0x9a   :  { %1437 = vmatpush.bf16.msra.mxu3 %v2287_v34  ;;  %1425 = vmatpush.bf16.msra.mxu2 %v2071_v42  ;;  %v2498_v34 = vld [vmem:[%s3864_s0 + $0x404] sm:$0xf]  ;;  %v2396_v42 = vld [vmem:[%s3864_s0 + $0xd4] sm:$0xf] }
  0x9b   :  { %v2147_v41 = vor.u32 %v2498_v34, %v2144_v35  ;;  %v1739_v49 = vor.u32 %v2396_v42, %v1736_v43  ;;  %v2420_v39 = vld [vmem:[%s3864_s0 + $0x194] sm:$0xf]  ;;  %v2024_v43 = vld [vmem:[%s3864_s0 + $0x328] sm:$0xf0] }
  0x9c   :  { %1400 = vmatpush.bf16.msra.mxu0 %v1663_v51  ;;  %v2312_v51 = vld [vmem:[%s3864_s0 + $0x568] sm:$0xf0]  ;;  %v2468_v42 = vld [vmem:[%s3864_s0 + $0x314] sm:$0xf] }
  0x9d   :  { %1413 = vmatpush.bf16.msra.mxu1 %v1855_v56  ;;  %v1931_v56 = vor.u32 %v2444_v44, %v1928_v45  ;;  %v2315_v60 = vor.u32 %v2540_v50, %v2312_v51  ;;  %v2243_v45 = vor.u32 %v2522_v32, %v2240_v33  ;;  %v2027_v51 = vor.u32 %v2468_v42, %v2024_v43 }
  0x9e   :  { %1438 = vmatpush.bf16.msra.mxu3 %v2263_v46  ;;  %1426 = vmatpush.bf16.msra.mxu2 %v2047_v55  ;;  %v2492_v46 = vld [vmem:[%s3864_s0 + $0x3d4] sm:$0xf]  ;;  %v2438_v55 = vld [vmem:[%s3864_s0 + $0x224] sm:$0xf] }
  0x9f   :  { %v2123_v52 = vor.u32 %v2492_v46, %v2120_v47  ;;  %v1907_v1 = vor.u32 %v2438_v55, %v1904_v57  ;;  %v2516_v47 = vld [vmem:[%s3864_s0 + $0x494] sm:$0xf] }
  0xa0   :  { %1401 = vmatpush.bf16.msra.mxu0 %v1639_v5  ;;  %v2432_v5 = vld [vmem:[%s3864_s0 + $0x1f4] sm:$0xf] }
  0xa1   :  { %1414 = vmatpush.bf16.msra.mxu1 %v1831_v6  ;;  %v1195_v6 = vpop.f32.mrf.mxu0 }
  0xa2   :  { %1439 = vmatpush.bf16.msra.mxu3 %v2239_v61  ;;  %1427 = vmatpush.bf16.msra.mxu2 %v2023_v13  ;;  %v1715_v61 = vor.u32 %v2390_v53, %v1712_v54  ;;  %v2072_v13 = vld [vmem:[%s3864_s0 + $0x388] sm:$0xf0] }
  0xa3   :  { %1402 = vmatmul.bf16.vlgmr.msra.gmra.mxu0 %v2863_v11  ;;  %v2075_v22 = vor.u32 %v2480_v10, %v2072_v13 }
  0xa4   :  { %1446 = vmatpush.bf16.msrb.mxu0 %v1811_v14  ;;  %1415 = vmatmul.bf16.vlgmr.msra.gmra.mxu1 %v2865_v12  ;;  %v1208_v14 = vpop.f32.mrf.mxu1 }
  0xa5   :  { %1459 = vmatpush.bf16.msrb.mxu1 %v2003_v16  ;;  %1428 = vmatmul.bf16.vlgmr.msra.gmra.mxu2 %v2840_v62  ;;  %v1209_v16 = vadd.f32 %v1208_v14, %v1195_v6 }
  0xa6   :  { %1472 = vmatpush.bf16.msrb.mxu2 %v2195_v17  ;;  %1440 = vmatpush.bf16.msra.mxu3 %v2215_v21  ;;  %v1691_v17 = vor.u32 %v2384_v8, %v1688_v4  ;;  %v1883_v21 = vor.u32 %v2432_v5, %v1880_v7 }
  0xa8   :  { %1447 = vmatpush.bf16.msrb.mxu0 %v1787_v26  ;;  %v1221_v20 = vpop.f32.mrf.mxu2 }
  0xa9   :  { %1460 = vmatpush.bf16.msrb.mxu1 %v1979_v9  ;;  %2368 = vmatmul.msk.bf16.vlgmr.msra.gmra.mxu3 %vm1163_vm1, %v2854_v3  ;;  %v1222_v26 = vadd.f32 %v1221_v20, %v1209_v16  ;;  %v2048_v9 = vld [vmem:[%s3864_s0 + $0x358] sm:$0xf0] }
  0xaa   :  { %1485 = vmatpush.bf16.msrb.mxu3 %v1184_v25  ;;  %1473 = vmatpush.bf16.msrb.mxu2 %v2171_v29  ;;  %v2426_v25 = vld [vmem:[%s3864_s0 + $0x1c4] sm:$0xf]  ;;  %v2267_v29 = vor.u32 %v2528_v18, %v2264_v19 }
  0xab   :  { %v1859_v35 = vor.u32 %v2426_v25, %v1856_v27 }
  0xac   :  { %1448 = vmatpush.bf16.msrb.mxu0 %v1763_v37  ;;  %v1234_v30 = vpop.f32.mrf.mxu3  ;;  %v2372_v37 = vld [vmem:[%s3864_s0 + $0x14] sm:$0xf]  ;;  %v1210_v44 = vpop.f32.mrf.mxu1 }
  0xad   :  { %1461 = vmatpush.bf16.msrb.mxu1 %v1955_v40  ;;  %v3749_v34 = vadd.f32 %v1234_v30, %v1222_v26  ;;  %v1197_v40 = vpop.f32.mrf.mxu0  ;;  %v1643_v46 = vor.u32 %v2372_v37, %v1640_v38 }
  0xae   :  { %1486 = vmatpush.bf16.msrb.mxu3 %v2363_v36  ;;  %1474 = vmatpush.bf16.msrb.mxu2 %v2147_v41  ;;  %v2051_v36 = vor.u32 %v2474_v28, %v2048_v9  ;;  %v1832_v41 = vld [vmem:[%s3864_s0 + $0x1a8] sm:$0xf0] }
  0xaf   :  { %v1835_v50 = vor.u32 %v2420_v39, %v1832_v41  ;;  %v1499_v37 = vsel %vm1498_vm2, %v3749_v34, 0.0 }
  0xb0   :  { %1449 = vmatpush.bf16.msrb.mxu0 %v1739_v49  ;;  %v1223_v49 = vpop.f32.mrf.mxu2 }
  0xb1   :  { %1462 = vmatpush.bf16.msrb.mxu1 %v1931_v56 }
  0xb2   :  { %1487 = vmatpush.bf16.msrb.mxu3 %v2339_v48  ;;  %1475 = vmatpush.bf16.msrb.mxu2 %v2123_v52  ;;  %v2216_v48 = vld [vmem:[%s3864_s0 + $0x4a8] sm:$0xf0] }
  0xb3   :  { %v2219_v56 = vor.u32 %v2516_v47, %v2216_v48 }
  0xb4   :  { %1450 = vmatpush.bf16.msrb.mxu0 %v1715_v61  ;;  %v1236_v52 = vpop.f32.mrf.mxu3 }
  0xb5   :  { %1463 = vmatpush.bf16.msrb.mxu1 %v1907_v1 }
  0xb6   :  { %1488 = vmatpush.bf16.msrb.mxu3 %v2315_v60  ;;  %1476 = vmatpush.bf16.msrb.mxu2 %v2099_v2 }
  0xb8   :  { %1451 = vmatpush.bf16.msrb.mxu0 %v1691_v17 }
  0xb9   :  { %1464 = vmatpush.bf16.msrb.mxu1 %v1883_v21 }
  0xba   :  { %1489 = vmatpush.bf16.msrb.mxu3 %v2291_v15  ;;  %1477 = vmatpush.bf16.msrb.mxu2 %v2075_v22 }
  0xbc   :  { %1452 = vmatpush.bf16.msrb.mxu0 %v1667_v31 }
  0xbd   :  { %1465 = vmatpush.bf16.msrb.mxu1 %v1859_v35 }
  0xbe   :  { %1490 = vmatpush.bf16.msrb.mxu3 %v2267_v29  ;;  %1478 = vmatpush.bf16.msrb.mxu2 %v2051_v36 }
  0xc0   :  { %1453 = vmatpush.bf16.msrb.mxu0 %v1643_v46  ;;  %v1247_v53 = vpop.f32.mrf.mxu0 }
  0xc1   :  { %1466 = vmatpush.bf16.msrb.mxu1 %v1835_v50  ;;  %v1260_v54 = vpop.f32.mrf.mxu1 }
  0xc2   :  { %1491 = vmatpush.bf16.msrb.mxu3 %v2243_v45  ;;  %1479 = vmatpush.bf16.msrb.mxu2 %v2027_v51  ;;  %v1261_v55 = vadd.f32 %v1260_v54, %v1247_v53 }
  0xc3   :  { %1454 = vmatmul.bf16.vlgmr.msrb.gmra.mxu0 %v2863_v11 }
  0xc4   :  { %1467 = vmatmul.bf16.vlgmr.msrb.gmra.mxu1 %v2865_v12 }
  0xc5   :  { %1480 = vmatmul.bf16.vlgmr.msrb.gmra.mxu2 %v2840_v62 }
  0xc6   :  { %1492 = vmatpush.bf16.msrb.mxu3 %v2219_v56 }
  0xc8   :  { %v1273_v57 = vpop.f32.mrf.mxu2  ;;  %v1249_v59 = vpop.f32.mrf.mxu0 }
  0xc9   :  { %2369 = vmatmul.msk.bf16.vlgmr.msrb.gmra.mxu3 %vm1163_vm1, %v2854_v3  ;;  %v1274_v58 = vadd.f32 %v1273_v57, %v1261_v55  ;;  %v1262_v61 = vpop.f32.mrf.mxu1  ;;  %v2567_v57 = vmov 722.0   ;;  %vm1612_vm1 = vmor %vm3834_vm15, %vm3823_vm13 }
  0xca   :  { %2563 = vrcp.f32 %v2567_v57 }
  0xcc   :  { %v1286_v60 = vpop.f32.mrf.mxu3 }
  0xcd   :  { %v3780_v63 = vadd.f32 %v1286_v60, %v1274_v58 }
  0xcf   :  { %v1500_v35 = vsel %vm1498_vm2, %v3780_v63, 0.0 }
  0xd0   :  { %v1275_v0 = vpop.f32.mrf.mxu2  ;;  %v1501_v41 = vadd.f32 %v1500_v35, %v1499_v37  ;;  %v2564_v58 = vpop.eup %2563 }
  0xd1   :  { %v1514_v59 = vmul.f32 722.0, %v2564_v58  ;;  %vm1518_vm4 = vweird.f32 %v2564_v58 }
  0xd3   :  { %v1515_v60 = vsub.f32 1.0, %v1514_v59 }
  0xd4   :  { %v1288_v11 = vpop.f32.mrf.mxu3 }
  0xd5   :  { %v1516_v61 = vmul.f32 %v2564_v58, %v1515_v60 }
  0xd7   :  { %v1517_v0 = vadd.f32 %v2564_v58, %v1516_v61 }
  0xd9   :  { %v1519_v11 = vsel %vm1518_vm4, %v2564_v58, %v1517_v0 }
  0xe0   :  { %v1299_v1 = vpop.f32.mrf.mxu0 }
  0xe1   :  { %v1312_v2 = vpop.f32.mrf.mxu1 }
  0xe2   :  { %v1313_v12 = vadd.f32 %v1312_v2, %v1299_v1 }
  0xe8   :  { %v1325_v8 = vpop.f32.mrf.mxu2  ;;  %v1301_v4 = vpop.f32.mrf.mxu0 }
  0xe9   :  { %v1326_v62 = vadd.f32 %v1325_v8, %v1313_v12  ;;  %v1314_v3 = vpop.f32.mrf.mxu1 }
  0xec   :  { %v1338_v5 = vpop.f32.mrf.mxu3 }
  0xed   :  { %v3782_v6 = vadd.f32 %v1338_v5, %v1326_v62 }
  0xef   :  { %v1502_v38 = vsel %vm1498_vm2, %v3782_v6, 0.0 }
  0xf0   :  { %v1327_v7 = vpop.f32.mrf.mxu2  ;;  %v1503_v44 = vadd.f32 %v1502_v38, %v1501_v41  ;;  %v1547_v38 = vld [vmem:[%s3866_s2] sm:$0x1f] }
  0xf4   :  { %v1340_v10 = vpop.f32.mrf.mxu3 }
 0x100   :  { %v1351_v13 = vpop.f32.mrf.mxu0 }
 0x101   :  { %v1364_v14 = vpop.f32.mrf.mxu1 }
 0x102   :  { %v1365_v9 = vadd.f32 %v1364_v14, %v1351_v13 }
 0x108   :  { %v1377_v15 = vpop.f32.mrf.mxu2  ;;  %v1353_v17 = vpop.f32.mrf.mxu0 }
 0x109   :  { %v1366_v18 = vpop.f32.mrf.mxu1  ;;  %v1378_v30 = vadd.f32 %v1377_v15, %v1365_v9 }
 0x10c   :  { %v1390_v16 = vpop.f32.mrf.mxu3 }
 0x10d   :  { %v3786_v36 = vadd.f32 %v1390_v16, %v1378_v30 }
 0x10f   :  { %v1504_v42 = vsel %vm1498_vm2, %v3786_v36, 0.0 }
 0x110   :  { %v1379_v19 = vpop.f32.mrf.mxu2  ;;  %v1505_v50 = vadd.f32 %v1504_v42, %v1503_v44  ;;  %v2570_v44 = vmov 1  }
 0x111   :  { %2561 = vset.pattern.permute.xlu2 %v2570_v44  ;;  %2562 = vset.pattern.permute.xlu0 %v2570_v44 }
 0x114   :  { %v1392_v20 = vpop.f32.mrf.mxu3 }
 0x120   :  { %v1403_v21 = vpop.f32.mrf.mxu0 }
 0x121   :  { %v1416_v22 = vpop.f32.mrf.mxu1 }
 0x122   :  { %v1417_v29 = vadd.f32 %v1416_v22, %v1403_v21 }
 0x128   :  { %v1429_v23 = vpop.f32.mrf.mxu2  ;;  %v1405_v24 = vpop.f32.mrf.mxu0 }
 0x129   :  { %v1418_v26 = vpop.f32.mrf.mxu1  ;;  %v1430_v31 = vadd.f32 %v1429_v23, %v1417_v29 }
 0x12c   :  { %v1442_v25 = vpop.f32.mrf.mxu3 }
 0x12d   :  { %v3792_v39 = vadd.f32 %v1442_v25, %v1430_v31 }
 0x12f   :  { %v1506_v47 = vsel %vm1498_vm2, %v3792_v39, 0.0 }
 0x130   :  { %v1431_v27 = vpop.f32.mrf.mxu2  ;;  %v1507_v56 = vadd.f32 %v1506_v47, %v1505_v50 }
 0x134   :  { %v1444_v28 = vpop.f32.mrf.mxu3 }
 0x135   :  { %v2568_v28 = vmov 0  }
 0x136   :  { %2560 = vset.pattern.permute.xlu1 %v2568_v28 }
 0x140   :  { %v1455_v32 = vpop.f32.mrf.mxu0 }
 0x141   :  { %v1468_v33 = vpop.f32.mrf.mxu1 }
 0x142   :  { %v1469_v40 = vadd.f32 %v1468_v33, %v1455_v32 }
 0x148   :  { %v1481_v43 = vpop.f32.mrf.mxu2  ;;  %v1457_v46 = vpop.f32.mrf.mxu0 }
 0x149   :  { %v1482_v45 = vadd.f32 %v1481_v43, %v1469_v40  ;;  %v1470_v48 = vpop.f32.mrf.mxu1 }
 0x14c   :  { %v1494_v49 = vpop.f32.mrf.mxu3 }
 0x14d   :  { %v3798_v51 = vadd.f32 %v1494_v49, %v1482_v45 }
 0x14f   :  { %v1509_v52 = vsel %vm1508_vm3, %v3798_v51, 0.0 }
 0x150   :  { %v1510_v53 = vadd.f32 %v1509_v52, %v1507_v56  ;;  %v1483_v54 = vpop.f32.mrf.mxu2 }
 0x152   :  { %1511 = vadd.xlane.f32.xlu0 %v1510_v53 }
 0x154   :  { %v1496_v55 = vpop.f32.mrf.mxu3 }
 0x1c5   :  { %v1512_v1 = vpop.xlane.xlu0 %1511 }
 0x1c6   :  { %v1520_v2 = vmul.f32 %v1519_v11, %v1512_v1  ;;  %v1607_v1 = vld [vmem:[%s3867_s3 + $0x8] sm:$0x77] }
 0x1c8   :  { %v1521_v12 = vsub.f32 %v3749_v34, %v1520_v2  ;;  %v1522_v8 = vsub.f32 %v3780_v63, %v1520_v2  ;;  %v1523_v62 = vsub.f32 %v3782_v6, %v1520_v2  ;;  %v1524_v4 = vsub.f32 %v3786_v36, %v1520_v2 }
 0x1c9   :  { %v1525_v5 = vsub.f32 %v3792_v39, %v1520_v2  ;;  %v1526_v13 = vsub.f32 %v3798_v51, %v1520_v2 }
 0x1ca   :  { %v1527_v3 = vmul.f32 %v1521_v12, %v1521_v12  ;;  %v1528_v7 = vmul.f32 %v1522_v8, %v1522_v8  ;;  %v1529_v10 = vmul.f32 %v1523_v62, %v1523_v62  ;;  %v1530_v14 = vmul.f32 %v1524_v4, %v1524_v4  ;;  %v1613_v8 = vld [vmem:[%s3867_s3 + $0x10] sm:$0x77] }
 0x1cb   :  { %v1531_v18 = vmul.f32 %v1525_v5, %v1525_v5  ;;  %v1532_v21 = vmul.f32 %v1526_v13, %v1526_v13 }
 0x1cc   :  { %v1533_v15 = vsel %vm1498_vm2, %v1527_v3, 0.0  ;;  %v1534_v16 = vsel %vm1498_vm2, %v1528_v7, 0.0  ;;  %v1536_v19 = vsel %vm1498_vm2, %v1529_v10, 0.0  ;;  %v1538_v22 = vsel %vm1498_vm2, %v1530_v14, 0.0 }
 0x1cd   :  { %v1535_v17 = vadd.f32 %v1534_v16, %v1533_v15  ;;  %v1540_v24 = vsel %vm1498_vm2, %v1531_v18, 0.0  ;;  %v1542_v26 = vsel %vm1508_vm3, %v1532_v21, 0.0 }
 0x1cf   :  { %v1537_v20 = vadd.f32 %v1536_v19, %v1535_v17 }
 0x1d1   :  { %v1539_v23 = vadd.f32 %v1538_v22, %v1537_v20 }
 0x1d3   :  { %v1541_v25 = vadd.f32 %v1540_v24, %v1539_v23 }
 0x1d5   :  { %v1543_v27 = vadd.f32 %v1542_v26, %v1541_v25 }
 0x1d7   :  { %1544 = vadd.xlane.f32.xlu0 %v1543_v27 }
 0x24a   :  { %v1545_v9 = vpop.xlane.xlu0 %1544 }
 0x24b   :  { %v1546_v29 = vmul.f32 %v1545_v9, %v1519_v11  ;;  %v1604_v11 = vld [vmem:[%s3867_s3] sm:$0x77] }
 0x24d   :  { %v1548_v30 = vadd.f32 1e-05, %v1546_v29 }
 0x24f   :  { %2565 = vrsqrt.f32 %v1548_v30  ;;  %vm1555_vm6 = vweird.f32 %v1548_v30 }
 0x255   :  { %v2566_v31 = vpop.eup %2565 }
 0x256   :  { %v1550_v32 = vmul.f32 %v2566_v31, %v1548_v30  ;;  %vm1556_vm5 = vweird.f32 %v2566_v31 }
 0x257   :  { %vm1557_vm7 = vmor %vm1555_vm6, %vm1556_vm5 }
 0x258   :  { %v1551_v33 = vmul.f32 %v2566_v31, %v1550_v32 }
 0x25a   :  { %v1552_v35 = vmul.f32 0.5, %v1551_v33 }
 0x25c   :  { %v1553_v37 = vsub.f32 1.5, %v1552_v35 }
 0x25e   :  { %v1554_v40 = vmul.f32 %v2566_v31, %v1553_v37 }
 0x260   :  { %v1558_v41 = vsel %vm1557_vm7, %v2566_v31, %v1554_v40 }
 0x261   :  { %v1559_v42 = vmul.f32 %v1558_v41, %v1547_v38 }
 0x263   :  { %v1560_v43 = vmul.f32 %v1559_v42, %v1520_v2 }
 0x265   :  { %1562 = vrot.lane.b32.xlu1 %v1560_v43, %s2569_s17 }
 0x26d   :  { %1568 = vperm.xlu1 %2560, %v1559_v42  }
 0x2d7   :  { %v1563_v45 = vpop.permute.xlu1 %1562 }
 0x2d8   :  { %v1565_v46 = vsub.f32 %v1547_v38, %v1563_v45 }
 0x2da   :  { %1579 = vperm.xlu2 %2561, %v1565_v46  }
 0x2df   :  { %v1569_v47 = vpop.permute.xlu1 %1568 }
 0x2e0   :  { %v1571_v48 = vmul.f32 %v1569_v47, %v3749_v34  ;;  %v1572_v49 = vmul.f32 %v1569_v47, %v3780_v63  ;;  %v1573_v50 = vmul.f32 %v1569_v47, %v3782_v6  ;;  %v1574_v56 = vmul.f32 %v1569_v47, %v3786_v36 }
 0x2e1   :  { %v1575_v52 = vmul.f32 %v1569_v47, %v3792_v39  ;;  %v1576_v53 = vmul.f32 %v1569_v47, %v3798_v51 }
 0x334   :  { %v1580_v55 = vpop.permute.xlu2 %1579 }
 0x335   :  { %v1582_v34 = vadd.f32 %v1580_v55, %v1571_v48  ;;  %v1583_v63 = vadd.f32 %v1580_v55, %v1572_v49  ;;  %v1584_v58 = vadd.f32 %v1580_v55, %v1573_v50  ;;  %v1585_v6 = vadd.f32 %v1580_v55, %v1574_v56 }
 0x336   :  { %v1586_v39 = vadd.f32 %v1580_v55, %v1575_v52  ;;  %v1587_v51 = vadd.f32 %v1580_v55, %v1576_v53 }
 0x337   :  { %v1588_v59 = vmax.f32 %v1582_v34, 0.0  ;;  %v1589_v60 = vmax.f32 %v1583_v63, 0.0  ;;  %v1590_v61 = vmax.f32 %v1584_v58, 0.0  ;;  %v1591_v0 = vmax.f32 %v1585_v6, 0.0 }
 0x338   :  { %v1592_v2 = vmax.f32 %v1586_v39, 0.0  ;;  %v1593_v12 = vmax.f32 %v1587_v51, 0.0 }
 0x339   :  { %v1594_v62 = vpack.c.bf16 %v1589_v60, %v1588_v59  ;;  %v1595_v4 = vpack.c.bf16 %v1591_v0, %v1590_v61 }
 0x33a   :  { %v1596_v5 = vpack.c.bf16 %v1593_v12, %v1592_v2 }
 0x33b   :  { %v1605_v3 = vsel %vm1603_vm0, %v1594_v62, %v1604_v11  ;;  %v1608_v7 = vsel %vm1603_vm0, %v1595_v4, %v1607_v1 }
 0x33c   :  { %1606 = vst [vmem:[%s3867_s3] sm:$0x77] %v1605_v3  ;;  %v1614_v10 = vsel %vm1612_vm1, %v1596_v5, %v1613_v8 }
 0x33d   :  { %1609 = vst [vmem:[%s3867_s3 + $0x8] sm:$0x77] %v1608_v7 }
 0x33e   :  { %1615 = vst [vmem:[%s3867_s3 + $0x10] sm:$0x77] %v1614_v10 }

// kernel: feature_extractor_forward.5
= control target key start
LH: loop header
LB: loop body
LE: loop exit
PB: predicated region body
PF: predicated region fallthrough
CT: control target
= control target key end

     0   :  { %vm288_vm0 = vcmask 1041408   ;;  %vm284_vm1 = vcmask 949248   ;;  %vm344_vm2 = vcmask 405504   ;;  %v959_v57 = vmov 50.0   ;;  %s961_s5 = smov 1   ;;  %s963_s12 = smov 103   ;;  %s1285_s0 = inlined_call_operand.vmem [shape: bf16[500,50], index: 0, kind: input, shape index: {}]   ;;  %s1286_s1 = inlined_call_operand.vmem [shape: bf16[5,500], index: 1, kind: input, shape index: {}]   ;;  %s1287_s3 = inlined_call_operand.vmem [shape: f32[360,128], index: 3, kind: input, shape index: {}]   ;;  %s1288_s2 = inlined_call_operand.vmem [shape: f32[2,1], index: 2, kind: input, shape index: {}]   ;;  %s1289_s4 = inlined_call_operand.vmem [shape: f32[2,1], index: 4, kind: output, shape index: {}]  }
   0x1   :  { %v906_v0 = vld [vmem:[%s1285_s0 + $0x38] sm:$0xff]  ;;  %v905_v5 = vld [vmem:[%s1285_s0 + $0x30] sm:$0xff]  ;;  %v904_v10 = vld [vmem:[%s1285_s0 + $0x28] sm:$0xff]  ;;  %945 = vrcp.f32 %v959_v57  ;;  %vm399_vm7 = vcmask 1040384   ;;  %vm415_vm8 = vcmask 203776   ;;  %vm642_vm9 = vcmask 1045504  }
   0x2   :  { %v914_v1 = vld [vmem:[%s1285_s0 + $0x78] sm:$0xff]  ;;  %292 = vmatpush.bf16.msra.mxu0 %v906_v0  ;;  %v913_v6 = vld [vmem:[%s1285_s0 + $0x70] sm:$0xff]  ;;  %v912_v11 = vld [vmem:[%s1285_s0 + $0x68] sm:$0xff]  ;;  %vm638_vm10 = vcmask 244736   ;;  %vm751_vm14 = vcmask 1024  }
   0x3   :  { %v922_v2 = vld [vmem:[%s1285_s0 + $0xb8] sm:$0xff]  ;;  %305 = vmatpush.bf16.msra.mxu1 %v914_v1  ;;  %v921_v7 = vld [vmem:[%s1285_s0 + $0xb0] sm:$0xff]  ;;  %v920_v13 = vld [vmem:[%s1285_s0 + $0xa8] sm:$0xff] }
   0x4   :  { %v81_v3 = vld [vmem:[%s1285_s0 + $0xf8] sm:$0x3]  ;;  %318 = vmatpush.bf16.msra.mxu2 %v922_v2  ;;  %v929_v12 = vld [vmem:[%s1285_s0 + $0xf0] sm:$0xff]  ;;  %v903_v14 = vld [vmem:[%s1285_s0 + $0x20] sm:$0xff] }
   0x5   :  { %v220_v4 = vunpack.c.l.b16 %v81_v3  ;;  %v911_v15 = vld [vmem:[%s1285_s0 + $0x60] sm:$0xff]  ;;  %v928_v16 = vld [vmem:[%s1285_s0 + $0xe8] sm:$0xff]  ;;  %v902_v18 = vld [vmem:[%s1285_s0 + $0x18] sm:$0xff] }
   0x6   :  { %293 = vmatpush.bf16.msra.mxu0 %v905_v5  ;;  %v919_v17 = vld [vmem:[%s1285_s0 + $0xa0] sm:$0xff]  ;;  %v910_v19 = vld [vmem:[%s1285_s0 + $0x58] sm:$0xff]  ;;  %v901_v22 = vld [vmem:[%s1285_s0 + $0x10] sm:$0xff]  ;;  %v960_v5 = vmov 0  }
   0x7   :  { %v252_v8 = vpack.c.b16 %v220_v4, %v220_v4  ;;  %306 = vmatpush.bf16.msra.mxu1 %v913_v6  ;;  %v927_v20 = vld [vmem:[%s1285_s0 + $0xe0] sm:$0xff]  ;;  %v918_v21 = vld [vmem:[%s1285_s0 + $0x98] sm:$0xff]  ;;  %v909_v23 = vld [vmem:[%s1285_s0 + $0x50] sm:$0xff]  ;;  %v946_v58 = vpop.eup %945  ;;  %935 = vset.pattern.permute.xlu1 %v960_v5 }
   0x8   :  { %319 = vmatpush.bf16.msra.mxu2 %v921_v7  ;;  %v926_v24 = vld [vmem:[%s1285_s0 + $0xd8] sm:$0xff]  ;;  %v917_v25 = vld [vmem:[%s1285_s0 + $0x90] sm:$0xff]  ;;  %v900_v26 = vld [vmem:[%s1285_s0 + $0x8] sm:$0xff]  ;;  %v349_v59 = vmul.f32 50.0, %v946_v58  ;;  %vm353_vm3 = vweird.f32 %v946_v58  ;;  %938 = vset.pattern.permute.xlu0 %v960_v5 }
   0x9   :  { %v290_v9 = vsel %vm288_vm0, %v252_v8, 0  ;;  %v908_v27 = vld [vmem:[%s1285_s0 + $0x48] sm:$0xff]  ;;  %v17_v28 = vld [vmem:[%s1286_s1] sm:$0x77]  ;;  %v925_v29 = vld [vmem:[%s1285_s0 + $0xd0] sm:$0xff] }
   0xa   :  { %331 = vmatpush.bf16.msra.mxu3 %v290_v9  ;;  %294 = vmatpush.bf16.msra.mxu0 %v904_v10  ;;  %v916_v30 = vld [vmem:[%s1285_s0 + $0x88] sm:$0xff]  ;;  %v84_v32 = vunpack.c.l.b16 %v17_v28  ;;  %v85_v33 = vunpack.c.h.b16 %v17_v28  ;;  %v899_v34 = vld [vmem:[%s1285_s0] sm:$0xff]  ;;  %v350_v60 = vsub.f32 1.0, %v349_v59 }
   0xb   :  { %307 = vmatpush.bf16.msra.mxu1 %v912_v11  ;;  %v18_v31 = vld [vmem:[%s1286_s1 + $0x8] sm:$0x77]  ;;  %v907_v35 = vld [vmem:[%s1285_s0 + $0x40] sm:$0xff] }
   0xc   :  { %320 = vmatpush.bf16.msra.mxu2 %v920_v13  ;;  %v86_v36 = vunpack.c.l.b16 %v18_v31  ;;  %v924_v37 = vld [vmem:[%s1285_s0 + $0xc8] sm:$0xff]  ;;  %v915_v38 = vld [vmem:[%s1285_s0 + $0x80] sm:$0xff]  ;;  %v88_v39 = vpack.c.b16 %v84_v32, %v84_v32  ;;  %v89_v40 = vpack.c.b16 %v85_v33, %v85_v33  ;;  %v87_v41 = vunpack.c.h.b16 %v18_v31 }
   0xd   :  { %v923_v43 = vld [vmem:[%s1285_s0 + $0xc0] sm:$0xff]  ;;  %v351_v61 = vmul.f32 %v946_v58, %v350_v60 }
   0xe   :  { %332 = vmatpush.bf16.msra.mxu3 %v929_v12  ;;  %295 = vmatpush.bf16.msra.mxu0 %v903_v14  ;;  %v90_v42 = vpack.c.b16 %v86_v36, %v86_v36  ;;  %v91_v44 = vpack.c.b16 %v87_v41, %v87_v41  ;;  %v362_v14 = vld [vmem:[%s1287_s3 + $0x15d] sm:$0x1f]  ;;  %v477_v41 = vld [vmem:[%s1287_s3 + $0x4a] sm:$0x1] }
   0xf   :  { %308 = vmatpush.bf16.msra.mxu1 %v911_v15  ;;  %v352_v62 = vadd.f32 %v946_v58, %v351_v61  ;;  %v513_v36 = vld [vmem:[%s1287_s3 + $0x5b] sm:$0xff] }
  0x10   :  { %321 = vmatpush.bf16.msra.mxu2 %v919_v17 }
  0x11   :  { %v354_v63 = vsel %vm353_vm3, %v946_v58, %v352_v62  ;;  %v599_v62 = vld [vmem:[%s1287_s3 + $0xf6] sm:$0xff] }
  0x12   :  { %333 = vmatpush.bf16.msra.mxu3 %v928_v16  ;;  %296 = vmatpush.bf16.msra.mxu0 %v902_v18 }
  0x13   :  { %309 = vmatpush.bf16.msra.mxu1 %v910_v19  ;;  %v962_v19 = vmov 1  }
  0x14   :  { %322 = vmatpush.bf16.msra.mxu2 %v918_v21  ;;  %936 = vset.pattern.permute.xlu2 %v962_v19 }
  0x16   :  { %334 = vmatpush.bf16.msra.mxu3 %v927_v20  ;;  %297 = vmatpush.bf16.msra.mxu0 %v901_v22  ;;  %v404_v22 = vld [vmem:[%s1287_s3 + $0x18] sm:$0x1] }
  0x17   :  { %310 = vmatpush.bf16.msra.mxu1 %v909_v23  ;;  %v403_v23 = vld [vmem:[%s1287_s3 + $0x10] sm:$0xff] }
  0x18   :  { %323 = vmatpush.bf16.msra.mxu2 %v917_v25 }
  0x1a   :  { %335 = vmatpush.bf16.msra.mxu3 %v926_v24  ;;  %298 = vmatpush.bf16.msra.mxu0 %v900_v26  ;;  %v402_v24 = vld [vmem:[%s1287_s3 + $0x8] sm:$0xff] }
  0x1b   :  { %311 = vmatpush.bf16.msra.mxu1 %v908_v27 }
  0x1c   :  { %324 = vmatpush.bf16.msra.mxu2 %v916_v30 }
  0x1e   :  { %336 = vmatpush.bf16.msra.mxu3 %v925_v29  ;;  %299 = vmatpush.bf16.msra.mxu0 %v899_v34  ;;  %v401_v34 = vld [vmem:[%s1287_s3] sm:$0xff] }
  0x1f   :  { %312 = vmatpush.bf16.msra.mxu1 %v907_v35  ;;  %v514_v35 = vld [vmem:[%s1287_s3 + $0x63] sm:$0x1] }
  0x20   :  { %325 = vmatpush.bf16.msra.mxu2 %v915_v38  ;;  %v511_v38 = vld [vmem:[%s1287_s3 + $0x4b] sm:$0xff] }
  0x21   :  { %300 = vmatmul.bf16.vlgmr.msra.gmra.mxu0 %v88_v39  ;;  %v414_v39 = vld [vmem:[%s1287_s3 + $0x31] sm:$0x1] }
  0x22   :  { %337 = vmatpush.bf16.msra.mxu3 %v924_v37  ;;  %313 = vmatmul.bf16.vlgmr.msra.gmra.mxu1 %v89_v40  ;;  %v512_v37 = vld [vmem:[%s1287_s3 + $0x53] sm:$0xff]  ;;  %v413_v40 = vld [vmem:[%s1287_s3 + $0x29] sm:$0xff] }
  0x23   :  { %326 = vmatmul.bf16.vlgmr.msra.gmra.mxu2 %v90_v42  ;;  %882 = vmatpush.msk.msrb.mxu0 %vm399_vm7, %v414_v39  ;;  %v476_v42 = vld [vmem:[%s1287_s3 + $0x42] sm:$0xff]  ;;  %v670_v39 = vld [vmem:[%s1287_s3 + $0x137] sm:$0x3f] }
  0x24   :  { %884 = vmatpush.msk.msrb.mxu2 %vm399_vm7, %v404_v22  ;;  %608 = vmatpush.msrb.mxu1 %v599_v62  ;;  %v939_v22 = vld [vmem:[%s1287_s3 + $0x7d] ss:$0 sm:$0xff] }
  0x25   :  { %435 = vmatpush.msrb.mxu0 %v413_v40  ;;  %v669_v40 = vld [vmem:[%s1287_s3 + $0x12f] sm:$0xff] }
  0x26   :  { %338 = vmatpush.bf16.msra.mxu3 %v923_v43  ;;  %461 = vmatpush.msrb.mxu2 %v403_v23  ;;  %v412_v43 = vld [vmem:[%s1287_s3 + $0x21] sm:$0xff] }
  0x27   :  { %436 = vmatpush.msrb.mxu0 %v412_v43  ;;  %v942_v43 = vld [vmem:[%s1287_s3 + $0x11e] ss:$0 sm:$0xff] }
  0x28   :  { %462 = vmatpush.msrb.mxu2 %v402_v24 }
  0x29   :  { %881 = vmatmul.msk.bf16.vlgmr.msra.gmra.mxu3 %vm284_vm1, %v91_v44  ;;  %v475_v44 = vld [vmem:[%s1287_s3 + $0x3a] sm:$0xff] }
  0x2a   :  { %463 = vmatpush.msrb.mxu2 %v401_v34  ;;  %888 = vmatpush.msk.msrb.mxu3 %vm399_vm7, %v514_v35  ;;  %v941_v34 = vld [vmem:[%s1287_s3 + $0xff] ss:$0 sm:$0xff] }
  0x2c   :  { %534 = vmatpush.msrb.mxu3 %v513_v36  ;;  %886 = vmatpush.msk.msra.mxu2 %vm399_vm7, %v477_v41  ;;  %v668_v41 = vld [vmem:[%s1287_s3 + $0x127] sm:$0xff] }
  0x2e   :  { %535 = vmatpush.msrb.mxu3 %v512_v37  ;;  %497 = vmatpush.msra.mxu2 %v476_v42  ;;  %v667_v42 = vld [vmem:[%s1287_s3 + $0x11f] sm:$0xff] }
  0x30   :  { %536 = vmatpush.msrb.mxu3 %v511_v38  ;;  %498 = vmatpush.msra.mxu2 %v475_v44 }
  0x32   :  { %894 = vmatpush.msk.msra.mxu3 %vm642_vm9, %v670_v39 }
  0x34   :  { %692 = vmatpush.msra.mxu3 %v669_v40 }
  0x36   :  { %693 = vmatpush.msra.mxu3 %v668_v41 }
  0x38   :  { %694 = vmatpush.msra.mxu3 %v667_v42 }
  0x9e   :  { %v301_v45 = vpop.f32.mrf.mxu0 }
  0x9f   :  { %v314_v46 = vpop.f32.mrf.mxu1 }
  0xa0   :  { %v315_v47 = vadd.f32 %v314_v46, %v301_v45  ;;  %v411_v45 = vld [vmem:[%s1287_s3 + $0x19] sm:$0xff] }
  0xa1   :  { %437 = vmatpush.msrb.mxu0 %v411_v45  ;;  %v474_v46 = vld [vmem:[%s1287_s3 + $0x32] sm:$0xff] }
  0xa2   :  { %499 = vmatpush.msra.mxu2 %v474_v46 }
  0xa6   :  { %v327_v48 = vpop.f32.mrf.mxu2  ;;  %v303_v50 = vpop.f32.mrf.mxu0 }
  0xa7   :  { %v328_v49 = vadd.f32 %v327_v48, %v315_v47  ;;  %v316_v51 = vpop.f32.mrf.mxu1  ;;  %v551_v47 = vld [vmem:[%s1287_s3 + $0x7c] sm:$0x1]  ;;  %v550_v48 = vld [vmem:[%s1287_s3 + $0x74] sm:$0xff]  ;;  %v548_v50 = vld [vmem:[%s1287_s3 + $0x64] sm:$0xff] }
  0xa8   :  { %890 = vmatpush.msk.msra.mxu0 %vm399_vm7, %v551_v47  ;;  %v703_v47 = vld [vmem:[%s1287_s3 + $0x156] sm:$0x3f] }
  0xaa   :  { %571 = vmatpush.msra.mxu0 %v550_v48  ;;  %v702_v48 = vld [vmem:[%s1287_s3 + $0x14e] sm:$0xff] }
  0xac   :  { %v340_v52 = vpop.f32.mrf.mxu3 }
  0xad   :  { %v341_v53 = vadd.f32 %v340_v52, %v328_v49  ;;  %v549_v49 = vld [vmem:[%s1287_s3 + $0x6c] sm:$0xff] }
  0xae   :  { %v329_v55 = vpop.f32.mrf.mxu2  ;;  %572 = vmatpush.msra.mxu0 %v549_v49  ;;  %v701_v49 = vld [vmem:[%s1287_s3 + $0x146] sm:$0xff] }
  0xaf   :  { %v345_v54 = vsel %vm344_vm2, %v341_v53, 0.0 }
  0xb0   :  { %346 = vadd.xlane.f32.xlu0 %v345_v54  ;;  %573 = vmatpush.msra.mxu0 %v548_v50  ;;  %v700_v50 = vld [vmem:[%s1287_s3 + $0x13e] sm:$0xff] }
  0xb4   :  { %v342_v56 = vpop.f32.mrf.mxu3 }
 0x123   :  { %v347_v0 = vpop.xlane.xlu0 %346 }
 0x124   :  { %v355_v1 = vmul.f32 %v354_v63, %v347_v0  ;;  %v597_v0 = vld [vmem:[%s1287_s3 + $0xe6] sm:$0xff] }
 0x126   :  { %v356_v2 = vsub.f32 %v341_v53, %v355_v1 }
 0x128   :  { %v357_v3 = vmul.f32 %v356_v2, %v356_v2  ;;  %v595_v2 = vld [vmem:[%s1287_s3 + $0xd6] sm:$0xff] }
 0x12a   :  { %v358_v4 = vsel %vm344_vm2, %v357_v3, 0.0  ;;  %v594_v3 = vld [vmem:[%s1287_s3 + $0xce] sm:$0xff] }
 0x12b   :  { %359 = vadd.xlane.f32.xlu0 %v358_v4  ;;  %v593_v4 = vld [vmem:[%s1287_s3 + $0xc6] sm:$0xff] }
 0x19e   :  { %v360_v6 = vpop.xlane.xlu0 %359 }
 0x19f   :  { %v361_v7 = vmul.f32 %v360_v6, %v354_v63  ;;  %v598_v63 = vld [vmem:[%s1287_s3 + $0xee] sm:$0xff]  ;;  %v591_v6 = vld [vmem:[%s1287_s3 + $0xb6] sm:$0xff] }
 0x1a0   :  { %609 = vmatpush.msrb.mxu1 %v598_v63 }
 0x1a1   :  { %v363_v8 = vadd.f32 1e-05, %v361_v7  ;;  %v590_v7 = vld [vmem:[%s1287_s3 + $0xae] sm:$0xff] }
 0x1a2   :  { %610 = vmatpush.msrb.mxu1 %v597_v0 }
 0x1a3   :  { %947 = vrsqrt.f32 %v363_v8  ;;  %vm370_vm5 = vweird.f32 %v363_v8 }
 0x1a9   :  { %v948_v9 = vpop.eup %947 }
 0x1aa   :  { %v365_v10 = vmul.f32 %v948_v9, %v363_v8  ;;  %vm371_vm4 = vweird.f32 %v948_v9  ;;  %v589_v8 = vld [vmem:[%s1287_s3 + $0xa6] sm:$0xff] }
 0x1ab   :  { %vm372_vm6 = vmor %vm370_vm5, %vm371_vm4 }
 0x1ac   :  { %v366_v11 = vmul.f32 %v948_v9, %v365_v10  ;;  %v587_v10 = vld [vmem:[%s1287_s3 + $0x96] sm:$0xff] }
 0x1ae   :  { %v367_v12 = vmul.f32 0.5, %v366_v11  ;;  %v586_v11 = vld [vmem:[%s1287_s3 + $0x8e] sm:$0xff] }
 0x1b0   :  { %v368_v13 = vsub.f32 1.5, %v367_v12  ;;  %v585_v12 = vld [vmem:[%s1287_s3 + $0x86] sm:$0xff] }
 0x1b2   :  { %v369_v15 = vmul.f32 %v948_v9, %v368_v13  ;;  %v584_v13 = vld [vmem:[%s1287_s3 + $0x7e] sm:$0xff] }
 0x1b4   :  { %v373_v16 = vsel %vm372_vm6, %v948_v9, %v369_v15  ;;  %v588_v9 = vld [vmem:[%s1287_s3 + $0x9e] sm:$0xff] }
 0x1b5   :  { %v374_v17 = vmul.f32 %v373_v16, %v362_v14 }
 0x1b7   :  { %v375_v18 = vmul.f32 %v374_v17, %v355_v1  ;;  %v596_v1 = vld [vmem:[%s1287_s3 + $0xde] sm:$0xff] }
 0x1b8   :  { %611 = vmatpush.msrb.mxu1 %v596_v1 }
 0x1b9   :  { %377 = vrot.lane.b32.xlu1 %v375_v18, %s961_s5 }
 0x1ba   :  { %612 = vmatpush.msrb.mxu1 %v595_v2 }
 0x1bc   :  { %613 = vmatpush.msrb.mxu1 %v594_v3 }
 0x1be   :  { %614 = vmatpush.msrb.mxu1 %v593_v4 }
 0x1c1   :  { %383 = vperm.xlu1 %935, %v374_v17  }
 0x22b   :  { %v378_v20 = vpop.permute.xlu1 %377 }
 0x22c   :  { %v380_v21 = vsub.f32 %v362_v14, %v378_v20  ;;  %v583_v14 = vld [vmem:[%s1288_s2] sm:$0x3] }
 0x22e   :  { %389 = vperm.xlu2 %936, %v380_v21  }
 0x233   :  { %v384_v25 = vpop.permute.xlu1 %383 }
 0x234   :  { %v386_v26 = vmul.f32 %v384_v25, %v341_v53 }
 0x236   :  { %937 = vset.pattern.permute.xlu2 %v960_v5  ;;  %v592_v5 = vld [vmem:[%s1287_s3 + $0xbe] sm:$0xff] }
 0x237   :  { %615 = vmatpush.msrb.mxu1 %v592_v5 }
 0x239   :  { %616 = vmatpush.msrb.mxu1 %v591_v6 }
 0x23b   :  { %617 = vmatpush.msrb.mxu1 %v590_v7 }
 0x23d   :  { %618 = vmatpush.msrb.mxu1 %v589_v8 }
 0x23f   :  { %619 = vmatpush.msrb.mxu1 %v588_v9 }
 0x241   :  { %620 = vmatpush.msrb.mxu1 %v587_v10 }
 0x243   :  { %621 = vmatpush.msrb.mxu1 %v586_v11 }
 0x245   :  { %622 = vmatpush.msrb.mxu1 %v585_v12 }
 0x247   :  { %623 = vmatpush.msrb.mxu1 %v584_v13 }
 0x288   :  { %v390_v27 = vpop.permute.xlu2 %389 }
 0x289   :  { %v392_v28 = vadd.f32 %v390_v27, %v386_v26  ;;  %v635_v27 = vld [vmem:[%s1287_s3 + $0x118] sm:$0x3f] }
 0x28b   :  { %v393_v29 = vmax.f32 %v392_v28, 0.0  ;;  %v634_v28 = vld [vmem:[%s1287_s3 + $0x110] sm:$0xff] }
 0x28d   :  { %407 = vrot.lane.b32.xlu1 %v393_v29, %s963_s12  ;;  %v405_v30 = vrot.slane %v393_v29, 1  ;;  %v395_v31 = vrot.slane %v393_v29, 7  ;;  %v505_v32 = vrot.slane %v393_v29, 3  ;;  %v468_v33 = vrot.slane %v393_v29, 2 }
 0x28e   :  { %v542_v59 = vrot.slane %v393_v29, 4 }
 0x28f   :  { %470 = vrot.lane.b32.xlu0 %v405_v30, %s963_s12  ;;  %396 = vrot.lane.b32.xlu2 %v395_v31, %s963_s12  ;;  %v940_v31 = vld [vmem:[%s1287_s3 + $0xfe] ss:$0 sm:$0xff] }
 0x295   :  { %544 = vrot.lane.b32.xlu1 %v505_v32, %s963_s12 }
 0x297   :  { %507 = vrot.lane.b32.xlu2 %v468_v33, %s963_s12 }
 0x29f   :  { %603 = vperm.xlu2 %937, %v583_v14  }
 0x2e9   :  { %v397_v51 = vpop.permute.xlu2 %396 }
 0x2ea   :  { %v400_v52 = vsel %vm399_vm7, %v393_v29, %v397_v51  ;;  %v633_v29 = vld [vmem:[%s1287_s3 + $0x108] sm:$0xff]  ;;  %v943_v51 = vld [vmem:[%s1287_s3 + $0x13d] ss:$0 sm:$0xff] }
 0x2eb   :  { %885 = vmatmul.msk.f32.vlgmr.msrb.gmra.mxu2 %vm415_vm8, %v400_v52 }
 0x2ec   :  { %892 = vmatpush.msk.msrb.mxu2 %vm642_vm9, %v635_v27 }
 0x2ee   :  { %659 = vmatpush.msrb.mxu2 %v634_v28 }
 0x2f0   :  { %660 = vmatpush.msrb.mxu2 %v633_v29 }
 0x2f1   :  { %v508_v53 = vpop.permute.xlu2 %507 }
 0x2f2   :  { %v510_v54 = vsel %vm399_vm7, %v505_v32, %v508_v53 }
 0x2f3   :  { %889 = vmatmul.msk.f32.vlgmr.msrb.gmra.mxu3 %vm415_vm8, %v510_v54 }
 0x2f9   :  { %v604_v32 = vpop.permute.xlu2 %603 }
 0x2ff   :  { %v408_v55 = vpop.permute.xlu1 %407 }
 0x300   :  { %v410_v56 = vsel %vm399_vm7, %v405_v30, %v408_v55  ;;  %v632_v30 = vld [vmem:[%s1287_s3 + $0x100] sm:$0xff]  ;;  %v944_v55 = vld [vmem:[%s1287_s3 + $0x15c] ss:$0 sm:$0xff] }
 0x301   :  { %v471_v57 = vpop.permute.xlu0 %470  ;;  %883 = vmatmul.msk.f32.vlgmr.msrb.gmra.mxu0 %vm415_vm8, %v410_v56  ;;  %661 = vmatpush.msrb.mxu2 %v632_v30 }
 0x302   :  { %v473_v58 = vsel %vm399_vm7, %v468_v33, %v471_v57  ;;  %v607_v33 = vmul.f32 %v940_v31, %v604_v32  ;;  %896 = vmatpush.msk.msrb.mxu0 %vm642_vm9, %v703_v47 }
 0x303   :  { %887 = vmatmul.msk.f32.vlgmr.msra.gmra.mxu2 %vm415_vm8, %v473_v58 }
 0x304   :  { %725 = vmatpush.msrb.mxu0 %v702_v48 }
 0x306   :  { %726 = vmatpush.msrb.mxu0 %v701_v49 }
 0x307   :  { %v545_v60 = vpop.permute.xlu1 %544 }
 0x308   :  { %v547_v61 = vsel %vm399_vm7, %v542_v59, %v545_v60  ;;  %727 = vmatpush.msrb.mxu0 %v700_v50 }
 0x309   :  { %891 = vmatmul.msk.f32.vlgmr.msra.gmra.mxu0 %vm415_vm8, %v547_v61 }
 0x36e   :  { %v465_v15 = vpop.f32.mrf.mxu2 }
 0x376   :  { %v538_v20 = vpop.f32.mrf.mxu3 }
 0x37e   :  { %v439_v16 = vpop.f32.mrf.mxu0 }
 0x37f   :  { %v466_v17 = vadd.f32 %v465_v15, %v439_v16 }
 0x386   :  { %v501_v18 = vpop.f32.mrf.mxu2  ;;  %v575_v23 = vpop.f32.mrf.mxu0 }
 0x387   :  { %v504_v19 = vadd.f32 %v501_v18, %v466_v17 }
 0x389   :  { %v541_v21 = vadd.f32 %v538_v20, %v504_v19 }
 0x38b   :  { %v578_v24 = vadd.f32 %v575_v23, %v541_v21 }
 0x38d   :  { %v581_v25 = vadd.f32 %v939_v22, %v578_v24 }
 0x38f   :  { %v582_v26 = vmax.f32 %v581_v25, 0.0 }
 0x391   :  { %624 = vmatmul.f32.vlgmr.msrb.gmra.mxu1 %v582_v26 }
 0x40e   :  { %v625_v35 = vpop.f32.mrf.mxu1 }
 0x40f   :  { %v626_v36 = vadd.f32 %v625_v35, %v607_v33 }
 0x411   :  { %v630_v37 = vadd.f32 %v941_v34, %v626_v36 }
 0x413   :  { %949 = vtanh.f32 %v630_v37 }
 0x419   :  { %v950_v38 = vpop.eup %949 }
 0x41a   :  { %893 = vmatmul.msk.f32.vlgmr.msrb.gmra.mxu2 %vm638_vm10, %v950_v38 }
 0x49d   :  { %v663_v44 = vpop.f32.mrf.mxu2 }
 0x49e   :  { %v664_v45 = vadd.f32 %v942_v43, %v663_v44 }
 0x4a0   :  { %951 = vtanh.f32 %v664_v45 }
 0x4a6   :  { %v952_v46 = vpop.eup %951 }
 0x4a7   :  { %895 = vmatmul.msk.f32.vlgmr.msra.gmra.mxu3 %vm638_vm10, %v952_v46 }
 0x52a   :  { %v696_v52 = vpop.f32.mrf.mxu3 }
 0x52b   :  { %v697_v53 = vadd.f32 %v943_v51, %v696_v52 }
 0x52d   :  { %953 = vtanh.f32 %v697_v53 }
 0x533   :  { %v954_v54 = vpop.eup %953 }
 0x534   :  { %897 = vmatmul.msk.f32.vlgmr.msrb.gmra.mxu0 %vm638_vm10, %v954_v54 }
 0x5b1   :  { %v729_v56 = vpop.f32.mrf.mxu0 }
 0x5b2   :  { %v730_v57 = vadd.f32 %v944_v55, %v729_v56 }
 0x5b4   :  { %v898_v58 = vmul.f32 -1.442695, %v730_v57 }
 0x5b6   :  { %955 = vpow2.f32 %v898_v58 }
 0x5bc   :  { %v956_v59 = vpop.eup %955 }
 0x5bd   :  { %v735_v60 = vadd.f32 1.0, %v956_v59 }
 0x5bf   :  { %957 = vrcp.f32 %v735_v60  ;;  %v747_v0 = vand.u32 2147483648, %v735_v60  ;;  %v745_v2 = vand.u32 2147483647, %v735_v60  ;;  %vm741_vm12 = vweird.f32 %v735_v60 }
 0x5c1   :  { %v748_v4 = vor.u32 1.1754944e-38, %v747_v0  ;;  %vm746_vm15 = vcmp.eq.f32.partialorder %v745_v2, 8.507059e+37 }
 0x5c5   :  { %v958_v61 = vpop.eup %957 }
 0x5c6   :  { %v737_v62 = vmul.f32 %v958_v61, %v735_v60  ;;  %vm742_vm11 = vweird.f32 %v958_v61 }
 0x5c7   :  { %vm743_vm13 = vmor %vm741_vm12, %vm742_vm11 }
 0x5c8   :  { %v738_v63 = vsub.f32 1.0, %v737_v62 }
 0x5ca   :  { %v739_v1 = vmul.f32 %v958_v61, %v738_v63 }
 0x5cc   :  { %v740_v3 = vadd.f32 %v958_v61, %v739_v1 }
 0x5ce   :  { %v744_v5 = vsel %vm743_vm13, %v958_v61, %v740_v3 }
 0x5cf   :  { %v749_v6 = vsel %vm746_vm15, %v748_v4, %v744_v5 }
 0x5d0   :  { %752 = vst.msk [vmem:[%s1289_s4] sm:$0x3] %vm751_vm14, %v749_v6 }

</bundles_post_ra>
